<compile_context>
chip_gen: v6e
topology: v6e:2x2x1
jax: 0.10.0
libtpu: 0.0.40
codegen_flags: <defaults>
</compile_context>

<pallas_src>
import jax
import jax.numpy as jnp
from jax.experimental import pallas as pl
from jax.experimental.pallas import tpu as pltpu

IN_FEATURES = 6100            # fc1 input width (kept unpadded)
H1, H2, H3, OUT = 256, 128, 64, 1


def _round_up(x, m):
    return ((x + m - 1) // m) * m


def classifier_kernel(x_ref, w1_ref, b1_ref, w2_ref, b2_ref,
                      w3_ref, b3_ref, w4_ref, b4_ref, o_ref):
    # fc1 + ReLU.  x may be f32 while W1 is bf16 -> cast x to W1's dtype for the
    # MXU; accumulation stays f32.  (No-op cast in the all-f32 configuration.)
    h = jnp.dot(x_ref[...].astype(w1_ref.dtype), w1_ref[...],
                preferred_element_type=jnp.float32)
    h = jnp.maximum(h + b1_ref[...], 0.0)
    # fc2 + ReLU (W2/W3 and activations stay f32 -- they are tiny).
    h = jnp.dot(h, w2_ref[...], preferred_element_type=jnp.float32)
    h = jnp.maximum(h + b2_ref[...], 0.0)
    # fc3 + ReLU
    h = jnp.dot(h, w3_ref[...], preferred_element_type=jnp.float32)
    h = jnp.maximum(h + b3_ref[...], 0.0)
    # fc4: out_features == 1 -> keep it off the MXU (VPU multiply + XLU reduce).
    o_ref[...] = jnp.sum(h * w4_ref[...], axis=-1, keepdims=True) + b4_ref[...]


def prepare_params(params, w1_dtype=jnp.float32):
    """One-time parameter prep (hoisted out of the hot path).

    Weights are stored transposed vs. PyTorch, i.e. (in_features, out_features),
    so every layer is x @ W + b.  Biases become (1, N) rows, W4 becomes a (1, 64)
    row for the VPU reduction.  Only W1 may be stored in bf16 (recommended on
    v6e/v7x); everything else stays f32.
    """
    w1, b1, w2, b2, w3, b3, w4, b4 = params
    return (w1.astype(w1_dtype),
            b1.reshape(1, -1).astype(jnp.float32),
            w2.astype(jnp.float32), b2.reshape(1, -1).astype(jnp.float32),
            w3.astype(jnp.float32), b3.reshape(1, -1).astype(jnp.float32),
            w4.reshape(1, -1).astype(jnp.float32),
            b4.reshape(1, -1).astype(jnp.float32))


def classifier_forward(x, prepared, *, tb=256):
    """x: (B, 6100) (or (B, ...) flattening to 6100).  Returns (B, 1) float32."""
    w1, b1, w2, b2, w3, b3, w4, b4 = prepared
    x = x.reshape(x.shape[0], -1)          # == x.view(x.shape[0], -1)
    B = x.shape[0]
    assert x.shape[1] == IN_FEATURES

    # Batch tile:
    #   * large B: `tb`-row tiles (256 fills the 256-wide MXU on v6e/v7x;
    #     sweep tb=512 on v6e/v5e's 128 MiB VMEM).
    #   * B <= tb: split the batch in two so the "parallel" grid axis feeds
    #     both v7x TensorCores; round to a sublane multiple of 8.
    if B > tb:
        TB = tb
    else:
        TB = _round_up(max(pl.cdiv(B, 2), 1), 8)
    n_tiles = pl.cdiv(B, TB)               # ragged edge block is masked by Pallas

    # --- VMEM budget: 2x streamed x tile + single-buffered params + out tiles.
    w_itemsize = jnp.dtype(w1.dtype).itemsize
    w1_vmem = _round_up(IN_FEATURES, 16) * H1 * w_itemsize
    param_vmem = w1_vmem + H1 * H2 * 4 + H2 * H3 * 4 + (64 << 10)   # + bias rows
    x_tile_vmem = TB * _round_up(IN_FEATURES, 128) * x.dtype.itemsize
    out_tile_vmem = TB * 128 * 4
    vmem_limit = int(2 * x_tile_vmem + param_vmem + 2 * out_tile_vmem
                     + w1_vmem             # slack in case W1 is still 2x-buffered
                     + (8 << 20))          # activations + compiler scratch

    param_hbm = (IN_FEATURES * H1 * w_itemsize + (H1 * H2 + H2 * H3) * 4
                 + (H1 + H2 + H3 + H3 + OUT) * 4)
    cost = pl.CostEstimate(
        flops=2 * B * (IN_FEATURES * H1 + H1 * H2 + H2 * H3 + H3 * OUT),
        transcendentals=0,
        bytes_accessed=int(B * IN_FEATURES * x.dtype.itemsize + param_hbm
                           + B * OUT * 4),
    )

    def resident(shape):
        # Constant index_map -> loaded once and VMEM-resident across the grid;
        # Buffered(1) avoids a useless second (double-buffer) copy in VMEM.
        return pl.BlockSpec(shape, lambda i: (0, 0), pipeline_mode=pl.Buffered(1))

    out = pl.pallas_call(
        classifier_kernel,
        out_shape=jax.ShapeDtypeStruct((B, OUT), jnp.float32),
        grid_spec=pltpu.PrefetchScalarGridSpec(
            num_scalar_prefetch=0,
            grid=(n_tiles,),
            in_specs=[
                pl.BlockSpec((TB, IN_FEATURES), lambda i: (i, 0)),  # x streams
                resident((IN_FEATURES, H1)),                        # W1
                resident((1, H1)),                                  # b1
                resident((H1, H2)),                                 # W2
                resident((1, H2)),                                  # b2
                resident((H2, H3)),                                 # W3
                resident((1, H3)),                                  # b3
                resident((1, H3)),                                  # w4 row (1, 64)
                resident((1, OUT)),                                 # b4
            ],
            out_specs=pl.BlockSpec((TB, OUT), lambda i: (i, 0)),
        ),
        compiler_params=pltpu.CompilerParams(
            dimension_semantics=("parallel",),   # shard batch over v7x's 2 TCs
            vmem_limit_bytes=vmem_limit,
        ),
        cost_estimate=cost,
    )(x, w1, b1, w2, b2, w3, b3, w4, b4)
    return out


def init_params(key):
    """Deterministic init matching the nn.Linear shapes (stored transposed)."""
    ks = jax.random.split(key, 8)

    def lin(kw, kb, fan_in, fan_out):
        bound = 1.0 / jnp.sqrt(fan_in)
        w = jax.random.uniform(kw, (fan_in, fan_out), jnp.float32, -bound, bound)
        b = jax.random.uniform(kb, (fan_out,), jnp.float32, -bound, bound)
        return w, b

    w1, b1 = lin(ks[0], ks[1], IN_FEATURES, H1)
    w2, b2 = lin(ks[2], ks[3], H1, H2)
    w3, b3 = lin(ks[4], ks[5], H2, H3)
    w4, b4 = lin(ks[6], ks[7], H3, OUT)
    return (w1, b1, w2, b2, w3, b3, w4, b4)


def reference_forward(x, params):
    w1, b1, w2, b2, w3, b3, w4, b4 = params
    h = jnp.maximum(x @ w1 + b1, 0.0)
    h = jnp.maximum(h @ w2 + b2, 0.0)
    h = jnp.maximum(h @ w3 + b3, 0.0)
    return h @ w4 + b4


if __name__ == "__main__":
    key = jax.random.PRNGKey(0)
    kx, kp = jax.random.split(key)
    B = 2
    x = jax.random.normal(kx, (B, IN_FEATURES), jnp.float32)
    params = init_params(kp)
    ref = reference_forward(x, params)

    # f32 weights (exact-parity configuration).
    out = classifier_forward(x, prepare_params(params, w1_dtype=jnp.float32))
    out = jax.block_until_ready(out)
    assert out.shape == (B, 1), out.shape
    assert jnp.allclose(out, ref, atol=5e-3, rtol=5e-3), (out, ref)

    # bf16-W1 configuration (recommended default on v6e/v7x): looser tolerance.
    out_bf16 = classifier_forward(x, prepare_params(params, w1_dtype=jnp.bfloat16))
    out_bf16 = jax.block_until_ready(out_bf16)
    assert jnp.allclose(out_bf16, ref, atol=5e-2, rtol=5e-2), (out_bf16, ref)

    print("KERNEL_OK")
</pallas_src>

<mosaic_0001>
module attributes {stable_mosaic.version = 11 : i64} {
  func.func @classifier_kernel(%arg0: i32, %arg1: memref<8x6100xf32, #tpu.memory_space<vmem>>, %arg2: memref<6100x256xf32, #tpu.memory_space<vmem>>, %arg3: memref<1x256xf32, #tpu.memory_space<vmem>>, %arg4: memref<256x128xf32, #tpu.memory_space<vmem>>, %arg5: memref<1x128xf32, #tpu.memory_space<vmem>>, %arg6: memref<128x64xf32, #tpu.memory_space<vmem>>, %arg7: memref<1x64xf32, #tpu.memory_space<vmem>>, %arg8: memref<1x64xf32, #tpu.memory_space<vmem>>, %arg9: memref<1x1xf32, #tpu.memory_space<vmem>>, %arg10: memref<8x1xf32, #tpu.memory_space<vmem>>) attributes {dimension_semantics = [#tpu.dimension_semantics<parallel>], iteration_bounds = array<i64: 1>, scalar_prefetch = 0 : i64, scratch_operands = 0 : i64, tpu.core_type = #tpu.core_type<tc>, window_params = [{transform_indices = @transform_0, window_bounds = array<i64: 8, 6100>}, {pipeline_mode = #tpu.pipeline_mode<synchronous>, transform_indices = @transform_1, window_bounds = array<i64: 6100, 256>}, {pipeline_mode = #tpu.pipeline_mode<synchronous>, transform_indices = @transform_2, window_bounds = array<i64: 1, 256>}, {pipeline_mode = #tpu.pipeline_mode<synchronous>, transform_indices = @transform_3, window_bounds = array<i64: 256, 128>}, {pipeline_mode = #tpu.pipeline_mode<synchronous>, transform_indices = @transform_4, window_bounds = array<i64: 1, 128>}, {pipeline_mode = #tpu.pipeline_mode<synchronous>, transform_indices = @transform_5, window_bounds = array<i64: 128, 64>}, {pipeline_mode = #tpu.pipeline_mode<synchronous>, transform_indices = @transform_6, window_bounds = array<i64: 1, 64>}, {pipeline_mode = #tpu.pipeline_mode<synchronous>, transform_indices = @transform_7, window_bounds = array<i64: 1, 64>}, {pipeline_mode = #tpu.pipeline_mode<synchronous>, transform_indices = @transform_8, window_bounds = array<i64: 1, 1>}, {transform_indices = @transform_9, window_bounds = array<i64: 8, 1>}]} {
    %c0 = arith.constant 0 : index
    %c0_0 = arith.constant 0 : index
    %0 = vector.load %arg1[%c0, %c0_0] : memref<8x6100xf32, #tpu.memory_space<vmem>>, vector<8x6100xf32>
    %c0_1 = arith.constant 0 : index
    %c0_2 = arith.constant 0 : index
    %1 = vector.load %arg2[%c0_1, %c0_2] : memref<6100x256xf32, #tpu.memory_space<vmem>>, vector<6100x256xf32>
    %cst = arith.constant dense<0.000000e+00> : vector<8x256xf32>
    %2 = tpu.matmul %0, %1, %cst {dimension_numbers = #tpu.dot_dimension_numbers<[1], [0], [0], [1], [0, 0, 1, 1], [], []>} : vector<8x6100xf32>, vector<6100x256xf32>, vector<8x256xf32> -> vector<8x256xf32>
    %c0_3 = arith.constant 0 : index
    %c0_4 = arith.constant 0 : index
    %3 = vector.load %arg3[%c0_3, %c0_4] : memref<1x256xf32, #tpu.memory_space<vmem>>, vector<1x256xf32>
    %4 = vector.broadcast %3 : vector<1x256xf32> to vector<8x256xf32>
    %5 = arith.addf %2, %4 : vector<8x256xf32>
    %cst_5 = arith.constant 0.000000e+00 : f32
    %6 = vector.broadcast %cst_5 : f32 to vector<8x256xf32>
    %7 = arith.maximumf %5, %6 : vector<8x256xf32>
    %c0_6 = arith.constant 0 : index
    %c0_7 = arith.constant 0 : index
    %8 = vector.load %arg4[%c0_6, %c0_7] : memref<256x128xf32, #tpu.memory_space<vmem>>, vector<256x128xf32>
    %cst_8 = arith.constant dense<0.000000e+00> : vector<8x128xf32>
    %9 = tpu.matmul %7, %8, %cst_8 {dimension_numbers = #tpu.dot_dimension_numbers<[1], [0], [0], [1], [0, 0, 1, 1], [], []>} : vector<8x256xf32>, vector<256x128xf32>, vector<8x128xf32> -> vector<8x128xf32>
    %c0_9 = arith.constant 0 : index
    %c0_10 = arith.constant 0 : index
    %10 = vector.load %arg5[%c0_9, %c0_10] : memref<1x128xf32, #tpu.memory_space<vmem>>, vector<1x128xf32>
    %11 = vector.broadcast %10 : vector<1x128xf32> to vector<8x128xf32>
    %12 = arith.addf %9, %11 : vector<8x128xf32>
    %cst_11 = arith.constant 0.000000e+00 : f32
    %13 = vector.broadcast %cst_11 : f32 to vector<8x128xf32>
    %14 = arith.maximumf %12, %13 : vector<8x128xf32>
    %c0_12 = arith.constant 0 : index
    %c0_13 = arith.constant 0 : index
    %15 = vector.load %arg6[%c0_12, %c0_13] : memref<128x64xf32, #tpu.memory_space<vmem>>, vector<128x64xf32>
    %cst_14 = arith.constant dense<0.000000e+00> : vector<8x64xf32>
    %16 = tpu.matmul %14, %15, %cst_14 {dimension_numbers = #tpu.dot_dimension_numbers<[1], [0], [0], [1], [0, 0, 1, 1], [], []>} : vector<8x128xf32>, vector<128x64xf32>, vector<8x64xf32> -> vector<8x64xf32>
    %c0_15 = arith.constant 0 : index
    %c0_16 = arith.constant 0 : index
    %17 = vector.load %arg7[%c0_15, %c0_16] : memref<1x64xf32, #tpu.memory_space<vmem>>, vector<1x64xf32>
    %18 = vector.broadcast %17 : vector<1x64xf32> to vector<8x64xf32>
    %19 = arith.addf %16, %18 : vector<8x64xf32>
    %cst_17 = arith.constant 0.000000e+00 : f32
    %20 = vector.broadcast %cst_17 : f32 to vector<8x64xf32>
    %21 = arith.maximumf %19, %20 : vector<8x64xf32>
    %c0_18 = arith.constant 0 : index
    %c0_19 = arith.constant 0 : index
    %22 = vector.load %arg8[%c0_18, %c0_19] : memref<1x64xf32, #tpu.memory_space<vmem>>, vector<1x64xf32>
    %23 = vector.broadcast %22 : vector<1x64xf32> to vector<8x64xf32>
    %24 = arith.mulf %21, %23 : vector<8x64xf32>
    %cst_20 = arith.constant dense<0.000000e+00> : vector<8xf32>
    %25 = vector.multi_reduction <add>, %24, %cst_20 [1] : vector<8x64xf32> to vector<8xf32>
    %26 = vector.shape_cast %25 : vector<8xf32> to vector<8x1xf32>
    %c0_21 = arith.constant 0 : index
    %c0_22 = arith.constant 0 : index
    %27 = vector.load %arg9[%c0_21, %c0_22] : memref<1x1xf32, #tpu.memory_space<vmem>>, vector<1x1xf32>
    %28 = vector.broadcast %27 : vector<1x1xf32> to vector<8x1xf32>
    %29 = arith.addf %26, %28 : vector<8x1xf32>
    %c0_23 = arith.constant 0 : index
    %c0_24 = arith.constant 0 : index
    %30 = vector.load %arg10[%c0_23, %c0_24] : memref<8x1xf32, #tpu.memory_space<vmem>>, vector<8x1xf32>
    tpu.vector_store %arg10[%c0_23, %c0_24], %29 {strides = array<i32>} : memref<8x1xf32, #tpu.memory_space<vmem>>, vector<8x1xf32>,
    return
  }
  func.func @transform_0(%arg0: i32) -> (i32, i32) {
    %c0_i32 = arith.constant 0 : i32
    %c0_i32_0 = arith.constant 0 : i32
    return %arg0, %c0_i32 : i32, i32
  }
  func.func @transform_1(%arg0: i32) -> (i32, i32) {
    %c0_i32 = arith.constant 0 : i32
    %c0_i32_0 = arith.constant 0 : i32
    %c0_i32_1 = arith.constant 0 : i32
    return %c0_i32, %c0_i32_0 : i32, i32
  }
  func.func @transform_2(%arg0: i32) -> (i32, i32) {
    %c0_i32 = arith.constant 0 : i32
    %c0_i32_0 = arith.constant 0 : i32
    %c0_i32_1 = arith.constant 0 : i32
    return %c0_i32, %c0_i32_0 : i32, i32
  }
  func.func @transform_3(%arg0: i32) -> (i32, i32) {
    %c0_i32 = arith.constant 0 : i32
    %c0_i32_0 = arith.constant 0 : i32
    %c0_i32_1 = arith.constant 0 : i32
    return %c0_i32, %c0_i32_0 : i32, i32
  }
  func.func @transform_4(%arg0: i32) -> (i32, i32) {
    %c0_i32 = arith.constant 0 : i32
    %c0_i32_0 = arith.constant 0 : i32
    %c0_i32_1 = arith.constant 0 : i32
    return %c0_i32, %c0_i32_0 : i32, i32
  }
  func.func @transform_5(%arg0: i32) -> (i32, i32) {
    %c0_i32 = arith.constant 0 : i32
    %c0_i32_0 = arith.constant 0 : i32
    %c0_i32_1 = arith.constant 0 : i32
    return %c0_i32, %c0_i32_0 : i32, i32
  }
  func.func @transform_6(%arg0: i32) -> (i32, i32) {
    %c0_i32 = arith.constant 0 : i32
    %c0_i32_0 = arith.constant 0 : i32
    %c0_i32_1 = arith.constant 0 : i32
    return %c0_i32, %c0_i32_0 : i32, i32
  }
  func.func @transform_7(%arg0: i32) -> (i32, i32) {
    %c0_i32 = arith.constant 0 : i32
    %c0_i32_0 = arith.constant 0 : i32
    %c0_i32_1 = arith.constant 0 : i32
    return %c0_i32, %c0_i32_0 : i32, i32
  }
  func.func @transform_8(%arg0: i32) -> (i32, i32) {
    %c0_i32 = arith.constant 0 : i32
    %c0_i32_0 = arith.constant 0 : i32
    %c0_i32_1 = arith.constant 0 : i32
    return %c0_i32, %c0_i32_0 : i32, i32
  }
  func.func @transform_9(%arg0: i32) -> (i32, i32) {
    %c0_i32 = arith.constant 0 : i32
    %c0_i32_0 = arith.constant 0 : i32
    return %arg0, %c0_i32 : i32, i32
  }
}

</mosaic_0001>

<bundles_post_ra>
// kernel: tpu_custom_call.1
= control target key start
LH: loop header
LB: loop body
LE: loop exit
PB: predicated region body
PF: predicated region fallthrough
CT: control target
= control target key end

     0   :  { %s4692_s0 = inlined_call_operand.hbm [shape: f32[2,6100], index: 0, kind: input, shape index: {}]   ;;  %s4693_s1 = inlined_call_operand.hbm [shape: f32[6100,256], index: 1, kind: input, shape index: {}]   ;;  %s4694_s2 = inlined_call_operand.hbm [shape: f32[1,256], index: 2, kind: input, shape index: {}]   ;;  %s4695_s3 = inlined_call_operand.hbm [shape: f32[256,128], index: 3, kind: input, shape index: {}]   ;;  %s4696_s4 = inlined_call_operand.hbm [shape: f32[1,128], index: 4, kind: input, shape index: {}]   ;;  %s4697_s5 = inlined_call_operand.vmem [shape: f32[128,64], index: 5, kind: input, shape index: {}]   ;;  %s4698_s6 = inlined_call_operand.hbm [shape: f32[1,64], index: 6, kind: input, shape index: {}]   ;;  %s4699_s7 = inlined_call_operand.hbm [shape: f32[1,64], index: 7, kind: input, shape index: {}]   ;;  %s4700_s8 = inlined_call_operand.<no memory space> [shape: f32[1,1], index: 8, kind: input, shape index: {}]   ;;  %s4701_s9 = inlined_call_operand.vmem [shape: f32[2,1], index: 9, kind: output, shape index: {}]  }
   0x1   :  { %v14_v0 = vstv %s4700_s8 }
   0x2   :  { %15 = vst [vmem:[#allocation2] sm:$0x1] %v14_v0 }
   0x3   :  { %16 = vsyncpa [#allocation4], 0 }
   0x4   :  { %17 = vsyncpa [#allocation6], 0 }
   0x5   :  { %18 = vsyncpa [#allocation9], 0 }
   0x6   :  { %19 = vsyncpa [#allocation12], 0 }
   0x7   :  { %24 = vsyncadd [#allocation4], 4608  ;;  %s4479_s11 = smov [#allocation5]  }
   0x8   :  { %s37_s12 = sshll.u32 %s4479_s11, 4  ;;  %s38_s12 = int_to_ptr.vmem [resolvable:$true] %s37_s12 }
   0x9   :  { %s4339_s13 = scalar_lea.vmem %s38_s12, 195328  ;;  %p4344_p1 = scmp.lt.s32.totalorder %s38_s12, %s38_s12 }
   0xa   :  { %p4340_p0 = scmp.ne.s32.totalorder %s38_s12, %s4339_s13  ;;  %p4345_p2 = scmp.lt.s32.totalorder %s4339_s13, %s4339_s13 }
   0xc   :  { %p4346_p3 = por %p4345_p2, %p4344_p1 }
   0xe   :  { %p4347_p4 = pnand %p4346_p3, %p4340_p0 }
  0x10   :  { %4350 = shalt.err (!%p4347_p4)
}
  0x11   :  { %s4480_s14 = smov 256   ;;  %s4481_s15 = smov 16  }
  0x12   :  { %43 = dma.hbm_to_vmem [thread:$0]  %s4693_s1, 195328, %s38_s12, [#allocation6], %s4480_s14, %s4480_s14, %s4481_s15  }
  0x13   :  { %s4482_s17 = smov [#allocation8]  }
  0x14   :  { %s59_s18 = sshll.u32 %s4482_s17, 4  ;;  %s60_s18 = int_to_ptr.vmem [resolvable:$true] %s59_s18 }
  0x15   :  { %s4359_s19 = scalar_lea.vmem %s60_s18, 4096  ;;  %p4364_p6 = scmp.lt.s32.totalorder %s60_s18, %s60_s18 }
  0x16   :  { %p4360_p5 = scmp.ne.s32.totalorder %s60_s18, %s4359_s19  ;;  %p4365_p7 = scmp.lt.s32.totalorder %s4359_s19, %s4359_s19 }
  0x18   :  { %p4366_p8 = por %p4365_p7, %p4364_p6 }
  0x1a   :  { %p4367_p9 = pnand %p4366_p8, %p4360_p5 }
  0x1c   :  { %4370 = shalt.err (!%p4367_p9)
}
  0x1d   :  { %s4483_s20 = smov 128   ;;  %s4484_s21 = smov 8  }
  0x1e   :  { %65 = dma.hbm_to_vmem [thread:$0]  %s4695_s3, 4096, %s60_s18, [#allocation9], %s4483_s20, %s4483_s20, %s4484_s21  }
  0x1f   :  { %s4485_s24 = smov [#allocation11]   ;;  %s4486_s26 = smov [#allocation3]  }
  0x20   :  { %s84_s25 = sshll.u32 %s4485_s24, 4  ;;  %s25_s1 = sshll.u32 %s4486_s26, 4  ;;  %s85_s25 = int_to_ptr.vmem [resolvable:$true] %s84_s25  ;;  %s26_s1 = int_to_ptr.vmem [resolvable:$true] %s25_s1 }
  0x21   :  { %s4379_s27 = scalar_lea.vmem %s85_s25, 16  ;;  %s4383_s28 = scalar_lea.vmem %s85_s25, 32 }
  0x22   :  { %p4380_p10 = scmp.ne.s32.totalorder %s85_s25, %s4379_s27  ;;  %p4384_p11 = scmp.lt.s32.totalorder %s85_s25, %s85_s25 }
  0x23   :  { %p4385_p12 = scmp.lt.s32.totalorder %s4383_s28, %s4379_s27 }
  0x25   :  { %p4386_p13 = por %p4385_p12, %p4384_p11 }
  0x27   :  { %p4387_p0 = pnand %p4386_p13, %p4380_p10 }
  0x29   :  { %4390 = shalt.err (!%p4387_p0)
}
  0x2a   :  { %87 = dma.hbm_to_vmem [thread:$0]  %s4698_s6, 16, %s85_s25, [#allocation12]  }
  0x2b   :  { %s4399_s10 = scalar_lea.vmem %s26_s1, 1536  ;;  %s4403_s3 = scalar_lea.vmem %s26_s1, 6144 }
  0x2c   :  { %p4400_p1 = scmp.ne.s32.totalorder %s26_s1, %s4399_s10  ;;  %p4404_p2 = scmp.lt.s32.totalorder %s26_s1, %s26_s1 }
  0x2d   :  { %p4405_p3 = scmp.lt.s32.totalorder %s4403_s3, %s4399_s10 }
  0x2f   :  { %p4406_p4 = por %p4405_p3, %p4404_p2 }
  0x31   :  { %p4407_p5 = pnand %p4406_p4, %p4400_p1 }
  0x33   :  { %4410 = shalt.err (!%p4407_p5)
}
  0x34   :  { %s4487_s11 = smov 1536   ;;  %s4488_s12 = smov 96  }
  0x35   :  { %31 = dma.hbm_to_vmem [thread:$0]  %s4692_s0, 1536, %s26_s1, [#allocation4], %s4487_s11, %s4487_s11, %s4488_s12  }
  0x36   :  { %s4489_s15 = smov [#allocation7]   ;;  %s4490_s8 = smov [#allocation10]  }
  0x37   :  { %s50_s16 = sshll.u32 %s4489_s15, 4  ;;  %s72_s17 = sshll.u32 %s4490_s8, 4  ;;  %s51_s16 = int_to_ptr.vmem [resolvable:$true] %s50_s16  ;;  %s73_s17 = int_to_ptr.vmem [resolvable:$true] %s72_s17 }
  0x38   :  { %s4419_s6 = scalar_lea.vmem %s51_s16, 32  ;;  %p4424_p7 = scmp.lt.s32.totalorder %s51_s16, %s51_s16 }
  0x39   :  { %p4420_p6 = scmp.ne.s32.totalorder %s51_s16, %s4419_s6  ;;  %p4425_p8 = scmp.lt.s32.totalorder %s4419_s6, %s4419_s6 }
  0x3b   :  { %p4426_p9 = por %p4425_p8, %p4424_p7 }
  0x3d   :  { %p4427_p10 = pnand %p4426_p9, %p4420_p6 }
  0x3f   :  { %4430 = shalt.err (!%p4427_p10)
}
  0x40   :  { %53 = dma.hbm_to_vmem [thread:$0]  %s4694_s2, 32, %s51_s16, [#allocation6]  }
  0x41   :  { %s4439_s20 = scalar_lea.vmem %s73_s17, 16  ;;  %s4443_s0 = scalar_lea.vmem %s73_s17, 32 }
  0x42   :  { %p4440_p11 = scmp.ne.s32.totalorder %s73_s17, %s4439_s20  ;;  %p4444_p12 = scmp.lt.s32.totalorder %s73_s17, %s73_s17 }
  0x43   :  { %p4445_p13 = scmp.lt.s32.totalorder %s4443_s0, %s4439_s20 }
  0x45   :  { %p4446_p0 = por %p4445_p13, %p4444_p12 }
  0x47   :  { %p4447_p1 = pnand %p4446_p0, %p4440_p11 }
  0x49   :  { %4450 = shalt.err (!%p4447_p1)
}
  0x4a   :  { %75 = dma.hbm_to_vmem [thread:$0]  %s4696_s4, 16, %s73_s17, [#allocation9]  }
  0x4b   :  { %s4491_s23 = smov [#allocation13]  }
  0x4c   :  { %s94_s24 = sshll.u32 %s4491_s23, 4  ;;  %s95_s24 = int_to_ptr.vmem [resolvable:$true] %s94_s24 }
  0x4d   :  { %s4459_s25 = scalar_lea.vmem %s95_s24, 16  ;;  %s4463_s26 = scalar_lea.vmem %s95_s24, 32 }
  0x4e   :  { %p4460_p2 = scmp.ne.s32.totalorder %s95_s24, %s4459_s25  ;;  %p4464_p3 = scmp.lt.s32.totalorder %s95_s24, %s95_s24 }
  0x4f   :  { %p4465_p4 = scmp.lt.s32.totalorder %s4463_s26, %s4459_s25 }
  0x51   :  { %p4466_p5 = por %p4465_p4, %p4464_p3 }
  0x53   :  { %p4467_p6 = pnand %p4466_p5, %p4460_p2 }
  0x55   :  { %4470 = shalt.err (!%p4467_p6)
}
  0x56   :  { %97 = dma.hbm_to_vmem [thread:$0]  %s4699_s7, 16, %s95_s24, [#allocation12]  }
  0x57   :  { %4471 = dma.done.wait [#allocation4], 6144  }
  0x58   :  { %4472 = vsyncadd [#allocation4], 4294961152 }
  0x59   :  { %4473 = dma.done.wait [#allocation6], 195360  }
  0x5a   :  { %4474 = vsyncadd [#allocation6], 4294771936 }
  0x5b   :  { %4475 = dma.done.wait [#allocation9], 4112  }
  0x5c   :  { %4476 = vsyncadd [#allocation9], 4294963184 }
  0x5d   :  { %4477 = dma.done.wait [#allocation12], 32  }
  0x5e   :  { %4478 = vsyncadd [#allocation12], 4294967264  ;;  %v200_v1 = vld [vmem:[#allocation5 + $0xf8] sm:$0xff]  ;;  %v199_v2 = vld [vmem:[#allocation5 + $0xf0] sm:$0xff]  ;;  %vm2237_vm0 = vcmask 1043456   ;;  %vm2234_vm1 = vcmask 687104  }
  0x5f   :  { %v198_v3 = vld [vmem:[#allocation5 + $0xe8] sm:$0xff]  ;;  %2244 = vmatprep.subr.mxu0 %v200_v1  ;;  %v264_v4 = vld [vmem:[#allocation5 + $0x2f8] sm:$0xff]  ;;  %v197_v5 = vld [vmem:[#allocation5 + $0xe0] sm:$0xff]  ;;  %vm4494_vm2 = vmmov 0   ;;  %vm4162_vm3 = vcmask 523264   ;;  %vm4174_vm4 = vcmask 7168  }
  0x60   :  { %v263_v6 = vld [vmem:[#allocation5 + $0x2f0] sm:$0xff]  ;;  %2245 = vmatpush1.msra.mxu0 %v199_v2  ;;  %2315 = vmatprep.subr.mxu1 %v264_v4  ;;  %v196_v7 = vld [vmem:[#allocation5 + $0xd8] sm:$0xff]  ;;  %v262_v8 = vld [vmem:[#allocation5 + $0x2e8] sm:$0xff] }
  0x61   :  { %2246 = vmatprep.subr.mxu0 %v198_v3  ;;  %2316 = vmatpush1.msra.mxu1 %v263_v6  ;;  %v195_v9 = vld [vmem:[#allocation5 + $0xd0] sm:$0xff]  ;;  %v261_v10 = vld [vmem:[#allocation5 + $0x2e0] sm:$0xff]  ;;  %v260_v11 = vld [vmem:[#allocation5 + $0x2d8] sm:$0xff] }
  0x62   :  { %2247 = vmatpush1.msra.mxu0 %v197_v5  ;;  %2317 = vmatprep.subr.mxu1 %v262_v8  ;;  %v194_v12 = vld [vmem:[#allocation5 + $0xc8] sm:$0xff]  ;;  %v259_v13 = vld [vmem:[#allocation5 + $0x2d0] sm:$0xff]  ;;  %v193_v14 = vld [vmem:[#allocation5 + $0xc0] sm:$0xff] }
  0x63   :  { %2248 = vmatprep.subr.mxu0 %v196_v7  ;;  %2318 = vmatpush1.msra.mxu1 %v261_v10  ;;  %v258_v15 = vld [vmem:[#allocation5 + $0x2c8] sm:$0xff]  ;;  %v192_v16 = vld [vmem:[#allocation5 + $0xb8] sm:$0xff]  ;;  %v257_v17 = vld [vmem:[#allocation5 + $0x2c0] sm:$0xff] }
  0x64   :  { %2249 = vmatpush1.msra.mxu0 %v195_v9  ;;  %2319 = vmatprep.subr.mxu1 %v260_v11  ;;  %v191_v18 = vld [vmem:[#allocation5 + $0xb0] sm:$0xff]  ;;  %v256_v19 = vld [vmem:[#allocation5 + $0x2b8] sm:$0xff]  ;;  %v190_v20 = vld [vmem:[#allocation5 + $0xa8] sm:$0xff] }
  0x65   :  { %2250 = vmatprep.subr.mxu0 %v194_v12  ;;  %2320 = vmatpush1.msra.mxu1 %v259_v13  ;;  %v255_v21 = vld [vmem:[#allocation5 + $0x2b0] sm:$0xff]  ;;  %v189_v22 = vld [vmem:[#allocation5 + $0xa0] sm:$0xff]  ;;  %v254_v23 = vld [vmem:[#allocation5 + $0x2a8] sm:$0xff] }
  0x66   :  { %2251 = vmatpush1.msra.mxu0 %v193_v14  ;;  %2321 = vmatprep.subr.mxu1 %v258_v15  ;;  %v188_v24 = vld [vmem:[#allocation5 + $0x98] sm:$0xff]  ;;  %v253_v25 = vld [vmem:[#allocation5 + $0x2a0] sm:$0xff]  ;;  %v187_v26 = vld [vmem:[#allocation5 + $0x90] sm:$0xff] }
  0x67   :  { %2252 = vmatprep.subr.mxu0 %v192_v16  ;;  %2322 = vmatpush1.msra.mxu1 %v257_v17  ;;  %v252_v27 = vld [vmem:[#allocation5 + $0x298] sm:$0xff]  ;;  %v186_v28 = vld [vmem:[#allocation5 + $0x88] sm:$0xff]  ;;  %v251_v29 = vld [vmem:[#allocation5 + $0x290] sm:$0xff] }
  0x68   :  { %2253 = vmatpush1.msra.mxu0 %v191_v18  ;;  %2323 = vmatprep.subr.mxu1 %v256_v19  ;;  %v185_v30 = vld [vmem:[#allocation5 + $0x80] sm:$0xff]  ;;  %v250_v31 = vld [vmem:[#allocation5 + $0x288] sm:$0xff]  ;;  %v184_v32 = vld [vmem:[#allocation5 + $0x78] sm:$0xff] }
  0x69   :  { %2254 = vmatprep.subr.mxu0 %v190_v20  ;;  %2324 = vmatpush1.msra.mxu1 %v255_v21  ;;  %v249_v33 = vld [vmem:[#allocation5 + $0x280] sm:$0xff]  ;;  %v183_v34 = vld [vmem:[#allocation5 + $0x70] sm:$0xff]  ;;  %v248_v35 = vld [vmem:[#allocation5 + $0x278] sm:$0xff] }
  0x6a   :  { %2255 = vmatpush1.msra.mxu0 %v189_v22  ;;  %2325 = vmatprep.subr.mxu1 %v254_v23  ;;  %v182_v36 = vld [vmem:[#allocation5 + $0x68] sm:$0xff]  ;;  %v247_v37 = vld [vmem:[#allocation5 + $0x270] sm:$0xff]  ;;  %v181_v38 = vld [vmem:[#allocation5 + $0x60] sm:$0xff] }
  0x6b   :  { %2256 = vmatprep.subr.mxu0 %v188_v24  ;;  %2326 = vmatpush1.msra.mxu1 %v253_v25  ;;  %v246_v39 = vld [vmem:[#allocation5 + $0x268] sm:$0xff]  ;;  %v180_v40 = vld [vmem:[#allocation5 + $0x58] sm:$0xff]  ;;  %v245_v41 = vld [vmem:[#allocation5 + $0x260] sm:$0xff] }
  0x6c   :  { %2257 = vmatpush1.msra.mxu0 %v187_v26  ;;  %2327 = vmatprep.subr.mxu1 %v252_v27  ;;  %v179_v42 = vld [vmem:[#allocation5 + $0x50] sm:$0xff]  ;;  %v244_v43 = vld [vmem:[#allocation5 + $0x258] sm:$0xff]  ;;  %v178_v44 = vld [vmem:[#allocation5 + $0x48] sm:$0xff] }
  0x6d   :  { %2258 = vmatprep.subr.mxu0 %v186_v28  ;;  %2328 = vmatpush1.msra.mxu1 %v251_v29  ;;  %v243_v45 = vld [vmem:[#allocation5 + $0x250] sm:$0xff]  ;;  %v177_v46 = vld [vmem:[#allocation5 + $0x40] sm:$0xff]  ;;  %v242_v47 = vld [vmem:[#allocation5 + $0x248] sm:$0xff]  ;;  %v1697_v28 = vlaneseq  ;;  %v4492_v29 = vmov 1983009808  }
  0x6e   :  { %2259 = vmatpush1.msra.mxu0 %v185_v30  ;;  %2329 = vmatprep.subr.mxu1 %v250_v31  ;;  %v176_v48 = vld [vmem:[#allocation5 + $0x38] sm:$0xff]  ;;  %v241_v49 = vld [vmem:[#allocation5 + $0x240] sm:$0xff]  ;;  %v175_v50 = vld [vmem:[#allocation5 + $0x30] sm:$0xff]  ;;  %v1760_v30 = vunpack.c.l.s4 %v4492_v29 }
  0x6f   :  { %2260 = vmatprep.subr.mxu0 %v184_v32  ;;  %2330 = vmatpush1.msra.mxu1 %v249_v33  ;;  %v240_v51 = vld [vmem:[#allocation5 + $0x238] sm:$0xff]  ;;  %v174_v52 = vld [vmem:[#allocation5 + $0x28] sm:$0xff]  ;;  %v239_v53 = vld [vmem:[#allocation5 + $0x230] sm:$0xff] }
  0x70   :  { %2261 = vmatpush1.msra.mxu0 %v183_v34  ;;  %2331 = vmatprep.subr.mxu1 %v248_v35  ;;  %v173_v54 = vld [vmem:[#allocation5 + $0x20] sm:$0xff]  ;;  %v238_v55 = vld [vmem:[#allocation5 + $0x228] sm:$0xff]  ;;  %v172_v56 = vld [vmem:[#allocation5 + $0x18] sm:$0xff] }
  0x71   :  { %2262 = vmatprep.subr.mxu0 %v182_v36  ;;  %2332 = vmatpush1.msra.mxu1 %v247_v37  ;;  %v237_v57 = vld [vmem:[#allocation5 + $0x220] sm:$0xff]  ;;  %v171_v58 = vld [vmem:[#allocation5 + $0x10] sm:$0xff]  ;;  %v236_v59 = vld [vmem:[#allocation5 + $0x218] sm:$0xff] }
  0x72   :  { %2263 = vmatpush1.msra.mxu0 %v181_v38  ;;  %2333 = vmatprep.subr.mxu1 %v246_v39  ;;  %v170_v60 = vld [vmem:[#allocation5 + $0x8] sm:$0xff]  ;;  %v235_v61 = vld [vmem:[#allocation5 + $0x210] sm:$0xff]  ;;  %v169_v62 = vld [vmem:[#allocation5] sm:$0xff] }
  0x73   :  { %2264 = vmatprep.subr.mxu0 %v180_v40  ;;  %2334 = vmatpush1.msra.mxu1 %v245_v41  ;;  %v234_v63 = vld [vmem:[#allocation5 + $0x208] sm:$0xff]  ;;  %v232_v0 = vld [vmem:[#allocation5 + $0x1f8] sm:$0xff]  ;;  %v233_v1 = vld [vmem:[#allocation5 + $0x200] sm:$0xff] }
  0x74   :  { %2265 = vmatpush1.msra.mxu0 %v179_v42  ;;  %2335 = vmatprep.subr.mxu1 %v244_v43  ;;  %v231_v2 = vld [vmem:[#allocation5 + $0x1f0] sm:$0xff]  ;;  %v296_v3 = vld [vmem:[#allocation5 + $0x3f8] sm:$0xff]  ;;  %v230_v4 = vld [vmem:[#allocation5 + $0x1e8] sm:$0xff]  ;;  %v4569_v42 = vshrl.u32 %v1697_v28, 7  ;;  %v1761_v43 = vunpack.c.0.s8 %v1760_v30 }
  0x75   :  { %2266 = vmatprep.subr.mxu0 %v178_v44  ;;  %2336 = vmatpush1.msra.mxu1 %v243_v45  ;;  %v295_v5 = vld [vmem:[#allocation5 + $0x3f0] sm:$0xff]  ;;  %v229_v6 = vld [vmem:[#allocation5 + $0x1e0] sm:$0xff]  ;;  %v294_v7 = vld [vmem:[#allocation5 + $0x3e8] sm:$0xff] }
  0x76   :  { %2267 = vmatpush1.msra.mxu0 %v177_v46  ;;  %2337 = vmatprep.subr.mxu1 %v242_v47  ;;  %v228_v8 = vld [vmem:[#allocation5 + $0x1d8] sm:$0xff]  ;;  %v293_v9 = vld [vmem:[#allocation5 + $0x3e0] sm:$0xff]  ;;  %v227_v10 = vld [vmem:[#allocation5 + $0x1d0] sm:$0xff] }
  0x77   :  { %2268 = vmatprep.subr.mxu0 %v176_v48  ;;  %2338 = vmatpush1.msra.mxu1 %v241_v49  ;;  %v292_v11 = vld [vmem:[#allocation5 + $0x3d8] sm:$0xff]  ;;  %v226_v12 = vld [vmem:[#allocation5 + $0x1c8] sm:$0xff]  ;;  %v291_v13 = vld [vmem:[#allocation5 + $0x3d0] sm:$0xff] }
  0x78   :  { %2269 = vmatpush1.msra.mxu0 %v175_v50  ;;  %2339 = vmatprep.subr.mxu1 %v240_v51  ;;  %v225_v14 = vld [vmem:[#allocation5 + $0x1c0] sm:$0xff]  ;;  %v290_v15 = vld [vmem:[#allocation5 + $0x3c8] sm:$0xff]  ;;  %v224_v16 = vld [vmem:[#allocation5 + $0x1b8] sm:$0xff] }
  0x79   :  { %2270 = vmatprep.subr.mxu0 %v174_v52  ;;  %2340 = vmatpush1.msra.mxu1 %v239_v53  ;;  %v289_v17 = vld [vmem:[#allocation5 + $0x3c0] sm:$0xff]  ;;  %v223_v18 = vld [vmem:[#allocation5 + $0x1b0] sm:$0xff]  ;;  %v288_v19 = vld [vmem:[#allocation5 + $0x3b8] sm:$0xff] }
  0x7a   :  { %2271 = vmatpush1.msra.mxu0 %v173_v54  ;;  %2341 = vmatprep.subr.mxu1 %v238_v55  ;;  %v222_v20 = vld [vmem:[#allocation5 + $0x1a8] sm:$0xff]  ;;  %v287_v21 = vld [vmem:[#allocation5 + $0x3b0] sm:$0xff]  ;;  %v221_v22 = vld [vmem:[#allocation5 + $0x1a0] sm:$0xff]  ;;  %v4572_v55 = vsub.s32 %v1761_v43, %v4569_v42 }
  0x7b   :  { %2272 = vmatprep.subr.mxu0 %v172_v56  ;;  %2342 = vmatpush1.msra.mxu1 %v237_v57  ;;  %v286_v23 = vld [vmem:[#allocation5 + $0x3a8] sm:$0xff]  ;;  %v220_v24 = vld [vmem:[#allocation5 + $0x198] sm:$0xff]  ;;  %v285_v25 = vld [vmem:[#allocation5 + $0x3a0] sm:$0xff] }
  0x7c   :  { %2273 = vmatpush1.msra.mxu0 %v171_v58  ;;  %2343 = vmatprep.subr.mxu1 %v236_v59  ;;  %v219_v26 = vld [vmem:[#allocation5 + $0x190] sm:$0xff]  ;;  %v284_v27 = vld [vmem:[#allocation5 + $0x398] sm:$0xff]  ;;  %v218_v31 = vld [vmem:[#allocation5 + $0x188] sm:$0xff] }
  0x7d   :  { %2274 = vmatprep.subr.mxu0 %v170_v60  ;;  %2344 = vmatpush1.msra.mxu1 %v235_v61  ;;  %v283_v32 = vld [vmem:[#allocation5 + $0x390] sm:$0xff]  ;;  %v217_v33 = vld [vmem:[#allocation5 + $0x180] sm:$0xff]  ;;  %v216_v34 = vld [vmem:[#allocation5 + $0x178] sm:$0xff] }
  0x7e   :  { %2275 = vmatpush1.msra.mxu0 %v169_v62  ;;  %2345 = vmatprep.subr.mxu1 %v234_v63  ;;  %v282_v35 = vld [vmem:[#allocation5 + $0x388] sm:$0xff]  ;;  %v215_v36 = vld [vmem:[#allocation5 + $0x170] sm:$0xff]  ;;  %v281_v37 = vld [vmem:[#allocation5 + $0x380] sm:$0xff] }
  0x7f   :  { %2276 = vmatprep.subr.mxu0 %v232_v0  ;;  %2346 = vmatpush1.msra.mxu1 %v233_v1  ;;  %v214_v38 = vld [vmem:[#allocation5 + $0x168] sm:$0xff]  ;;  %v280_v39 = vld [vmem:[#allocation5 + $0x378] sm:$0xff]  ;;  %v279_v40 = vld [vmem:[#allocation5 + $0x370] sm:$0xff] }
  0x80   :  { %2277 = vmatpush2.msra.mxu0 %v231_v2  ;;  %2347 = vmatprep.subr.mxu1 %v296_v3  ;;  %v121_v41 = vld [vmem:[#allocation3] sm:$0xff]  ;;  %v278_v48 = vld [vmem:[#allocation5 + $0x368] sm:$0xff]  ;;  %v212_v49 = vld [vmem:[#allocation5 + $0x158] sm:$0xff] }
  0x81   :  { %2278 = vmatprep.subr.mxu0 %v230_v4  ;;  %2348 = vmatpush2.msra.mxu1 %v295_v5  ;;  %v133_v44 = vld [vmem:[#allocation3 + $0x60] sm:$0xff]  ;;  %v211_v51 = vld [vmem:[#allocation5 + $0x150] sm:$0xff]  ;;  %v276_v52 = vld [vmem:[#allocation5 + $0x358] sm:$0xff] }
  0x82   :  { %2279 = vmatpush2.msra.mxu0 %v229_v6  ;;  %2349 = vmatprep.subr.mxu1 %v294_v7  ;;  %v145_v45 = vld [vmem:[#allocation3 + $0xc0] sm:$0xff]  ;;  %v1755_v53 = vcombine.low %v121_v41, %v133_v44  ;;  %v210_v56 = vld [vmem:[#allocation5 + $0x148] sm:$0xff]  ;;  %v275_v57 = vld [vmem:[#allocation5 + $0x350] sm:$0xff]  ;;  %v1756_v62 = vcombine.high %v121_v41, %v133_v44 }
  0x83   :  { %2280 = vmatprep.subr.mxu0 %v228_v8  ;;  %2350 = vmatpush2.msra.mxu1 %v293_v9  ;;  %v157_v46 = vld [vmem:[#allocation3 + $0x120] sm:$0xff]  ;;  %v274_v59 = vld [vmem:[#allocation5 + $0x348] sm:$0xff]  ;;  %v208_v60 = vld [vmem:[#allocation5 + $0x138] sm:$0xff] }
  0x84   :  { %2281 = vmatpush2.msra.mxu0 %v227_v10  ;;  %2351 = vmatprep.subr.mxu1 %v292_v11  ;;  %v213_v47 = vld [vmem:[#allocation5 + $0x160] sm:$0xff]  ;;  %v1757_v54 = vcombine.low %v145_v45, %v157_v46  ;;  %v207_v63 = vld [vmem:[#allocation5 + $0x130] sm:$0xff]  ;;  %v272_v0 = vld [vmem:[#allocation5 + $0x338] sm:$0xff]  ;;  %v1765_v1 = vrot.slane %v1755_v53, %v4572_v55  ;;  %v1758_v3 = vcombine.high %v145_v45, %v157_v46 }
  0x85   :  { %2282 = vmatprep.subr.mxu0 %v226_v12  ;;  %2352 = vmatpush2.msra.mxu1 %v291_v13  ;;  %v277_v50 = vld [vmem:[#allocation5 + $0x360] sm:$0xff]  ;;  %v206_v4 = vld [vmem:[#allocation5 + $0x128] sm:$0xff]  ;;  %v271_v5 = vld [vmem:[#allocation5 + $0x330] sm:$0xff]  ;;  %v1772_v13 = vrot.slane %v1756_v62, %v4572_v55 }
  0x86   :  { %2283 = vmatpush2.msra.mxu0 %v225_v14  ;;  %2353 = vmatprep.subr.mxu1 %v290_v15  ;;  %v209_v58 = vld [vmem:[#allocation5 + $0x140] sm:$0xff]  ;;  %v1779_v2 = vrot.slane %v1757_v54, %v4572_v55  ;;  %v270_v7 = vld [vmem:[#allocation5 + $0x328] sm:$0xff]  ;;  %v204_v8 = vld [vmem:[#allocation5 + $0x118] sm:$0xff]  ;;  %v1786_v14 = vrot.slane %v1758_v3, %v4572_v55 }
  0x87   :  { %2284 = vmatprep.subr.mxu0 %v224_v16  ;;  %2354 = vmatpush2.msra.mxu1 %v289_v17  ;;  %v273_v61 = vld [vmem:[#allocation5 + $0x340] sm:$0xff]  ;;  %v203_v10 = vld [vmem:[#allocation5 + $0x110] sm:$0xff]  ;;  %v268_v11 = vld [vmem:[#allocation5 + $0x318] sm:$0xff] }
  0x88   :  { %2285 = vmatpush2.msra.mxu0 %v223_v18  ;;  %2355 = vmatprep.subr.mxu1 %v288_v19  ;;  %v205_v6 = vld [vmem:[#allocation5 + $0x120] sm:$0xff]  ;;  %v1788_v12 = vcombine.high %v1765_v1, %v1779_v2  ;;  %v202_v15 = vld [vmem:[#allocation5 + $0x108] sm:$0xff]  ;;  %v267_v17 = vld [vmem:[#allocation5 + $0x310] sm:$0xff]  ;;  %v1787_v18 = vcombine.low %v1765_v1, %v1779_v2 }
  0x89   :  { %2286 = vmatprep.subr.mxu0 %v222_v20  ;;  %2356 = vmatpush2.msra.mxu1 %v287_v21  ;;  %v269_v9 = vld [vmem:[#allocation5 + $0x320] sm:$0xff]  ;;  %v266_v19 = vld [vmem:[#allocation5 + $0x308] sm:$0xff]  ;;  %v328_v20 = vld [vmem:[#allocation5 + $0x4f8] sm:$0xff] }
  0x8a   :  { %2287 = vmatpush2.msra.mxu0 %v221_v22  ;;  %2357 = vmatprep.subr.mxu1 %v286_v23  ;;  %v201_v16 = vld [vmem:[#allocation5 + $0x100] sm:$0xff]  ;;  %v1790_v22 = vcombine.high %v1772_v13, %v1786_v14  ;;  %v327_v23 = vld [vmem:[#allocation5 + $0x4f0] sm:$0xff]  ;;  %v324_v29 = vld [vmem:[#allocation5 + $0x4d8] sm:$0xff] }
  0x8b   :  { %2288 = vmatprep.subr.mxu0 %v220_v24  ;;  %2358 = vmatpush2.msra.mxu1 %v285_v25  ;;  %v265_v21 = vld [vmem:[#allocation5 + $0x300] sm:$0xff]  ;;  %v1789_v24 = vcombine.low %v1772_v13, %v1786_v14  ;;  %v326_v25 = vld [vmem:[#allocation5 + $0x4e8] sm:$0xff]  ;;  %v391_v28 = vld [vmem:[#allocation5 + $0x6f0] sm:$0xff] }
  0x8c   :  { %2289 = vmatpush2.msra.mxu0 %v219_v26  ;;  %2359 = vmatprep.subr.mxu1 %v284_v27  ;;  %v392_v26 = vld [vmem:[#allocation5 + $0x6f8] sm:$0xff]  ;;  %v325_v27 = vld [vmem:[#allocation5 + $0x4e0] sm:$0xff]  ;;  %v390_v30 = vld [vmem:[#allocation5 + $0x6e8] sm:$0xff] }
  0x8d   :  { %2290 = vmatprep.subr.mxu0 %v218_v31  ;;  %2360 = vmatpush2.msra.mxu1 %v283_v32  ;;  %v323_v31 = vld [vmem:[#allocation5 + $0x4d0] sm:$0xff]  ;;  %v389_v32 = vld [vmem:[#allocation5 + $0x6e0] sm:$0xff]  ;;  %v318_v41 = vld [vmem:[#allocation5 + $0x4a8] sm:$0xff] }
  0x8e   :  { %2291 = vmatpush2.msra.mxu0 %v217_v33  ;;  %2361 = vmatprep.subr.mxu1 %v282_v35  ;;  %v322_v33 = vld [vmem:[#allocation5 + $0x4c8] sm:$0xff]  ;;  %v321_v35 = vld [vmem:[#allocation5 + $0x4c0] sm:$0xff]  ;;  %v384_v43 = vld [vmem:[#allocation5 + $0x6b8] sm:$0xff] }
  0x8f   :  { %2292 = vmatprep.subr.mxu0 %v216_v34  ;;  %2362 = vmatpush2.msra.mxu1 %v281_v37  ;;  %v388_v34 = vld [vmem:[#allocation5 + $0x6d8] sm:$0xff]  ;;  %v317_v44 = vld [vmem:[#allocation5 + $0x4a0] sm:$0xff]  ;;  %v383_v45 = vld [vmem:[#allocation5 + $0x6b0] sm:$0xff] }
  0x90   :  { %2293 = vmatpush2.msra.mxu0 %v215_v36  ;;  %2363 = vmatprep.subr.mxu1 %v280_v39  ;;  %v387_v36 = vld [vmem:[#allocation5 + $0x6d0] sm:$0xff]  ;;  %v320_v37 = vld [vmem:[#allocation5 + $0x4b8] sm:$0xff]  ;;  %v373_v2 = vld [vmem:[#allocation5 + $0x660] sm:$0xff] }
  0x91   :  { %2294 = vmatprep.subr.mxu0 %v214_v38  ;;  %2364 = vmatpush2.msra.mxu1 %v279_v40  ;;  %v386_v38 = vld [vmem:[#allocation5 + $0x6c8] sm:$0xff]  ;;  %v319_v39 = vld [vmem:[#allocation5 + $0x4b0] sm:$0xff]  ;;  %v385_v40 = vld [vmem:[#allocation5 + $0x6c0] sm:$0xff] }
  0x92   :  { %2295 = vmatpush2.msra.mxu0 %v213_v47  ;;  %2365 = vmatprep.subr.mxu1 %v278_v48  ;;  %v316_v46 = vld [vmem:[#allocation5 + $0x498] sm:$0xff]  ;;  %v382_v47 = vld [vmem:[#allocation5 + $0x6a8] sm:$0xff]  ;;  %v315_v48 = vld [vmem:[#allocation5 + $0x490] sm:$0xff] }
  0x93   :  { %2296 = vmatprep.subr.mxu0 %v212_v49  ;;  %2366 = vmatpush2.msra.mxu1 %v277_v50  ;;  %v381_v49 = vld [vmem:[#allocation5 + $0x6a0] sm:$0xff]  ;;  %v314_v50 = vld [vmem:[#allocation5 + $0x488] sm:$0xff]  ;;  %v379_v53 = vld [vmem:[#allocation5 + $0x690] sm:$0xff] }
  0x94   :  { %2297 = vmatpush2.msra.mxu0 %v211_v51  ;;  %2367 = vmatprep.subr.mxu1 %v276_v52  ;;  %v380_v51 = vld [vmem:[#allocation5 + $0x698] sm:$0xff]  ;;  %v313_v52 = vld [vmem:[#allocation5 + $0x480] sm:$0xff]  ;;  %v375_v62 = vld [vmem:[#allocation5 + $0x670] sm:$0xff] }
  0x95   :  { %2298 = vmatprep.subr.mxu0 %v210_v56  ;;  %2368 = vmatpush2.msra.mxu1 %v275_v57  ;;  %v312_v54 = vld [vmem:[#allocation5 + $0x478] sm:$0xff]  ;;  %v378_v56 = vld [vmem:[#allocation5 + $0x688] sm:$0xff]  ;;  %v311_v57 = vld [vmem:[#allocation5 + $0x470] sm:$0xff] }
  0x96   :  { %2299 = vmatpush2.msra.mxu0 %v209_v58  ;;  %2369 = vmatprep.subr.mxu1 %v274_v59  ;;  %v377_v58 = vld [vmem:[#allocation5 + $0x680] sm:$0xff]  ;;  %v310_v59 = vld [vmem:[#allocation5 + $0x468] sm:$0xff]  ;;  %v307_v1 = vld [vmem:[#allocation5 + $0x450] sm:$0xff] }
  0x97   :  { %2300 = vmatprep.subr.mxu0 %v208_v60  ;;  %2370 = vmatpush2.msra.mxu1 %v273_v61  ;;  %v376_v60 = vld [vmem:[#allocation5 + $0x678] sm:$0xff]  ;;  %v309_v61 = vld [vmem:[#allocation5 + $0x460] sm:$0xff]  ;;  %v306_v3 = vld [vmem:[#allocation5 + $0x448] sm:$0xff] }
  0x98   :  { %2301 = vmatpush2.msra.mxu0 %v207_v63  ;;  %2371 = vmatprep.subr.mxu1 %v272_v0  ;;  %v308_v63 = vld [vmem:[#allocation5 + $0x458] sm:$0xff]  ;;  %v374_v0 = vld [vmem:[#allocation5 + $0x668] sm:$0xff]  ;;  %v301_v13 = vld [vmem:[#allocation5 + $0x420] sm:$0xff] }
  0x99   :  { %2302 = vmatprep.subr.mxu0 %v206_v4  ;;  %2372 = vmatpush2.msra.mxu1 %v271_v5  ;;  %v372_v4 = vld [vmem:[#allocation5 + $0x658] sm:$0xff]  ;;  %v305_v5 = vld [vmem:[#allocation5 + $0x440] sm:$0xff]  ;;  %v367_v14 = vld [vmem:[#allocation5 + $0x630] sm:$0xff] }
  0x9a   :  { %2303 = vmatpush2.msra.mxu0 %v205_v6  ;;  %2373 = vmatprep.subr.mxu1 %v270_v7  ;;  %v371_v6 = vld [vmem:[#allocation5 + $0x650] sm:$0xff]  ;;  %v304_v7 = vld [vmem:[#allocation5 + $0x438] sm:$0xff] }
  0x9b   :  { %2304 = vmatprep.subr.mxu0 %v204_v8  ;;  %2374 = vmatpush2.msra.mxu1 %v269_v9  ;;  %v370_v8 = vld [vmem:[#allocation5 + $0x648] sm:$0xff]  ;;  %v303_v9 = vld [vmem:[#allocation5 + $0x430] sm:$0xff] }
  0x9c   :  { %2305 = vmatpush2.msra.mxu0 %v203_v10  ;;  %2375 = vmatprep.subr.mxu1 %v268_v11  ;;  %v369_v10 = vld [vmem:[#allocation5 + $0x640] sm:$0xff]  ;;  %v302_v11 = vld [vmem:[#allocation5 + $0x428] sm:$0xff] }
  0x9d   :  { %2306 = vmatprep.subr.mxu0 %v202_v15  ;;  %2308 = vmatprep.mubr.f32.mxu0 %v1788_v12  ;;  %v368_v12 = vld [vmem:[#allocation5 + $0x638] sm:$0xff] }
  0x9e   :  { %2307 = vmatpush2.msra.mxu0 %v201_v16  ;;  %2376 = vmatpush2.msra.mxu1 %v267_v17  ;;  %v300_v15 = vld [vmem:[#allocation5 + $0x418] sm:$0xff]  ;;  %v366_v16 = vld [vmem:[#allocation5 + $0x628] sm:$0xff]  ;;  %v299_v17 = vld [vmem:[#allocation5 + $0x410] sm:$0xff] }
  0x9f   :  { %2309 = vmatmul.mubr.f32.vlgmr.msra.gmra.mxu0 %v1787_v18  ;;  %2377 = vmatprep.subr.mxu1 %v266_v19  ;;  %v365_v18 = vld [vmem:[#allocation5 + $0x620] sm:$0xff]  ;;  %v298_v19 = vld [vmem:[#allocation5 + $0x408] sm:$0xff] }
  0xa0   :  { %2386 = vmatprep.subr.mxu0 %v328_v20  ;;  %2378 = vmatpush2.msra.mxu1 %v265_v21  ;;  %v364_v20 = vld [vmem:[#allocation5 + $0x618] sm:$0xff]  ;;  %v297_v21 = vld [vmem:[#allocation5 + $0x400] sm:$0xff] }
  0xa1   :  { %2379 = vmatprep.mubr.f32.mxu1 %v1790_v22  ;;  %2387 = vmatpush1.msra.mxu0 %v327_v23  ;;  %v363_v22 = vld [vmem:[#allocation5 + $0x610] sm:$0xff]  ;;  %v360_v23 = vld [vmem:[#allocation5 + $0x5f8] sm:$0xff] }
  0xa2   :  { %2380 = vmatmul.mubr.f32.vlgmr.msra.gmra.mxu1 %v1789_v24  ;;  %2388 = vmatprep.subr.mxu0 %v326_v25  ;;  %v362_v24 = vld [vmem:[#allocation5 + $0x608] sm:$0xff]  ;;  %v359_v25 = vld [vmem:[#allocation5 + $0x5f0] sm:$0xff] }
  0xa3   :  { %2457 = vmatprep.subr.mxu1 %v392_v26  ;;  %2389 = vmatpush1.msra.mxu0 %v325_v27  ;;  %v361_v26 = vld [vmem:[#allocation5 + $0x600] sm:$0xff]  ;;  %v358_v27 = vld [vmem:[#allocation5 + $0x5e8] sm:$0xff] }
  0xa4   :  { %2458 = vmatpush1.msra.mxu1 %v391_v28  ;;  %2390 = vmatprep.subr.mxu0 %v324_v29  ;;  %v424_v28 = vld [vmem:[#allocation5 + $0x7f8] sm:$0xff]  ;;  %v357_v29 = vld [vmem:[#allocation5 + $0x5e0] sm:$0xff] }
  0xa5   :  { %2459 = vmatprep.subr.mxu1 %v390_v30  ;;  %2391 = vmatpush1.msra.mxu0 %v323_v31  ;;  %v423_v30 = vld [vmem:[#allocation5 + $0x7f0] sm:$0xff]  ;;  %v356_v31 = vld [vmem:[#allocation5 + $0x5d8] sm:$0xff] }
  0xa6   :  { %2460 = vmatpush1.msra.mxu1 %v389_v32  ;;  %2392 = vmatprep.subr.mxu0 %v322_v33  ;;  %v422_v32 = vld [vmem:[#allocation5 + $0x7e8] sm:$0xff]  ;;  %v355_v33 = vld [vmem:[#allocation5 + $0x5d0] sm:$0xff] }
  0xa7   :  { %2461 = vmatprep.subr.mxu1 %v388_v34  ;;  %2393 = vmatpush1.msra.mxu0 %v321_v35  ;;  %v421_v34 = vld [vmem:[#allocation5 + $0x7e0] sm:$0xff]  ;;  %v354_v35 = vld [vmem:[#allocation5 + $0x5c8] sm:$0xff] }
  0xa8   :  { %2462 = vmatpush1.msra.mxu1 %v387_v36  ;;  %2394 = vmatprep.subr.mxu0 %v320_v37  ;;  %v420_v36 = vld [vmem:[#allocation5 + $0x7d8] sm:$0xff]  ;;  %v353_v37 = vld [vmem:[#allocation5 + $0x5c0] sm:$0xff] }
  0xa9   :  { %2463 = vmatprep.subr.mxu1 %v386_v38  ;;  %2395 = vmatpush1.msra.mxu0 %v319_v39  ;;  %v419_v38 = vld [vmem:[#allocation5 + $0x7d0] sm:$0xff]  ;;  %v352_v39 = vld [vmem:[#allocation5 + $0x5b8] sm:$0xff] }
  0xaa   :  { %2464 = vmatpush1.msra.mxu1 %v385_v40  ;;  %2396 = vmatprep.subr.mxu0 %v318_v41  ;;  %v418_v40 = vld [vmem:[#allocation5 + $0x7c8] sm:$0xff]  ;;  %v351_v41 = vld [vmem:[#allocation5 + $0x5b0] sm:$0xff] }
  0xab   :  { %2465 = vmatprep.subr.mxu1 %v384_v43  ;;  %2397 = vmatpush1.msra.mxu0 %v317_v44  ;;  %v417_v43 = vld [vmem:[#allocation5 + $0x7c0] sm:$0xff]  ;;  %v350_v44 = vld [vmem:[#allocation5 + $0x5a8] sm:$0xff] }
  0xac   :  { %2466 = vmatpush1.msra.mxu1 %v383_v45  ;;  %2398 = vmatprep.subr.mxu0 %v316_v46  ;;  %v416_v45 = vld [vmem:[#allocation5 + $0x7b8] sm:$0xff]  ;;  %v349_v46 = vld [vmem:[#allocation5 + $0x5a0] sm:$0xff] }
  0xad   :  { %2467 = vmatprep.subr.mxu1 %v382_v47  ;;  %2399 = vmatpush1.msra.mxu0 %v315_v48  ;;  %v415_v47 = vld [vmem:[#allocation5 + $0x7b0] sm:$0xff]  ;;  %v348_v48 = vld [vmem:[#allocation5 + $0x598] sm:$0xff] }
  0xae   :  { %2468 = vmatpush1.msra.mxu1 %v381_v49  ;;  %2400 = vmatprep.subr.mxu0 %v314_v50  ;;  %v414_v49 = vld [vmem:[#allocation5 + $0x7a8] sm:$0xff]  ;;  %v347_v50 = vld [vmem:[#allocation5 + $0x590] sm:$0xff] }
  0xaf   :  { %2469 = vmatprep.subr.mxu1 %v380_v51  ;;  %2401 = vmatpush1.msra.mxu0 %v313_v52  ;;  %v413_v51 = vld [vmem:[#allocation5 + $0x7a0] sm:$0xff]  ;;  %v346_v52 = vld [vmem:[#allocation5 + $0x588] sm:$0xff] }
  0xb0   :  { %2470 = vmatpush1.msra.mxu1 %v379_v53  ;;  %2402 = vmatprep.subr.mxu0 %v312_v54  ;;  %v412_v53 = vld [vmem:[#allocation5 + $0x798] sm:$0xff]  ;;  %v345_v54 = vld [vmem:[#allocation5 + $0x580] sm:$0xff] }
  0xb1   :  { %2471 = vmatprep.subr.mxu1 %v378_v56  ;;  %2403 = vmatpush1.msra.mxu0 %v311_v57  ;;  %v411_v56 = vld [vmem:[#allocation5 + $0x790] sm:$0xff]  ;;  %v344_v57 = vld [vmem:[#allocation5 + $0x578] sm:$0xff] }
  0xb2   :  { %2472 = vmatpush1.msra.mxu1 %v377_v58  ;;  %2404 = vmatprep.subr.mxu0 %v310_v59  ;;  %v410_v58 = vld [vmem:[#allocation5 + $0x788] sm:$0xff]  ;;  %v343_v59 = vld [vmem:[#allocation5 + $0x570] sm:$0xff] }
  0xb3   :  { %2473 = vmatprep.subr.mxu1 %v376_v60  ;;  %2405 = vmatpush1.msra.mxu0 %v309_v61  ;;  %v409_v60 = vld [vmem:[#allocation5 + $0x780] sm:$0xff]  ;;  %v342_v61 = vld [vmem:[#allocation5 + $0x568] sm:$0xff] }
  0xb4   :  { %2474 = vmatpush1.msra.mxu1 %v375_v62  ;;  %2406 = vmatprep.subr.mxu0 %v308_v63  ;;  %v408_v62 = vld [vmem:[#allocation5 + $0x778] sm:$0xff]  ;;  %v341_v63 = vld [vmem:[#allocation5 + $0x560] sm:$0xff] }
  0xb5   :  { %2475 = vmatprep.subr.mxu1 %v374_v0  ;;  %2407 = vmatpush1.msra.mxu0 %v307_v1  ;;  %v407_v0 = vld [vmem:[#allocation5 + $0x770] sm:$0xff]  ;;  %v340_v1 = vld [vmem:[#allocation5 + $0x558] sm:$0xff] }
  0xb6   :  { %2476 = vmatpush1.msra.mxu1 %v373_v2  ;;  %2408 = vmatprep.subr.mxu0 %v306_v3  ;;  %v122_v2 = vld [vmem:[#allocation3 + $0x8] sm:$0xff] }
  0xb7   :  { %2477 = vmatprep.subr.mxu1 %v372_v4  ;;  %2409 = vmatpush1.msra.mxu0 %v305_v5  ;;  %v134_v3 = vld [vmem:[#allocation3 + $0x68] sm:$0xff] }
  0xb8   :  { %2478 = vmatpush1.msra.mxu1 %v371_v6  ;;  %2410 = vmatprep.subr.mxu0 %v304_v7  ;;  %v146_v4 = vld [vmem:[#allocation3 + $0xc8] sm:$0xff]  ;;  %v339_v7 = vld [vmem:[#allocation5 + $0x550] sm:$0xff] }
  0xb9   :  { %2479 = vmatprep.subr.mxu1 %v370_v8  ;;  %2411 = vmatpush1.msra.mxu0 %v303_v9  ;;  %v158_v5 = vld [vmem:[#allocation3 + $0x128] sm:$0xff]  ;;  %v405_v8 = vld [vmem:[#allocation5 + $0x760] sm:$0xff] }
  0xba   :  { %2480 = vmatpush1.msra.mxu1 %v369_v10  ;;  %2412 = vmatprep.subr.mxu0 %v302_v11  ;;  %v406_v6 = vld [vmem:[#allocation5 + $0x768] sm:$0xff]  ;;  %v404_v10 = vld [vmem:[#allocation5 + $0x758] sm:$0xff]  ;;  %v337_v11 = vld [vmem:[#allocation5 + $0x540] sm:$0xff] }
  0xbb   :  { %2481 = vmatprep.subr.mxu1 %v368_v12  ;;  %2413 = vmatpush1.msra.mxu0 %v301_v13  ;;  %v338_v9 = vld [vmem:[#allocation5 + $0x548] sm:$0xff]  ;;  %v1791_v12 = vcombine.low %v122_v2, %v134_v3  ;;  %v1793_v13 = vcombine.low %v146_v4, %v158_v5 }
  0xbc   :  { %2482 = vmatpush1.msra.mxu1 %v367_v14  ;;  %2414 = vmatprep.subr.mxu0 %v300_v15  ;;  %v403_v14 = vld [vmem:[#allocation5 + $0x750] sm:$0xff]  ;;  %v336_v15 = vld [vmem:[#allocation5 + $0x538] sm:$0xff] }
  0xbd   :  { %2483 = vmatprep.subr.mxu1 %v366_v16  ;;  %2415 = vmatpush1.msra.mxu0 %v299_v17  ;;  %v402_v16 = vld [vmem:[#allocation5 + $0x748] sm:$0xff]  ;;  %v335_v17 = vld [vmem:[#allocation5 + $0x530] sm:$0xff] }
  0xbe   :  { %2484 = vmatpush1.msra.mxu1 %v365_v18  ;;  %2416 = vmatprep.subr.mxu0 %v298_v19  ;;  %v401_v18 = vld [vmem:[#allocation5 + $0x740] sm:$0xff]  ;;  %v334_v19 = vld [vmem:[#allocation5 + $0x528] sm:$0xff] }
  0xbf   :  { %2485 = vmatprep.subr.mxu1 %v364_v20  ;;  %2417 = vmatpush1.msra.mxu0 %v297_v21  ;;  %v1792_v20 = vcombine.high %v122_v2, %v134_v3  ;;  %v1794_v21 = vcombine.high %v146_v4, %v158_v5  ;;  %v511_v2 = vld [vmem:[#allocation5 + $0xab0] sm:$0xff]  ;;  %v444_v3 = vld [vmem:[#allocation5 + $0x898] sm:$0xff]  ;;  %v510_v4 = vld [vmem:[#allocation5 + $0xaa8] sm:$0xff] }
  0xc0   :  { %2486 = vmatpush1.msra.mxu1 %v363_v22  ;;  %2418 = vmatprep.subr.mxu0 %v360_v23  ;;  %v400_v22 = vld [vmem:[#allocation5 + $0x738] sm:$0xff]  ;;  %v333_v23 = vld [vmem:[#allocation5 + $0x520] sm:$0xff]  ;;  %v443_v5 = vld [vmem:[#allocation5 + $0x890] sm:$0xff] }
  0xc1   :  { %2487 = vmatprep.subr.mxu1 %v362_v24  ;;  %2419 = vmatpush2.msra.mxu0 %v359_v25  ;;  %v1801_v24 = vrot.slane %v1791_v12, %v4572_v55  ;;  %v1815_v25 = vrot.slane %v1793_v13, %v4572_v55  ;;  %v506_v12 = vld [vmem:[#allocation5 + $0xa88] sm:$0xff]  ;;  %v439_v13 = vld [vmem:[#allocation5 + $0x870] sm:$0xff] }
  0xc2   :  { %2488 = vmatpush1.msra.mxu1 %v361_v26  ;;  %2420 = vmatprep.subr.mxu0 %v358_v27  ;;  %v399_v26 = vld [vmem:[#allocation5 + $0x730] sm:$0xff]  ;;  %v332_v27 = vld [vmem:[#allocation5 + $0x518] sm:$0xff] }
  0xc3   :  { %2489 = vmatprep.subr.mxu1 %v424_v28  ;;  %2421 = vmatpush2.msra.mxu0 %v357_v29  ;;  %v398_v28 = vld [vmem:[#allocation5 + $0x728] sm:$0xff]  ;;  %v331_v29 = vld [vmem:[#allocation5 + $0x510] sm:$0xff] }
  0xc4   :  { %2490 = vmatpush2.msra.mxu1 %v423_v30  ;;  %2422 = vmatprep.subr.mxu0 %v356_v31  ;;  %v397_v30 = vld [vmem:[#allocation5 + $0x720] sm:$0xff]  ;;  %v330_v31 = vld [vmem:[#allocation5 + $0x508] sm:$0xff] }
  0xc5   :  { %2491 = vmatprep.subr.mxu1 %v422_v32  ;;  %2423 = vmatpush2.msra.mxu0 %v355_v33  ;;  %v1808_v32 = vrot.slane %v1792_v20, %v4572_v55  ;;  %v1822_v33 = vrot.slane %v1794_v21, %v4572_v55  ;;  %v502_v20 = vld [vmem:[#allocation5 + $0xa68] sm:$0xff]  ;;  %v435_v21 = vld [vmem:[#allocation5 + $0x850] sm:$0xff] }
  0xc6   :  { %2492 = vmatpush2.msra.mxu1 %v421_v34  ;;  %2424 = vmatprep.subr.mxu0 %v354_v35  ;;  %v396_v34 = vld [vmem:[#allocation5 + $0x718] sm:$0xff]  ;;  %v329_v35 = vld [vmem:[#allocation5 + $0x500] sm:$0xff] }
  0xc7   :  { %2493 = vmatprep.subr.mxu1 %v420_v36  ;;  %2425 = vmatpush2.msra.mxu0 %v353_v37  ;;  %v1824_v36 = vcombine.high %v1801_v24, %v1815_v25  ;;  %v395_v37 = vld [vmem:[#allocation5 + $0x710] sm:$0xff] }
  0xc8   :  { %2494 = vmatpush2.msra.mxu1 %v419_v38  ;;  %2426 = vmatprep.subr.mxu0 %v352_v39  ;;  %v1823_v38 = vcombine.low %v1801_v24, %v1815_v25  ;;  %v394_v39 = vld [vmem:[#allocation5 + $0x708] sm:$0xff]  ;;  %v500_v24 = vld [vmem:[#allocation5 + $0xa58] sm:$0xff]  ;;  %v433_v25 = vld [vmem:[#allocation5 + $0x840] sm:$0xff] }
  0xc9   :  { %2495 = vmatprep.subr.mxu1 %v418_v40  ;;  %2427 = vmatpush2.msra.mxu0 %v351_v41  ;;  %v456_v40 = vld [vmem:[#allocation5 + $0x8f8] sm:$0xff]  ;;  %v393_v41 = vld [vmem:[#allocation5 + $0x700] sm:$0xff] }
  0xca   :  { %2496 = vmatpush2.msra.mxu1 %v417_v43  ;;  %2428 = vmatprep.subr.mxu0 %v350_v44  ;;  %v1826_v43 = vcombine.high %v1808_v32, %v1822_v33  ;;  %v455_v44 = vld [vmem:[#allocation5 + $0x8f0] sm:$0xff] }
  0xcb   :  { %2497 = vmatprep.subr.mxu1 %v416_v45  ;;  %2429 = vmatpush2.msra.mxu0 %v349_v46  ;;  %v1825_v45 = vcombine.low %v1808_v32, %v1822_v33  ;;  %v454_v46 = vld [vmem:[#allocation5 + $0x8e8] sm:$0xff]  ;;  %v496_v32 = vld [vmem:[#allocation5 + $0xa38] sm:$0xff]  ;;  %v429_v33 = vld [vmem:[#allocation5 + $0x820] sm:$0xff] }
  0xcc   :  { %2498 = vmatpush2.msra.mxu1 %v415_v47  ;;  %2430 = vmatprep.subr.mxu0 %v348_v48  ;;  %v520_v47 = vld [vmem:[#allocation5 + $0xaf8] sm:$0xff]  ;;  %v453_v48 = vld [vmem:[#allocation5 + $0x8e0] sm:$0xff] }
  0xcd   :  { %2499 = vmatprep.subr.mxu1 %v414_v49  ;;  %2431 = vmatpush2.msra.mxu0 %v347_v50  ;;  %v519_v49 = vld [vmem:[#allocation5 + $0xaf0] sm:$0xff]  ;;  %v452_v50 = vld [vmem:[#allocation5 + $0x8d8] sm:$0xff] }
  0xce   :  { %2500 = vmatpush2.msra.mxu1 %v413_v51  ;;  %2432 = vmatprep.subr.mxu0 %v346_v52  ;;  %v518_v51 = vld [vmem:[#allocation5 + $0xae8] sm:$0xff]  ;;  %v451_v52 = vld [vmem:[#allocation5 + $0x8d0] sm:$0xff] }
  0xcf   :  { %2501 = vmatprep.subr.mxu1 %v412_v53  ;;  %2433 = vmatpush2.msra.mxu0 %v345_v54  ;;  %v517_v53 = vld [vmem:[#allocation5 + $0xae0] sm:$0xff]  ;;  %v450_v54 = vld [vmem:[#allocation5 + $0x8c8] sm:$0xff] }
  0xd0   :  { %2502 = vmatpush2.msra.mxu1 %v411_v56  ;;  %2434 = vmatprep.subr.mxu0 %v344_v57  ;;  %v516_v56 = vld [vmem:[#allocation5 + $0xad8] sm:$0xff]  ;;  %v449_v57 = vld [vmem:[#allocation5 + $0x8c0] sm:$0xff] }
  0xd1   :  { %2503 = vmatprep.subr.mxu1 %v410_v58  ;;  %2435 = vmatpush2.msra.mxu0 %v343_v59  ;;  %v515_v58 = vld [vmem:[#allocation5 + $0xad0] sm:$0xff]  ;;  %v448_v59 = vld [vmem:[#allocation5 + $0x8b8] sm:$0xff] }
  0xd2   :  { %2504 = vmatpush2.msra.mxu1 %v409_v60  ;;  %2436 = vmatprep.subr.mxu0 %v342_v61  ;;  %v514_v60 = vld [vmem:[#allocation5 + $0xac8] sm:$0xff]  ;;  %v447_v61 = vld [vmem:[#allocation5 + $0x8b0] sm:$0xff] }
  0xd3   :  { %2505 = vmatprep.subr.mxu1 %v408_v62  ;;  %2437 = vmatpush2.msra.mxu0 %v341_v63  ;;  %v513_v62 = vld [vmem:[#allocation5 + $0xac0] sm:$0xff]  ;;  %v446_v63 = vld [vmem:[#allocation5 + $0x8a8] sm:$0xff] }
  0xd4   :  { %2506 = vmatpush2.msra.mxu1 %v407_v0  ;;  %2438 = vmatprep.subr.mxu0 %v340_v1  ;;  %v512_v0 = vld [vmem:[#allocation5 + $0xab8] sm:$0xff]  ;;  %v445_v1 = vld [vmem:[#allocation5 + $0x8a0] sm:$0xff] }
  0xd5   :  { %2507 = vmatprep.subr.mxu1 %v406_v6  ;;  %2439 = vmatpush2.msra.mxu0 %v339_v7  ;;  %v509_v6 = vld [vmem:[#allocation5 + $0xaa0] sm:$0xff]  ;;  %v442_v7 = vld [vmem:[#allocation5 + $0x888] sm:$0xff] }
  0xd6   :  { %2508 = vmatpush2.msra.mxu1 %v405_v8  ;;  %2440 = vmatprep.subr.mxu0 %v338_v9  ;;  %v508_v8 = vld [vmem:[#allocation5 + $0xa98] sm:$0xff]  ;;  %v441_v9 = vld [vmem:[#allocation5 + $0x880] sm:$0xff] }
  0xd7   :  { %2509 = vmatprep.subr.mxu1 %v404_v10  ;;  %2441 = vmatpush2.msra.mxu0 %v337_v11  ;;  %v507_v10 = vld [vmem:[#allocation5 + $0xa90] sm:$0xff]  ;;  %v440_v11 = vld [vmem:[#allocation5 + $0x878] sm:$0xff] }
  0xd8   :  { %2510 = vmatpush2.msra.mxu1 %v403_v14  ;;  %2442 = vmatprep.subr.mxu0 %v336_v15  ;;  %v505_v14 = vld [vmem:[#allocation5 + $0xa80] sm:$0xff]  ;;  %v438_v15 = vld [vmem:[#allocation5 + $0x868] sm:$0xff] }
  0xd9   :  { %2511 = vmatprep.subr.mxu1 %v402_v16  ;;  %2443 = vmatpush2.msra.mxu0 %v335_v17  ;;  %v504_v16 = vld [vmem:[#allocation5 + $0xa78] sm:$0xff]  ;;  %v437_v17 = vld [vmem:[#allocation5 + $0x860] sm:$0xff] }
  0xda   :  { %2512 = vmatpush2.msra.mxu1 %v401_v18  ;;  %2444 = vmatprep.subr.mxu0 %v334_v19  ;;  %v503_v18 = vld [vmem:[#allocation5 + $0xa70] sm:$0xff]  ;;  %v436_v19 = vld [vmem:[#allocation5 + $0x858] sm:$0xff] }
  0xdb   :  { %2513 = vmatprep.subr.mxu1 %v400_v22  ;;  %2445 = vmatpush2.msra.mxu0 %v333_v23  ;;  %v501_v22 = vld [vmem:[#allocation5 + $0xa60] sm:$0xff]  ;;  %v434_v23 = vld [vmem:[#allocation5 + $0x848] sm:$0xff] }
  0xdc   :  { %2514 = vmatpush2.msra.mxu1 %v399_v26  ;;  %2446 = vmatprep.subr.mxu0 %v332_v27  ;;  %v499_v26 = vld [vmem:[#allocation5 + $0xa50] sm:$0xff]  ;;  %v432_v27 = vld [vmem:[#allocation5 + $0x838] sm:$0xff] }
  0xdd   :  { %2515 = vmatprep.subr.mxu1 %v398_v28  ;;  %2447 = vmatpush2.msra.mxu0 %v331_v29  ;;  %v498_v28 = vld [vmem:[#allocation5 + $0xa48] sm:$0xff]  ;;  %v431_v29 = vld [vmem:[#allocation5 + $0x830] sm:$0xff] }
  0xde   :  { %2516 = vmatpush2.msra.mxu1 %v397_v30  ;;  %2448 = vmatprep.subr.mxu0 %v330_v31  ;;  %v497_v30 = vld [vmem:[#allocation5 + $0xa40] sm:$0xff]  ;;  %v430_v31 = vld [vmem:[#allocation5 + $0x828] sm:$0xff] }
  0xdf   :  { %2517 = vmatprep.subr.mxu1 %v396_v34  ;;  %2449 = vmatpush2.msra.mxu0 %v329_v35  ;;  %v495_v34 = vld [vmem:[#allocation5 + $0xa30] sm:$0xff]  ;;  %v428_v35 = vld [vmem:[#allocation5 + $0x818] sm:$0xff] }
  0xe0   :  { %2450 = vmatprep.mubr.f32.mxu0 %v1824_v36  ;;  %2518 = vmatpush2.msra.mxu1 %v395_v37  ;;  %v494_v36 = vld [vmem:[#allocation5 + $0xa28] sm:$0xff]  ;;  %v427_v37 = vld [vmem:[#allocation5 + $0x810] sm:$0xff] }
  0xe1   :  { %2451 = vmatmul.mubr.f32.vlgmr.msra.gmra.mxu0 %v1823_v38  ;;  %2519 = vmatprep.subr.mxu1 %v394_v39  ;;  %v493_v38 = vld [vmem:[#allocation5 + $0xa20] sm:$0xff]  ;;  %v426_v39 = vld [vmem:[#allocation5 + $0x808] sm:$0xff] }
  0xe2   :  { %2528 = vmatprep.subr.mxu0 %v456_v40  ;;  %2520 = vmatpush2.msra.mxu1 %v393_v41  ;;  %v492_v40 = vld [vmem:[#allocation5 + $0xa18] sm:$0xff]  ;;  %v425_v41 = vld [vmem:[#allocation5 + $0x800] sm:$0xff] }
  0xe3   :  { %2521 = vmatprep.mubr.f32.mxu1 %v1826_v43  ;;  %2529 = vmatpush1.msra.mxu0 %v455_v44  ;;  %v491_v43 = vld [vmem:[#allocation5 + $0xa10] sm:$0xff]  ;;  %v488_v44 = vld [vmem:[#allocation5 + $0x9f8] sm:$0xff] }
  0xe4   :  { %2522 = vmatmul.mubr.f32.vlgmr.msra.gmra.mxu1 %v1825_v45  ;;  %2530 = vmatprep.subr.mxu0 %v454_v46  ;;  %v490_v45 = vld [vmem:[#allocation5 + $0xa08] sm:$0xff]  ;;  %v487_v46 = vld [vmem:[#allocation5 + $0x9f0] sm:$0xff] }
  0xe5   :  { %2599 = vmatprep.subr.mxu1 %v520_v47  ;;  %2531 = vmatpush1.msra.mxu0 %v453_v48  ;;  %v489_v47 = vld [vmem:[#allocation5 + $0xa00] sm:$0xff]  ;;  %v486_v48 = vld [vmem:[#allocation5 + $0x9e8] sm:$0xff] }
  0xe6   :  { %2600 = vmatpush1.msra.mxu1 %v519_v49  ;;  %2532 = vmatprep.subr.mxu0 %v452_v50  ;;  %v552_v49 = vld [vmem:[#allocation5 + $0xbf8] sm:$0xff]  ;;  %v485_v50 = vld [vmem:[#allocation5 + $0x9e0] sm:$0xff] }
  0xe7   :  { %2601 = vmatprep.subr.mxu1 %v518_v51  ;;  %2533 = vmatpush1.msra.mxu0 %v451_v52  ;;  %v551_v51 = vld [vmem:[#allocation5 + $0xbf0] sm:$0xff]  ;;  %v484_v52 = vld [vmem:[#allocation5 + $0x9d8] sm:$0xff] }
  0xe8   :  { %2602 = vmatpush1.msra.mxu1 %v517_v53  ;;  %2534 = vmatprep.subr.mxu0 %v450_v54  ;;  %v550_v53 = vld [vmem:[#allocation5 + $0xbe8] sm:$0xff]  ;;  %v483_v54 = vld [vmem:[#allocation5 + $0x9d0] sm:$0xff] }
  0xe9   :  { %2603 = vmatprep.subr.mxu1 %v516_v56  ;;  %2535 = vmatpush1.msra.mxu0 %v449_v57  ;;  %v549_v56 = vld [vmem:[#allocation5 + $0xbe0] sm:$0xff]  ;;  %v482_v57 = vld [vmem:[#allocation5 + $0x9c8] sm:$0xff] }
  0xea   :  { %2604 = vmatpush1.msra.mxu1 %v515_v58  ;;  %2536 = vmatprep.subr.mxu0 %v448_v59  ;;  %v548_v58 = vld [vmem:[#allocation5 + $0xbd8] sm:$0xff]  ;;  %v481_v59 = vld [vmem:[#allocation5 + $0x9c0] sm:$0xff] }
  0xeb   :  { %2605 = vmatprep.subr.mxu1 %v514_v60  ;;  %2537 = vmatpush1.msra.mxu0 %v447_v61  ;;  %v547_v60 = vld [vmem:[#allocation5 + $0xbd0] sm:$0xff]  ;;  %v480_v61 = vld [vmem:[#allocation5 + $0x9b8] sm:$0xff] }
  0xec   :  { %2606 = vmatpush1.msra.mxu1 %v513_v62  ;;  %2538 = vmatprep.subr.mxu0 %v446_v63  ;;  %v546_v62 = vld [vmem:[#allocation5 + $0xbc8] sm:$0xff]  ;;  %v479_v63 = vld [vmem:[#allocation5 + $0x9b0] sm:$0xff] }
  0xed   :  { %2607 = vmatprep.subr.mxu1 %v512_v0  ;;  %2539 = vmatpush1.msra.mxu0 %v445_v1  ;;  %v545_v0 = vld [vmem:[#allocation5 + $0xbc0] sm:$0xff]  ;;  %v478_v1 = vld [vmem:[#allocation5 + $0x9a8] sm:$0xff] }
  0xee   :  { %2608 = vmatpush1.msra.mxu1 %v511_v2  ;;  %2540 = vmatprep.subr.mxu0 %v444_v3  ;;  %v544_v2 = vld [vmem:[#allocation5 + $0xbb8] sm:$0xff]  ;;  %v477_v3 = vld [vmem:[#allocation5 + $0x9a0] sm:$0xff] }
  0xef   :  { %2609 = vmatprep.subr.mxu1 %v510_v4  ;;  %2541 = vmatpush1.msra.mxu0 %v443_v5  ;;  %v543_v4 = vld [vmem:[#allocation5 + $0xbb0] sm:$0xff]  ;;  %v476_v5 = vld [vmem:[#allocation5 + $0x998] sm:$0xff] }
  0xf0   :  { %2610 = vmatpush1.msra.mxu1 %v509_v6  ;;  %2542 = vmatprep.subr.mxu0 %v442_v7  ;;  %v542_v6 = vld [vmem:[#allocation5 + $0xba8] sm:$0xff]  ;;  %v475_v7 = vld [vmem:[#allocation5 + $0x990] sm:$0xff] }
  0xf1   :  { %2611 = vmatprep.subr.mxu1 %v508_v8  ;;  %2543 = vmatpush1.msra.mxu0 %v441_v9  ;;  %v541_v8 = vld [vmem:[#allocation5 + $0xba0] sm:$0xff]  ;;  %v474_v9 = vld [vmem:[#allocation5 + $0x988] sm:$0xff] }
  0xf2   :  { %2612 = vmatpush1.msra.mxu1 %v507_v10  ;;  %2544 = vmatprep.subr.mxu0 %v440_v11  ;;  %v540_v10 = vld [vmem:[#allocation5 + $0xb98] sm:$0xff]  ;;  %v473_v11 = vld [vmem:[#allocation5 + $0x980] sm:$0xff] }
  0xf3   :  { %2613 = vmatprep.subr.mxu1 %v506_v12  ;;  %2545 = vmatpush1.msra.mxu0 %v439_v13  ;;  %v539_v12 = vld [vmem:[#allocation5 + $0xb90] sm:$0xff]  ;;  %v472_v13 = vld [vmem:[#allocation5 + $0x978] sm:$0xff] }
  0xf4   :  { %2614 = vmatpush1.msra.mxu1 %v505_v14  ;;  %2546 = vmatprep.subr.mxu0 %v438_v15  ;;  %v538_v14 = vld [vmem:[#allocation5 + $0xb88] sm:$0xff]  ;;  %v471_v15 = vld [vmem:[#allocation5 + $0x970] sm:$0xff] }
  0xf5   :  { %2615 = vmatprep.subr.mxu1 %v504_v16  ;;  %2547 = vmatpush1.msra.mxu0 %v437_v17  ;;  %v537_v16 = vld [vmem:[#allocation5 + $0xb80] sm:$0xff]  ;;  %v470_v17 = vld [vmem:[#allocation5 + $0x968] sm:$0xff] }
  0xf6   :  { %2616 = vmatpush1.msra.mxu1 %v503_v18  ;;  %2548 = vmatprep.subr.mxu0 %v436_v19  ;;  %v536_v18 = vld [vmem:[#allocation5 + $0xb78] sm:$0xff]  ;;  %v469_v19 = vld [vmem:[#allocation5 + $0x960] sm:$0xff] }
  0xf7   :  { %2617 = vmatprep.subr.mxu1 %v502_v20  ;;  %2549 = vmatpush1.msra.mxu0 %v435_v21  ;;  %v535_v20 = vld [vmem:[#allocation5 + $0xb70] sm:$0xff]  ;;  %v468_v21 = vld [vmem:[#allocation5 + $0x958] sm:$0xff] }
  0xf8   :  { %2618 = vmatpush1.msra.mxu1 %v501_v22  ;;  %2550 = vmatprep.subr.mxu0 %v434_v23  ;;  %v123_v22 = vld [vmem:[#allocation3 + $0x10] sm:$0xff] }
  0xf9   :  { %2619 = vmatprep.subr.mxu1 %v500_v24  ;;  %2551 = vmatpush1.msra.mxu0 %v433_v25  ;;  %v135_v23 = vld [vmem:[#allocation3 + $0x70] sm:$0xff] }
  0xfa   :  { %2620 = vmatpush1.msra.mxu1 %v499_v26  ;;  %2552 = vmatprep.subr.mxu0 %v432_v27  ;;  %v147_v24 = vld [vmem:[#allocation3 + $0xd0] sm:$0xff]  ;;  %v534_v26 = vld [vmem:[#allocation5 + $0xb68] sm:$0xff] }
  0xfb   :  { %2621 = vmatprep.subr.mxu1 %v498_v28  ;;  %2553 = vmatpush1.msra.mxu0 %v431_v29  ;;  %v159_v25 = vld [vmem:[#allocation3 + $0x130] sm:$0xff]  ;;  %v533_v28 = vld [vmem:[#allocation5 + $0xb60] sm:$0xff]  ;;  %v466_v29 = vld [vmem:[#allocation5 + $0x948] sm:$0xff] }
  0xfc   :  { %2622 = vmatpush1.msra.mxu1 %v497_v30  ;;  %2554 = vmatprep.subr.mxu0 %v430_v31  ;;  %v467_v27 = vld [vmem:[#allocation5 + $0x950] sm:$0xff]  ;;  %v532_v30 = vld [vmem:[#allocation5 + $0xb58] sm:$0xff]  ;;  %v465_v31 = vld [vmem:[#allocation5 + $0x940] sm:$0xff] }
  0xfd   :  { %2623 = vmatprep.subr.mxu1 %v496_v32  ;;  %2555 = vmatpush1.msra.mxu0 %v429_v33  ;;  %v1827_v32 = vcombine.low %v123_v22, %v135_v23  ;;  %v1829_v33 = vcombine.low %v147_v24, %v159_v25 }
  0xfe   :  { %2624 = vmatpush1.msra.mxu1 %v495_v34  ;;  %2556 = vmatprep.subr.mxu0 %v428_v35  ;;  %v531_v34 = vld [vmem:[#allocation5 + $0xb50] sm:$0xff]  ;;  %v464_v35 = vld [vmem:[#allocation5 + $0x938] sm:$0xff] }
  0xff   :  { %2625 = vmatprep.subr.mxu1 %v494_v36  ;;  %2557 = vmatpush1.msra.mxu0 %v427_v37  ;;  %v530_v36 = vld [vmem:[#allocation5 + $0xb48] sm:$0xff]  ;;  %v463_v37 = vld [vmem:[#allocation5 + $0x930] sm:$0xff] }
 0x100   :  { %2626 = vmatpush1.msra.mxu1 %v493_v38  ;;  %2558 = vmatprep.subr.mxu0 %v426_v39  ;;  %v529_v38 = vld [vmem:[#allocation5 + $0xb40] sm:$0xff]  ;;  %v462_v39 = vld [vmem:[#allocation5 + $0x928] sm:$0xff] }
 0x101   :  { %2627 = vmatprep.subr.mxu1 %v492_v40  ;;  %2559 = vmatpush1.msra.mxu0 %v425_v41  ;;  %v1828_v40 = vcombine.high %v123_v22, %v135_v23  ;;  %v1830_v41 = vcombine.high %v147_v24, %v159_v25  ;;  %v639_v22 = vld [vmem:[#allocation5 + $0xeb0] sm:$0xff]  ;;  %v572_v23 = vld [vmem:[#allocation5 + $0xc98] sm:$0xff]  ;;  %v638_v24 = vld [vmem:[#allocation5 + $0xea8] sm:$0xff] }
 0x102   :  { %2628 = vmatpush1.msra.mxu1 %v491_v43  ;;  %2560 = vmatprep.subr.mxu0 %v488_v44  ;;  %v528_v43 = vld [vmem:[#allocation5 + $0xb38] sm:$0xff]  ;;  %v461_v44 = vld [vmem:[#allocation5 + $0x920] sm:$0xff]  ;;  %v571_v25 = vld [vmem:[#allocation5 + $0xc90] sm:$0xff] }
 0x103   :  { %2629 = vmatprep.subr.mxu1 %v490_v45  ;;  %2561 = vmatpush2.msra.mxu0 %v487_v46  ;;  %v1837_v45 = vrot.slane %v1827_v32, %v4572_v55  ;;  %v1851_v46 = vrot.slane %v1829_v33, %v4572_v55  ;;  %v634_v32 = vld [vmem:[#allocation5 + $0xe88] sm:$0xff]  ;;  %v567_v33 = vld [vmem:[#allocation5 + $0xc70] sm:$0xff] }
 0x104   :  { %2630 = vmatpush1.msra.mxu1 %v489_v47  ;;  %2562 = vmatprep.subr.mxu0 %v486_v48  ;;  %v527_v47 = vld [vmem:[#allocation5 + $0xb30] sm:$0xff]  ;;  %v460_v48 = vld [vmem:[#allocation5 + $0x918] sm:$0xff] }
 0x105   :  { %2631 = vmatprep.subr.mxu1 %v552_v49  ;;  %2563 = vmatpush2.msra.mxu0 %v485_v50  ;;  %v526_v49 = vld [vmem:[#allocation5 + $0xb28] sm:$0xff]  ;;  %v459_v50 = vld [vmem:[#allocation5 + $0x910] sm:$0xff] }
 0x106   :  { %2632 = vmatpush2.msra.mxu1 %v551_v51  ;;  %2564 = vmatprep.subr.mxu0 %v484_v52  ;;  %v525_v51 = vld [vmem:[#allocation5 + $0xb20] sm:$0xff]  ;;  %v458_v52 = vld [vmem:[#allocation5 + $0x908] sm:$0xff] }
 0x107   :  { %2633 = vmatprep.subr.mxu1 %v550_v53  ;;  %2565 = vmatpush2.msra.mxu0 %v483_v54  ;;  %v1844_v53 = vrot.slane %v1828_v40, %v4572_v55  ;;  %v1858_v54 = vrot.slane %v1830_v41, %v4572_v55  ;;  %v630_v40 = vld [vmem:[#allocation5 + $0xe68] sm:$0xff]  ;;  %v563_v41 = vld [vmem:[#allocation5 + $0xc50] sm:$0xff] }
 0x108   :  { %2634 = vmatpush2.msra.mxu1 %v549_v56  ;;  %2566 = vmatprep.subr.mxu0 %v482_v57  ;;  %v524_v56 = vld [vmem:[#allocation5 + $0xb18] sm:$0xff]  ;;  %v457_v57 = vld [vmem:[#allocation5 + $0x900] sm:$0xff] }
 0x109   :  { %2635 = vmatprep.subr.mxu1 %v548_v58  ;;  %2567 = vmatpush2.msra.mxu0 %v481_v59  ;;  %v1860_v58 = vcombine.high %v1837_v45, %v1851_v46  ;;  %v523_v59 = vld [vmem:[#allocation5 + $0xb10] sm:$0xff] }
 0x10a   :  { %2636 = vmatpush2.msra.mxu1 %v547_v60  ;;  %2568 = vmatprep.subr.mxu0 %v480_v61  ;;  %v1859_v60 = vcombine.low %v1837_v45, %v1851_v46  ;;  %v522_v61 = vld [vmem:[#allocation5 + $0xb08] sm:$0xff]  ;;  %v628_v45 = vld [vmem:[#allocation5 + $0xe58] sm:$0xff]  ;;  %v561_v46 = vld [vmem:[#allocation5 + $0xc40] sm:$0xff] }
 0x10b   :  { %2637 = vmatprep.subr.mxu1 %v546_v62  ;;  %2569 = vmatpush2.msra.mxu0 %v479_v63  ;;  %v584_v62 = vld [vmem:[#allocation5 + $0xcf8] sm:$0xff]  ;;  %v521_v63 = vld [vmem:[#allocation5 + $0xb00] sm:$0xff] }
 0x10c   :  { %2638 = vmatpush2.msra.mxu1 %v545_v0  ;;  %2570 = vmatprep.subr.mxu0 %v478_v1  ;;  %v1862_v0 = vcombine.high %v1844_v53, %v1858_v54  ;;  %v583_v1 = vld [vmem:[#allocation5 + $0xcf0] sm:$0xff] }
 0x10d   :  { %2639 = vmatprep.subr.mxu1 %v544_v2  ;;  %2571 = vmatpush2.msra.mxu0 %v477_v3  ;;  %v1861_v2 = vcombine.low %v1844_v53, %v1858_v54  ;;  %v582_v3 = vld [vmem:[#allocation5 + $0xce8] sm:$0xff]  ;;  %v624_v53 = vld [vmem:[#allocation5 + $0xe38] sm:$0xff]  ;;  %v557_v54 = vld [vmem:[#allocation5 + $0xc20] sm:$0xff] }
 0x10e   :  { %2640 = vmatpush2.msra.mxu1 %v543_v4  ;;  %2572 = vmatprep.subr.mxu0 %v476_v5  ;;  %v648_v4 = vld [vmem:[#allocation5 + $0xef8] sm:$0xff]  ;;  %v581_v5 = vld [vmem:[#allocation5 + $0xce0] sm:$0xff] }
 0x10f   :  { %2641 = vmatprep.subr.mxu1 %v542_v6  ;;  %2573 = vmatpush2.msra.mxu0 %v475_v7  ;;  %v647_v6 = vld [vmem:[#allocation5 + $0xef0] sm:$0xff]  ;;  %v580_v7 = vld [vmem:[#allocation5 + $0xcd8] sm:$0xff] }
 0x110   :  { %2642 = vmatpush2.msra.mxu1 %v541_v8  ;;  %2574 = vmatprep.subr.mxu0 %v474_v9  ;;  %v646_v8 = vld [vmem:[#allocation5 + $0xee8] sm:$0xff]  ;;  %v579_v9 = vld [vmem:[#allocation5 + $0xcd0] sm:$0xff] }
 0x111   :  { %2643 = vmatprep.subr.mxu1 %v540_v10  ;;  %2575 = vmatpush2.msra.mxu0 %v473_v11  ;;  %v645_v10 = vld [vmem:[#allocation5 + $0xee0] sm:$0xff]  ;;  %v578_v11 = vld [vmem:[#allocation5 + $0xcc8] sm:$0xff] }
 0x112   :  { %2644 = vmatpush2.msra.mxu1 %v539_v12  ;;  %2576 = vmatprep.subr.mxu0 %v472_v13  ;;  %v644_v12 = vld [vmem:[#allocation5 + $0xed8] sm:$0xff]  ;;  %v577_v13 = vld [vmem:[#allocation5 + $0xcc0] sm:$0xff] }
 0x113   :  { %2645 = vmatprep.subr.mxu1 %v538_v14  ;;  %2577 = vmatpush2.msra.mxu0 %v471_v15  ;;  %v643_v14 = vld [vmem:[#allocation5 + $0xed0] sm:$0xff]  ;;  %v576_v15 = vld [vmem:[#allocation5 + $0xcb8] sm:$0xff] }
 0x114   :  { %2646 = vmatpush2.msra.mxu1 %v537_v16  ;;  %2578 = vmatprep.subr.mxu0 %v470_v17  ;;  %v642_v16 = vld [vmem:[#allocation5 + $0xec8] sm:$0xff]  ;;  %v575_v17 = vld [vmem:[#allocation5 + $0xcb0] sm:$0xff] }
 0x115   :  { %2647 = vmatprep.subr.mxu1 %v536_v18  ;;  %2579 = vmatpush2.msra.mxu0 %v469_v19  ;;  %v641_v18 = vld [vmem:[#allocation5 + $0xec0] sm:$0xff]  ;;  %v574_v19 = vld [vmem:[#allocation5 + $0xca8] sm:$0xff] }
 0x116   :  { %2648 = vmatpush2.msra.mxu1 %v535_v20  ;;  %2580 = vmatprep.subr.mxu0 %v468_v21  ;;  %v640_v20 = vld [vmem:[#allocation5 + $0xeb8] sm:$0xff]  ;;  %v573_v21 = vld [vmem:[#allocation5 + $0xca0] sm:$0xff] }
 0x117   :  { %2649 = vmatprep.subr.mxu1 %v534_v26  ;;  %2581 = vmatpush2.msra.mxu0 %v467_v27  ;;  %v637_v26 = vld [vmem:[#allocation5 + $0xea0] sm:$0xff]  ;;  %v570_v27 = vld [vmem:[#allocation5 + $0xc88] sm:$0xff] }
 0x118   :  { %2650 = vmatpush2.msra.mxu1 %v533_v28  ;;  %2582 = vmatprep.subr.mxu0 %v466_v29  ;;  %v636_v28 = vld [vmem:[#allocation5 + $0xe98] sm:$0xff]  ;;  %v569_v29 = vld [vmem:[#allocation5 + $0xc80] sm:$0xff] }
 0x119   :  { %2651 = vmatprep.subr.mxu1 %v532_v30  ;;  %2583 = vmatpush2.msra.mxu0 %v465_v31  ;;  %v635_v30 = vld [vmem:[#allocation5 + $0xe90] sm:$0xff]  ;;  %v568_v31 = vld [vmem:[#allocation5 + $0xc78] sm:$0xff] }
 0x11a   :  { %2652 = vmatpush2.msra.mxu1 %v531_v34  ;;  %2584 = vmatprep.subr.mxu0 %v464_v35  ;;  %v633_v34 = vld [vmem:[#allocation5 + $0xe80] sm:$0xff]  ;;  %v566_v35 = vld [vmem:[#allocation5 + $0xc68] sm:$0xff] }
 0x11b   :  { %2653 = vmatprep.subr.mxu1 %v530_v36  ;;  %2585 = vmatpush2.msra.mxu0 %v463_v37  ;;  %v632_v36 = vld [vmem:[#allocation5 + $0xe78] sm:$0xff]  ;;  %v565_v37 = vld [vmem:[#allocation5 + $0xc60] sm:$0xff] }
 0x11c   :  { %2654 = vmatpush2.msra.mxu1 %v529_v38  ;;  %2586 = vmatprep.subr.mxu0 %v462_v39  ;;  %v631_v38 = vld [vmem:[#allocation5 + $0xe70] sm:$0xff]  ;;  %v564_v39 = vld [vmem:[#allocation5 + $0xc58] sm:$0xff] }
 0x11d   :  { %2655 = vmatprep.subr.mxu1 %v528_v43  ;;  %2587 = vmatpush2.msra.mxu0 %v461_v44  ;;  %v629_v43 = vld [vmem:[#allocation5 + $0xe60] sm:$0xff]  ;;  %v562_v44 = vld [vmem:[#allocation5 + $0xc48] sm:$0xff] }
 0x11e   :  { %2656 = vmatpush2.msra.mxu1 %v527_v47  ;;  %2588 = vmatprep.subr.mxu0 %v460_v48  ;;  %v627_v47 = vld [vmem:[#allocation5 + $0xe50] sm:$0xff]  ;;  %v560_v48 = vld [vmem:[#allocation5 + $0xc38] sm:$0xff] }
 0x11f   :  { %2657 = vmatprep.subr.mxu1 %v526_v49  ;;  %2589 = vmatpush2.msra.mxu0 %v459_v50  ;;  %v626_v49 = vld [vmem:[#allocation5 + $0xe48] sm:$0xff]  ;;  %v559_v50 = vld [vmem:[#allocation5 + $0xc30] sm:$0xff] }
 0x120   :  { %2658 = vmatpush2.msra.mxu1 %v525_v51  ;;  %2590 = vmatprep.subr.mxu0 %v458_v52  ;;  %v625_v51 = vld [vmem:[#allocation5 + $0xe40] sm:$0xff]  ;;  %v558_v52 = vld [vmem:[#allocation5 + $0xc28] sm:$0xff] }
 0x121   :  { %2659 = vmatprep.subr.mxu1 %v524_v56  ;;  %2591 = vmatpush2.msra.mxu0 %v457_v57  ;;  %v623_v56 = vld [vmem:[#allocation5 + $0xe30] sm:$0xff]  ;;  %v556_v57 = vld [vmem:[#allocation5 + $0xc18] sm:$0xff] }
 0x122   :  { %2592 = vmatprep.mubr.f32.mxu0 %v1860_v58  ;;  %2660 = vmatpush2.msra.mxu1 %v523_v59  ;;  %v622_v58 = vld [vmem:[#allocation5 + $0xe28] sm:$0xff]  ;;  %v555_v59 = vld [vmem:[#allocation5 + $0xc10] sm:$0xff] }
 0x123   :  { %2593 = vmatmul.mubr.f32.vlgmr.msra.gmra.mxu0 %v1859_v60  ;;  %2661 = vmatprep.subr.mxu1 %v522_v61  ;;  %v621_v60 = vld [vmem:[#allocation5 + $0xe20] sm:$0xff]  ;;  %v554_v61 = vld [vmem:[#allocation5 + $0xc08] sm:$0xff] }
 0x124   :  { %2670 = vmatprep.subr.mxu0 %v584_v62  ;;  %2662 = vmatpush2.msra.mxu1 %v521_v63  ;;  %v620_v62 = vld [vmem:[#allocation5 + $0xe18] sm:$0xff]  ;;  %v553_v63 = vld [vmem:[#allocation5 + $0xc00] sm:$0xff] }
 0x125   :  { %2663 = vmatprep.mubr.f32.mxu1 %v1862_v0  ;;  %2671 = vmatpush1.msra.mxu0 %v583_v1  ;;  %v619_v0 = vld [vmem:[#allocation5 + $0xe10] sm:$0xff]  ;;  %v616_v1 = vld [vmem:[#allocation5 + $0xdf8] sm:$0xff] }
 0x126   :  { %2664 = vmatmul.mubr.f32.vlgmr.msra.gmra.mxu1 %v1861_v2  ;;  %2672 = vmatprep.subr.mxu0 %v582_v3  ;;  %v618_v2 = vld [vmem:[#allocation5 + $0xe08] sm:$0xff]  ;;  %v615_v3 = vld [vmem:[#allocation5 + $0xdf0] sm:$0xff] }
 0x127   :  { %2741 = vmatprep.subr.mxu1 %v648_v4  ;;  %2673 = vmatpush1.msra.mxu0 %v581_v5  ;;  %v617_v4 = vld [vmem:[#allocation5 + $0xe00] sm:$0xff]  ;;  %v614_v5 = vld [vmem:[#allocation5 + $0xde8] sm:$0xff] }
 0x128   :  { %2742 = vmatpush1.msra.mxu1 %v647_v6  ;;  %2674 = vmatprep.subr.mxu0 %v580_v7  ;;  %v680_v6 = vld [vmem:[#allocation5 + $0xff8] sm:$0xff]  ;;  %v613_v7 = vld [vmem:[#allocation5 + $0xde0] sm:$0xff] }
 0x129   :  { %2743 = vmatprep.subr.mxu1 %v646_v8  ;;  %2675 = vmatpush1.msra.mxu0 %v579_v9  ;;  %v679_v8 = vld [vmem:[#allocation5 + $0xff0] sm:$0xff]  ;;  %v612_v9 = vld [vmem:[#allocation5 + $0xdd8] sm:$0xff] }
 0x12a   :  { %2744 = vmatpush1.msra.mxu1 %v645_v10  ;;  %2676 = vmatprep.subr.mxu0 %v578_v11  ;;  %v678_v10 = vld [vmem:[#allocation5 + $0xfe8] sm:$0xff]  ;;  %v611_v11 = vld [vmem:[#allocation5 + $0xdd0] sm:$0xff] }
 0x12b   :  { %2745 = vmatprep.subr.mxu1 %v644_v12  ;;  %2677 = vmatpush1.msra.mxu0 %v577_v13  ;;  %v677_v12 = vld [vmem:[#allocation5 + $0xfe0] sm:$0xff]  ;;  %v610_v13 = vld [vmem:[#allocation5 + $0xdc8] sm:$0xff] }
 0x12c   :  { %2746 = vmatpush1.msra.mxu1 %v643_v14  ;;  %2678 = vmatprep.subr.mxu0 %v576_v15  ;;  %v676_v14 = vld [vmem:[#allocation5 + $0xfd8] sm:$0xff]  ;;  %v609_v15 = vld [vmem:[#allocation5 + $0xdc0] sm:$0xff] }
 0x12d   :  { %2747 = vmatprep.subr.mxu1 %v642_v16  ;;  %2679 = vmatpush1.msra.mxu0 %v575_v17  ;;  %v675_v16 = vld [vmem:[#allocation5 + $0xfd0] sm:$0xff]  ;;  %v608_v17 = vld [vmem:[#allocation5 + $0xdb8] sm:$0xff] }
 0x12e   :  { %2748 = vmatpush1.msra.mxu1 %v641_v18  ;;  %2680 = vmatprep.subr.mxu0 %v574_v19  ;;  %v674_v18 = vld [vmem:[#allocation5 + $0xfc8] sm:$0xff]  ;;  %v607_v19 = vld [vmem:[#allocation5 + $0xdb0] sm:$0xff] }
 0x12f   :  { %2749 = vmatprep.subr.mxu1 %v640_v20  ;;  %2681 = vmatpush1.msra.mxu0 %v573_v21  ;;  %v673_v20 = vld [vmem:[#allocation5 + $0xfc0] sm:$0xff]  ;;  %v606_v21 = vld [vmem:[#allocation5 + $0xda8] sm:$0xff] }
 0x130   :  { %2750 = vmatpush1.msra.mxu1 %v639_v22  ;;  %2682 = vmatprep.subr.mxu0 %v572_v23  ;;  %v672_v22 = vld [vmem:[#allocation5 + $0xfb8] sm:$0xff]  ;;  %v605_v23 = vld [vmem:[#allocation5 + $0xda0] sm:$0xff] }
 0x131   :  { %2751 = vmatprep.subr.mxu1 %v638_v24  ;;  %2683 = vmatpush1.msra.mxu0 %v571_v25  ;;  %v671_v24 = vld [vmem:[#allocation5 + $0xfb0] sm:$0xff]  ;;  %v604_v25 = vld [vmem:[#allocation5 + $0xd98] sm:$0xff] }
 0x132   :  { %2752 = vmatpush1.msra.mxu1 %v637_v26  ;;  %2684 = vmatprep.subr.mxu0 %v570_v27  ;;  %v670_v26 = vld [vmem:[#allocation5 + $0xfa8] sm:$0xff]  ;;  %v603_v27 = vld [vmem:[#allocation5 + $0xd90] sm:$0xff] }
 0x133   :  { %2753 = vmatprep.subr.mxu1 %v636_v28  ;;  %2685 = vmatpush1.msra.mxu0 %v569_v29  ;;  %v669_v28 = vld [vmem:[#allocation5 + $0xfa0] sm:$0xff]  ;;  %v602_v29 = vld [vmem:[#allocation5 + $0xd88] sm:$0xff] }
 0x134   :  { %2754 = vmatpush1.msra.mxu1 %v635_v30  ;;  %2686 = vmatprep.subr.mxu0 %v568_v31  ;;  %v668_v30 = vld [vmem:[#allocation5 + $0xf98] sm:$0xff]  ;;  %v601_v31 = vld [vmem:[#allocation5 + $0xd80] sm:$0xff] }
 0x135   :  { %2755 = vmatprep.subr.mxu1 %v634_v32  ;;  %2687 = vmatpush1.msra.mxu0 %v567_v33  ;;  %v667_v32 = vld [vmem:[#allocation5 + $0xf90] sm:$0xff]  ;;  %v600_v33 = vld [vmem:[#allocation5 + $0xd78] sm:$0xff] }
 0x136   :  { %2756 = vmatpush1.msra.mxu1 %v633_v34  ;;  %2688 = vmatprep.subr.mxu0 %v566_v35  ;;  %v666_v34 = vld [vmem:[#allocation5 + $0xf88] sm:$0xff]  ;;  %v599_v35 = vld [vmem:[#allocation5 + $0xd70] sm:$0xff] }
 0x137   :  { %2757 = vmatprep.subr.mxu1 %v632_v36  ;;  %2689 = vmatpush1.msra.mxu0 %v565_v37  ;;  %v665_v36 = vld [vmem:[#allocation5 + $0xf80] sm:$0xff]  ;;  %v598_v37 = vld [vmem:[#allocation5 + $0xd68] sm:$0xff] }
 0x138   :  { %2758 = vmatpush1.msra.mxu1 %v631_v38  ;;  %2690 = vmatprep.subr.mxu0 %v564_v39  ;;  %v664_v38 = vld [vmem:[#allocation5 + $0xf78] sm:$0xff]  ;;  %v597_v39 = vld [vmem:[#allocation5 + $0xd60] sm:$0xff] }
 0x139   :  { %2759 = vmatprep.subr.mxu1 %v630_v40  ;;  %2691 = vmatpush1.msra.mxu0 %v563_v41  ;;  %v663_v40 = vld [vmem:[#allocation5 + $0xf70] sm:$0xff]  ;;  %v596_v41 = vld [vmem:[#allocation5 + $0xd58] sm:$0xff] }
 0x13a   :  { %2760 = vmatpush1.msra.mxu1 %v629_v43  ;;  %2692 = vmatprep.subr.mxu0 %v562_v44  ;;  %v124_v43 = vld [vmem:[#allocation3 + $0x18] sm:$0xff] }
 0x13b   :  { %2761 = vmatprep.subr.mxu1 %v628_v45  ;;  %2693 = vmatpush1.msra.mxu0 %v561_v46  ;;  %v136_v44 = vld [vmem:[#allocation3 + $0x78] sm:$0xff] }
 0x13c   :  { %2762 = vmatpush1.msra.mxu1 %v627_v47  ;;  %2694 = vmatprep.subr.mxu0 %v560_v48  ;;  %v148_v45 = vld [vmem:[#allocation3 + $0xd8] sm:$0xff]  ;;  %v662_v47 = vld [vmem:[#allocation5 + $0xf68] sm:$0xff]  ;;  %v595_v48 = vld [vmem:[#allocation5 + $0xd50] sm:$0xff] }
 0x13d   :  { %2763 = vmatprep.subr.mxu1 %v626_v49  ;;  %2695 = vmatpush1.msra.mxu0 %v559_v50  ;;  %v160_v46 = vld [vmem:[#allocation3 + $0x138] sm:$0xff]  ;;  %v661_v49 = vld [vmem:[#allocation5 + $0xf60] sm:$0xff]  ;;  %v594_v50 = vld [vmem:[#allocation5 + $0xd48] sm:$0xff] }
 0x13e   :  { %2764 = vmatpush1.msra.mxu1 %v625_v51  ;;  %2696 = vmatprep.subr.mxu0 %v558_v52  ;;  %v660_v51 = vld [vmem:[#allocation5 + $0xf58] sm:$0xff]  ;;  %v593_v52 = vld [vmem:[#allocation5 + $0xd40] sm:$0xff] }
 0x13f   :  { %2765 = vmatprep.subr.mxu1 %v624_v53  ;;  %2697 = vmatpush1.msra.mxu0 %v557_v54  ;;  %v1863_v53 = vcombine.low %v124_v43, %v136_v44  ;;  %v1865_v54 = vcombine.low %v148_v45, %v160_v46 }
 0x140   :  { %2766 = vmatpush1.msra.mxu1 %v623_v56  ;;  %2698 = vmatprep.subr.mxu0 %v556_v57  ;;  %v659_v56 = vld [vmem:[#allocation5 + $0xf50] sm:$0xff]  ;;  %v592_v57 = vld [vmem:[#allocation5 + $0xd38] sm:$0xff] }
 0x141   :  { %2767 = vmatprep.subr.mxu1 %v622_v58  ;;  %2699 = vmatpush1.msra.mxu0 %v555_v59  ;;  %v658_v58 = vld [vmem:[#allocation5 + $0xf48] sm:$0xff]  ;;  %v591_v59 = vld [vmem:[#allocation5 + $0xd30] sm:$0xff] }
 0x142   :  { %2768 = vmatpush1.msra.mxu1 %v621_v60  ;;  %2700 = vmatprep.subr.mxu0 %v554_v61  ;;  %v657_v60 = vld [vmem:[#allocation5 + $0xf40] sm:$0xff]  ;;  %v590_v61 = vld [vmem:[#allocation5 + $0xd28] sm:$0xff] }
 0x143   :  { %2769 = vmatprep.subr.mxu1 %v620_v62  ;;  %2701 = vmatpush1.msra.mxu0 %v553_v63  ;;  %v1864_v62 = vcombine.high %v124_v43, %v136_v44  ;;  %v1866_v63 = vcombine.high %v148_v45, %v160_v46  ;;  %v767_v43 = vld [vmem:[#allocation5 + $0x12b0] sm:$0xff]  ;;  %v700_v44 = vld [vmem:[#allocation5 + $0x1098] sm:$0xff]  ;;  %v766_v45 = vld [vmem:[#allocation5 + $0x12a8] sm:$0xff] }
 0x144   :  { %2770 = vmatpush1.msra.mxu1 %v619_v0  ;;  %2702 = vmatprep.subr.mxu0 %v616_v1  ;;  %v656_v0 = vld [vmem:[#allocation5 + $0xf38] sm:$0xff]  ;;  %v589_v1 = vld [vmem:[#allocation5 + $0xd20] sm:$0xff]  ;;  %v699_v46 = vld [vmem:[#allocation5 + $0x1090] sm:$0xff] }
 0x145   :  { %2771 = vmatprep.subr.mxu1 %v618_v2  ;;  %2703 = vmatpush2.msra.mxu0 %v615_v3  ;;  %v1873_v2 = vrot.slane %v1863_v53, %v4572_v55  ;;  %v1887_v3 = vrot.slane %v1865_v54, %v4572_v55  ;;  %v762_v53 = vld [vmem:[#allocation5 + $0x1288] sm:$0xff]  ;;  %v695_v54 = vld [vmem:[#allocation5 + $0x1070] sm:$0xff] }
 0x146   :  { %2772 = vmatpush1.msra.mxu1 %v617_v4  ;;  %2704 = vmatprep.subr.mxu0 %v614_v5  ;;  %v655_v4 = vld [vmem:[#allocation5 + $0xf30] sm:$0xff]  ;;  %v588_v5 = vld [vmem:[#allocation5 + $0xd18] sm:$0xff] }
 0x147   :  { %2773 = vmatprep.subr.mxu1 %v680_v6  ;;  %2705 = vmatpush2.msra.mxu0 %v613_v7  ;;  %v654_v6 = vld [vmem:[#allocation5 + $0xf28] sm:$0xff]  ;;  %v587_v7 = vld [vmem:[#allocation5 + $0xd10] sm:$0xff] }
 0x148   :  { %2774 = vmatpush2.msra.mxu1 %v679_v8  ;;  %2706 = vmatprep.subr.mxu0 %v612_v9  ;;  %v653_v8 = vld [vmem:[#allocation5 + $0xf20] sm:$0xff]  ;;  %v586_v9 = vld [vmem:[#allocation5 + $0xd08] sm:$0xff] }
 0x149   :  { %2775 = vmatprep.subr.mxu1 %v678_v10  ;;  %2707 = vmatpush2.msra.mxu0 %v611_v11  ;;  %v1880_v10 = vrot.slane %v1864_v62, %v4572_v55  ;;  %v1894_v11 = vrot.slane %v1866_v63, %v4572_v55  ;;  %v758_v62 = vld [vmem:[#allocation5 + $0x1268] sm:$0xff]  ;;  %v691_v63 = vld [vmem:[#allocation5 + $0x1050] sm:$0xff] }
 0x14a   :  { %2776 = vmatpush2.msra.mxu1 %v677_v12  ;;  %2708 = vmatprep.subr.mxu0 %v610_v13  ;;  %v652_v12 = vld [vmem:[#allocation5 + $0xf18] sm:$0xff]  ;;  %v585_v13 = vld [vmem:[#allocation5 + $0xd00] sm:$0xff] }
 0x14b   :  { %2777 = vmatprep.subr.mxu1 %v676_v14  ;;  %2709 = vmatpush2.msra.mxu0 %v609_v15  ;;  %v1896_v14 = vcombine.high %v1873_v2, %v1887_v3  ;;  %v651_v15 = vld [vmem:[#allocation5 + $0xf10] sm:$0xff] }
 0x14c   :  { %2778 = vmatpush2.msra.mxu1 %v675_v16  ;;  %2710 = vmatprep.subr.mxu0 %v608_v17  ;;  %v1895_v16 = vcombine.low %v1873_v2, %v1887_v3  ;;  %v650_v17 = vld [vmem:[#allocation5 + $0xf08] sm:$0xff]  ;;  %v756_v2 = vld [vmem:[#allocation5 + $0x1258] sm:$0xff]  ;;  %v689_v3 = vld [vmem:[#allocation5 + $0x1040] sm:$0xff] }
 0x14d   :  { %2779 = vmatprep.subr.mxu1 %v674_v18  ;;  %2711 = vmatpush2.msra.mxu0 %v607_v19  ;;  %v712_v18 = vld [vmem:[#allocation5 + $0x10f8] sm:$0xff]  ;;  %v649_v19 = vld [vmem:[#allocation5 + $0xf00] sm:$0xff] }
 0x14e   :  { %2780 = vmatpush2.msra.mxu1 %v673_v20  ;;  %2712 = vmatprep.subr.mxu0 %v606_v21  ;;  %v1898_v20 = vcombine.high %v1880_v10, %v1894_v11  ;;  %v711_v21 = vld [vmem:[#allocation5 + $0x10f0] sm:$0xff] }
 0x14f   :  { %2781 = vmatprep.subr.mxu1 %v672_v22  ;;  %2713 = vmatpush2.msra.mxu0 %v605_v23  ;;  %v1897_v22 = vcombine.low %v1880_v10, %v1894_v11  ;;  %v710_v23 = vld [vmem:[#allocation5 + $0x10e8] sm:$0xff]  ;;  %v752_v10 = vld [vmem:[#allocation5 + $0x1238] sm:$0xff]  ;;  %v685_v11 = vld [vmem:[#allocation5 + $0x1020] sm:$0xff] }
 0x150   :  { %2782 = vmatpush2.msra.mxu1 %v671_v24  ;;  %2714 = vmatprep.subr.mxu0 %v604_v25  ;;  %v776_v24 = vld [vmem:[#allocation5 + $0x12f8] sm:$0xff]  ;;  %v709_v25 = vld [vmem:[#allocation5 + $0x10e0] sm:$0xff] }
 0x151   :  { %2783 = vmatprep.subr.mxu1 %v670_v26  ;;  %2715 = vmatpush2.msra.mxu0 %v603_v27  ;;  %v775_v26 = vld [vmem:[#allocation5 + $0x12f0] sm:$0xff]  ;;  %v708_v27 = vld [vmem:[#allocation5 + $0x10d8] sm:$0xff] }
 0x152   :  { %2784 = vmatpush2.msra.mxu1 %v669_v28  ;;  %2716 = vmatprep.subr.mxu0 %v602_v29  ;;  %v774_v28 = vld [vmem:[#allocation5 + $0x12e8] sm:$0xff]  ;;  %v707_v29 = vld [vmem:[#allocation5 + $0x10d0] sm:$0xff] }
 0x153   :  { %2785 = vmatprep.subr.mxu1 %v668_v30  ;;  %2717 = vmatpush2.msra.mxu0 %v601_v31  ;;  %v773_v30 = vld [vmem:[#allocation5 + $0x12e0] sm:$0xff]  ;;  %v706_v31 = vld [vmem:[#allocation5 + $0x10c8] sm:$0xff] }
 0x154   :  { %2786 = vmatpush2.msra.mxu1 %v667_v32  ;;  %2718 = vmatprep.subr.mxu0 %v600_v33  ;;  %v772_v32 = vld [vmem:[#allocation5 + $0x12d8] sm:$0xff]  ;;  %v705_v33 = vld [vmem:[#allocation5 + $0x10c0] sm:$0xff] }
 0x155   :  { %2787 = vmatprep.subr.mxu1 %v666_v34  ;;  %2719 = vmatpush2.msra.mxu0 %v599_v35  ;;  %v771_v34 = vld [vmem:[#allocation5 + $0x12d0] sm:$0xff]  ;;  %v704_v35 = vld [vmem:[#allocation5 + $0x10b8] sm:$0xff] }
 0x156   :  { %2788 = vmatpush2.msra.mxu1 %v665_v36  ;;  %2720 = vmatprep.subr.mxu0 %v598_v37  ;;  %v770_v36 = vld [vmem:[#allocation5 + $0x12c8] sm:$0xff]  ;;  %v703_v37 = vld [vmem:[#allocation5 + $0x10b0] sm:$0xff] }
 0x157   :  { %2789 = vmatprep.subr.mxu1 %v664_v38  ;;  %2721 = vmatpush2.msra.mxu0 %v597_v39  ;;  %v769_v38 = vld [vmem:[#allocation5 + $0x12c0] sm:$0xff]  ;;  %v702_v39 = vld [vmem:[#allocation5 + $0x10a8] sm:$0xff] }
 0x158   :  { %2790 = vmatpush2.msra.mxu1 %v663_v40  ;;  %2722 = vmatprep.subr.mxu0 %v596_v41  ;;  %v768_v40 = vld [vmem:[#allocation5 + $0x12b8] sm:$0xff]  ;;  %v701_v41 = vld [vmem:[#allocation5 + $0x10a0] sm:$0xff] }
 0x159   :  { %2791 = vmatprep.subr.mxu1 %v662_v47  ;;  %2723 = vmatpush2.msra.mxu0 %v595_v48  ;;  %v765_v47 = vld [vmem:[#allocation5 + $0x12a0] sm:$0xff]  ;;  %v698_v48 = vld [vmem:[#allocation5 + $0x1088] sm:$0xff] }
 0x15a   :  { %2792 = vmatpush2.msra.mxu1 %v661_v49  ;;  %2724 = vmatprep.subr.mxu0 %v594_v50  ;;  %v764_v49 = vld [vmem:[#allocation5 + $0x1298] sm:$0xff]  ;;  %v697_v50 = vld [vmem:[#allocation5 + $0x1080] sm:$0xff] }
 0x15b   :  { %2793 = vmatprep.subr.mxu1 %v660_v51  ;;  %2725 = vmatpush2.msra.mxu0 %v593_v52  ;;  %v763_v51 = vld [vmem:[#allocation5 + $0x1290] sm:$0xff]  ;;  %v696_v52 = vld [vmem:[#allocation5 + $0x1078] sm:$0xff] }
 0x15c   :  { %2794 = vmatpush2.msra.mxu1 %v659_v56  ;;  %2726 = vmatprep.subr.mxu0 %v592_v57  ;;  %v761_v56 = vld [vmem:[#allocation5 + $0x1280] sm:$0xff]  ;;  %v694_v57 = vld [vmem:[#allocation5 + $0x1068] sm:$0xff] }
 0x15d   :  { %2795 = vmatprep.subr.mxu1 %v658_v58  ;;  %2727 = vmatpush2.msra.mxu0 %v591_v59  ;;  %v760_v58 = vld [vmem:[#allocation5 + $0x1278] sm:$0xff]  ;;  %v693_v59 = vld [vmem:[#allocation5 + $0x1060] sm:$0xff] }
 0x15e   :  { %2796 = vmatpush2.msra.mxu1 %v657_v60  ;;  %2728 = vmatprep.subr.mxu0 %v590_v61  ;;  %v759_v60 = vld [vmem:[#allocation5 + $0x1270] sm:$0xff]  ;;  %v692_v61 = vld [vmem:[#allocation5 + $0x1058] sm:$0xff] }
 0x15f   :  { %2797 = vmatprep.subr.mxu1 %v656_v0  ;;  %2729 = vmatpush2.msra.mxu0 %v589_v1  ;;  %v757_v0 = vld [vmem:[#allocation5 + $0x1260] sm:$0xff]  ;;  %v690_v1 = vld [vmem:[#allocation5 + $0x1048] sm:$0xff] }
 0x160   :  { %2798 = vmatpush2.msra.mxu1 %v655_v4  ;;  %2730 = vmatprep.subr.mxu0 %v588_v5  ;;  %v755_v4 = vld [vmem:[#allocation5 + $0x1250] sm:$0xff]  ;;  %v688_v5 = vld [vmem:[#allocation5 + $0x1038] sm:$0xff] }
 0x161   :  { %2799 = vmatprep.subr.mxu1 %v654_v6  ;;  %2731 = vmatpush2.msra.mxu0 %v587_v7  ;;  %v754_v6 = vld [vmem:[#allocation5 + $0x1248] sm:$0xff]  ;;  %v687_v7 = vld [vmem:[#allocation5 + $0x1030] sm:$0xff] }
 0x162   :  { %2800 = vmatpush2.msra.mxu1 %v653_v8  ;;  %2732 = vmatprep.subr.mxu0 %v586_v9  ;;  %v753_v8 = vld [vmem:[#allocation5 + $0x1240] sm:$0xff]  ;;  %v686_v9 = vld [vmem:[#allocation5 + $0x1028] sm:$0xff] }
 0x163   :  { %2801 = vmatprep.subr.mxu1 %v652_v12  ;;  %2733 = vmatpush2.msra.mxu0 %v585_v13  ;;  %v751_v12 = vld [vmem:[#allocation5 + $0x1230] sm:$0xff]  ;;  %v684_v13 = vld [vmem:[#allocation5 + $0x1018] sm:$0xff] }
 0x164   :  { %2734 = vmatprep.mubr.f32.mxu0 %v1896_v14  ;;  %2802 = vmatpush2.msra.mxu1 %v651_v15  ;;  %v750_v14 = vld [vmem:[#allocation5 + $0x1228] sm:$0xff]  ;;  %v683_v15 = vld [vmem:[#allocation5 + $0x1010] sm:$0xff] }
 0x165   :  { %2735 = vmatmul.mubr.f32.vlgmr.msra.gmra.mxu0 %v1895_v16  ;;  %2803 = vmatprep.subr.mxu1 %v650_v17  ;;  %v749_v16 = vld [vmem:[#allocation5 + $0x1220] sm:$0xff]  ;;  %v682_v17 = vld [vmem:[#allocation5 + $0x1008] sm:$0xff] }
 0x166   :  { %2812 = vmatprep.subr.mxu0 %v712_v18  ;;  %2804 = vmatpush2.msra.mxu1 %v649_v19  ;;  %v748_v18 = vld [vmem:[#allocation5 + $0x1218] sm:$0xff]  ;;  %v681_v19 = vld [vmem:[#allocation5 + $0x1000] sm:$0xff] }
 0x167   :  { %2805 = vmatprep.mubr.f32.mxu1 %v1898_v20  ;;  %2813 = vmatpush1.msra.mxu0 %v711_v21  ;;  %v747_v20 = vld [vmem:[#allocation5 + $0x1210] sm:$0xff]  ;;  %v744_v21 = vld [vmem:[#allocation5 + $0x11f8] sm:$0xff] }
 0x168   :  { %2806 = vmatmul.mubr.f32.vlgmr.msra.gmra.mxu1 %v1897_v22  ;;  %2814 = vmatprep.subr.mxu0 %v710_v23  ;;  %v746_v22 = vld [vmem:[#allocation5 + $0x1208] sm:$0xff]  ;;  %v743_v23 = vld [vmem:[#allocation5 + $0x11f0] sm:$0xff] }
 0x169   :  { %2883 = vmatprep.subr.mxu1 %v776_v24  ;;  %2815 = vmatpush1.msra.mxu0 %v709_v25  ;;  %v745_v24 = vld [vmem:[#allocation5 + $0x1200] sm:$0xff]  ;;  %v742_v25 = vld [vmem:[#allocation5 + $0x11e8] sm:$0xff] }
 0x16a   :  { %2884 = vmatpush1.msra.mxu1 %v775_v26  ;;  %2816 = vmatprep.subr.mxu0 %v708_v27  ;;  %v808_v26 = vld [vmem:[#allocation5 + $0x13f8] sm:$0xff]  ;;  %v741_v27 = vld [vmem:[#allocation5 + $0x11e0] sm:$0xff] }
 0x16b   :  { %2885 = vmatprep.subr.mxu1 %v774_v28  ;;  %2817 = vmatpush1.msra.mxu0 %v707_v29  ;;  %v807_v28 = vld [vmem:[#allocation5 + $0x13f0] sm:$0xff]  ;;  %v740_v29 = vld [vmem:[#allocation5 + $0x11d8] sm:$0xff] }
 0x16c   :  { %2886 = vmatpush1.msra.mxu1 %v773_v30  ;;  %2818 = vmatprep.subr.mxu0 %v706_v31  ;;  %v806_v30 = vld [vmem:[#allocation5 + $0x13e8] sm:$0xff]  ;;  %v739_v31 = vld [vmem:[#allocation5 + $0x11d0] sm:$0xff] }
 0x16d   :  { %2887 = vmatprep.subr.mxu1 %v772_v32  ;;  %2819 = vmatpush1.msra.mxu0 %v705_v33  ;;  %v805_v32 = vld [vmem:[#allocation5 + $0x13e0] sm:$0xff]  ;;  %v738_v33 = vld [vmem:[#allocation5 + $0x11c8] sm:$0xff] }
 0x16e   :  { %2888 = vmatpush1.msra.mxu1 %v771_v34  ;;  %2820 = vmatprep.subr.mxu0 %v704_v35  ;;  %v804_v34 = vld [vmem:[#allocation5 + $0x13d8] sm:$0xff]  ;;  %v737_v35 = vld [vmem:[#allocation5 + $0x11c0] sm:$0xff] }
 0x16f   :  { %2889 = vmatprep.subr.mxu1 %v770_v36  ;;  %2821 = vmatpush1.msra.mxu0 %v703_v37  ;;  %v803_v36 = vld [vmem:[#allocation5 + $0x13d0] sm:$0xff]  ;;  %v736_v37 = vld [vmem:[#allocation5 + $0x11b8] sm:$0xff] }
 0x170   :  { %2890 = vmatpush1.msra.mxu1 %v769_v38  ;;  %2822 = vmatprep.subr.mxu0 %v702_v39  ;;  %v802_v38 = vld [vmem:[#allocation5 + $0x13c8] sm:$0xff]  ;;  %v735_v39 = vld [vmem:[#allocation5 + $0x11b0] sm:$0xff] }
 0x171   :  { %2891 = vmatprep.subr.mxu1 %v768_v40  ;;  %2823 = vmatpush1.msra.mxu0 %v701_v41  ;;  %v801_v40 = vld [vmem:[#allocation5 + $0x13c0] sm:$0xff]  ;;  %v734_v41 = vld [vmem:[#allocation5 + $0x11a8] sm:$0xff] }
 0x172   :  { %2892 = vmatpush1.msra.mxu1 %v767_v43  ;;  %2824 = vmatprep.subr.mxu0 %v700_v44  ;;  %v800_v43 = vld [vmem:[#allocation5 + $0x13b8] sm:$0xff]  ;;  %v733_v44 = vld [vmem:[#allocation5 + $0x11a0] sm:$0xff] }
 0x173   :  { %2893 = vmatprep.subr.mxu1 %v766_v45  ;;  %2825 = vmatpush1.msra.mxu0 %v699_v46  ;;  %v799_v45 = vld [vmem:[#allocation5 + $0x13b0] sm:$0xff]  ;;  %v732_v46 = vld [vmem:[#allocation5 + $0x1198] sm:$0xff] }
 0x174   :  { %2894 = vmatpush1.msra.mxu1 %v765_v47  ;;  %2826 = vmatprep.subr.mxu0 %v698_v48  ;;  %v798_v47 = vld [vmem:[#allocation5 + $0x13a8] sm:$0xff]  ;;  %v731_v48 = vld [vmem:[#allocation5 + $0x1190] sm:$0xff] }
 0x175   :  { %2895 = vmatprep.subr.mxu1 %v764_v49  ;;  %2827 = vmatpush1.msra.mxu0 %v697_v50  ;;  %v797_v49 = vld [vmem:[#allocation5 + $0x13a0] sm:$0xff]  ;;  %v730_v50 = vld [vmem:[#allocation5 + $0x1188] sm:$0xff] }
 0x176   :  { %2896 = vmatpush1.msra.mxu1 %v763_v51  ;;  %2828 = vmatprep.subr.mxu0 %v696_v52  ;;  %v796_v51 = vld [vmem:[#allocation5 + $0x1398] sm:$0xff]  ;;  %v729_v52 = vld [vmem:[#allocation5 + $0x1180] sm:$0xff] }
 0x177   :  { %2897 = vmatprep.subr.mxu1 %v762_v53  ;;  %2829 = vmatpush1.msra.mxu0 %v695_v54  ;;  %v795_v53 = vld [vmem:[#allocation5 + $0x1390] sm:$0xff]  ;;  %v728_v54 = vld [vmem:[#allocation5 + $0x1178] sm:$0xff] }
 0x178   :  { %2898 = vmatpush1.msra.mxu1 %v761_v56  ;;  %2830 = vmatprep.subr.mxu0 %v694_v57  ;;  %v794_v56 = vld [vmem:[#allocation5 + $0x1388] sm:$0xff]  ;;  %v727_v57 = vld [vmem:[#allocation5 + $0x1170] sm:$0xff] }
 0x179   :  { %2899 = vmatprep.subr.mxu1 %v760_v58  ;;  %2831 = vmatpush1.msra.mxu0 %v693_v59  ;;  %v793_v58 = vld [vmem:[#allocation5 + $0x1380] sm:$0xff]  ;;  %v726_v59 = vld [vmem:[#allocation5 + $0x1168] sm:$0xff] }
 0x17a   :  { %2900 = vmatpush1.msra.mxu1 %v759_v60  ;;  %2832 = vmatprep.subr.mxu0 %v692_v61  ;;  %v792_v60 = vld [vmem:[#allocation5 + $0x1378] sm:$0xff]  ;;  %v725_v61 = vld [vmem:[#allocation5 + $0x1160] sm:$0xff] }
 0x17b   :  { %2901 = vmatprep.subr.mxu1 %v758_v62  ;;  %2833 = vmatpush1.msra.mxu0 %v691_v63  ;;  %v791_v62 = vld [vmem:[#allocation5 + $0x1370] sm:$0xff]  ;;  %v724_v63 = vld [vmem:[#allocation5 + $0x1158] sm:$0xff] }
 0x17c   :  { %2902 = vmatpush1.msra.mxu1 %v757_v0  ;;  %2834 = vmatprep.subr.mxu0 %v690_v1  ;;  %v125_v0 = vld [vmem:[#allocation3 + $0x20] sm:$0xff] }
 0x17d   :  { %2903 = vmatprep.subr.mxu1 %v756_v2  ;;  %2835 = vmatpush1.msra.mxu0 %v689_v3  ;;  %v137_v1 = vld [vmem:[#allocation3 + $0x80] sm:$0xff] }
 0x17e   :  { %2904 = vmatpush1.msra.mxu1 %v755_v4  ;;  %2836 = vmatprep.subr.mxu0 %v688_v5  ;;  %v149_v2 = vld [vmem:[#allocation3 + $0xe0] sm:$0xff]  ;;  %v790_v4 = vld [vmem:[#allocation5 + $0x1368] sm:$0xff]  ;;  %v723_v5 = vld [vmem:[#allocation5 + $0x1150] sm:$0xff] }
 0x17f   :  { %2905 = vmatprep.subr.mxu1 %v754_v6  ;;  %2837 = vmatpush1.msra.mxu0 %v687_v7  ;;  %v161_v3 = vld [vmem:[#allocation3 + $0x140] sm:$0xff]  ;;  %v722_v7 = vld [vmem:[#allocation5 + $0x1148] sm:$0xff] }
 0x180   :  { %2906 = vmatpush1.msra.mxu1 %v753_v8  ;;  %2838 = vmatprep.subr.mxu0 %v686_v9  ;;  %v789_v6 = vld [vmem:[#allocation5 + $0x1360] sm:$0xff]  ;;  %v788_v8 = vld [vmem:[#allocation5 + $0x1358] sm:$0xff] }
 0x181   :  { %2907 = vmatprep.subr.mxu1 %v752_v10  ;;  %2839 = vmatpush1.msra.mxu0 %v685_v11  ;;  %v721_v9 = vld [vmem:[#allocation5 + $0x1140] sm:$0xff]  ;;  %v1899_v10 = vcombine.low %v125_v0, %v137_v1  ;;  %v1901_v11 = vcombine.low %v149_v2, %v161_v3 }
 0x182   :  { %2908 = vmatpush1.msra.mxu1 %v751_v12  ;;  %2840 = vmatprep.subr.mxu0 %v684_v13  ;;  %v787_v12 = vld [vmem:[#allocation5 + $0x1350] sm:$0xff]  ;;  %v720_v13 = vld [vmem:[#allocation5 + $0x1138] sm:$0xff] }
 0x183   :  { %2909 = vmatprep.subr.mxu1 %v750_v14  ;;  %2841 = vmatpush1.msra.mxu0 %v683_v15  ;;  %v786_v14 = vld [vmem:[#allocation5 + $0x1348] sm:$0xff]  ;;  %v719_v15 = vld [vmem:[#allocation5 + $0x1130] sm:$0xff] }
 0x184   :  { %2910 = vmatpush1.msra.mxu1 %v749_v16  ;;  %2842 = vmatprep.subr.mxu0 %v682_v17  ;;  %v785_v16 = vld [vmem:[#allocation5 + $0x1340] sm:$0xff]  ;;  %v718_v17 = vld [vmem:[#allocation5 + $0x1128] sm:$0xff] }
 0x185   :  { %2911 = vmatprep.subr.mxu1 %v748_v18  ;;  %2843 = vmatpush1.msra.mxu0 %v681_v19  ;;  %v1900_v18 = vcombine.high %v125_v0, %v137_v1  ;;  %v1902_v19 = vcombine.high %v149_v2, %v161_v3  ;;  %v895_v0 = vld [vmem:[#allocation5 + $0x16b0] sm:$0xff]  ;;  %v828_v1 = vld [vmem:[#allocation5 + $0x1498] sm:$0xff]  ;;  %v894_v2 = vld [vmem:[#allocation5 + $0x16a8] sm:$0xff] }
 0x186   :  { %2912 = vmatpush1.msra.mxu1 %v747_v20  ;;  %2844 = vmatprep.subr.mxu0 %v744_v21  ;;  %v784_v20 = vld [vmem:[#allocation5 + $0x1338] sm:$0xff]  ;;  %v717_v21 = vld [vmem:[#allocation5 + $0x1120] sm:$0xff]  ;;  %v827_v3 = vld [vmem:[#allocation5 + $0x1490] sm:$0xff] }
 0x187   :  { %2913 = vmatprep.subr.mxu1 %v746_v22  ;;  %2845 = vmatpush2.msra.mxu0 %v743_v23  ;;  %v1909_v22 = vrot.slane %v1899_v10, %v4572_v55  ;;  %v1923_v23 = vrot.slane %v1901_v11, %v4572_v55  ;;  %v890_v10 = vld [vmem:[#allocation5 + $0x1688] sm:$0xff]  ;;  %v823_v11 = vld [vmem:[#allocation5 + $0x1470] sm:$0xff] }
 0x188   :  { %2914 = vmatpush1.msra.mxu1 %v745_v24  ;;  %2846 = vmatprep.subr.mxu0 %v742_v25  ;;  %v783_v24 = vld [vmem:[#allocation5 + $0x1330] sm:$0xff]  ;;  %v716_v25 = vld [vmem:[#allocation5 + $0x1118] sm:$0xff] }
 0x189   :  { %2915 = vmatprep.subr.mxu1 %v808_v26  ;;  %2847 = vmatpush2.msra.mxu0 %v741_v27  ;;  %v782_v26 = vld [vmem:[#allocation5 + $0x1328] sm:$0xff]  ;;  %v715_v27 = vld [vmem:[#allocation5 + $0x1110] sm:$0xff] }
 0x18a   :  { %2916 = vmatpush2.msra.mxu1 %v807_v28  ;;  %2848 = vmatprep.subr.mxu0 %v740_v29  ;;  %v781_v28 = vld [vmem:[#allocation5 + $0x1320] sm:$0xff]  ;;  %v714_v29 = vld [vmem:[#allocation5 + $0x1108] sm:$0xff] }
 0x18b   :  { %2917 = vmatprep.subr.mxu1 %v806_v30  ;;  %2849 = vmatpush2.msra.mxu0 %v739_v31  ;;  %v1916_v30 = vrot.slane %v1900_v18, %v4572_v55  ;;  %v1930_v31 = vrot.slane %v1902_v19, %v4572_v55  ;;  %v886_v18 = vld [vmem:[#allocation5 + $0x1668] sm:$0xff]  ;;  %v819_v19 = vld [vmem:[#allocation5 + $0x1450] sm:$0xff] }
 0x18c   :  { %2918 = vmatpush2.msra.mxu1 %v805_v32  ;;  %2850 = vmatprep.subr.mxu0 %v738_v33  ;;  %v780_v32 = vld [vmem:[#allocation5 + $0x1318] sm:$0xff]  ;;  %v713_v33 = vld [vmem:[#allocation5 + $0x1100] sm:$0xff] }
 0x18d   :  { %2919 = vmatprep.subr.mxu1 %v804_v34  ;;  %2851 = vmatpush2.msra.mxu0 %v737_v35  ;;  %v1932_v34 = vcombine.high %v1909_v22, %v1923_v23  ;;  %v779_v35 = vld [vmem:[#allocation5 + $0x1310] sm:$0xff] }
 0x18e   :  { %2920 = vmatpush2.msra.mxu1 %v803_v36  ;;  %2852 = vmatprep.subr.mxu0 %v736_v37  ;;  %v1931_v36 = vcombine.low %v1909_v22, %v1923_v23  ;;  %v778_v37 = vld [vmem:[#allocation5 + $0x1308] sm:$0xff]  ;;  %v884_v22 = vld [vmem:[#allocation5 + $0x1658] sm:$0xff]  ;;  %v817_v23 = vld [vmem:[#allocation5 + $0x1440] sm:$0xff] }
 0x18f   :  { %2921 = vmatprep.subr.mxu1 %v802_v38  ;;  %2853 = vmatpush2.msra.mxu0 %v735_v39  ;;  %v840_v38 = vld [vmem:[#allocation5 + $0x14f8] sm:$0xff]  ;;  %v777_v39 = vld [vmem:[#allocation5 + $0x1300] sm:$0xff] }
 0x190   :  { %2922 = vmatpush2.msra.mxu1 %v801_v40  ;;  %2854 = vmatprep.subr.mxu0 %v734_v41  ;;  %v1934_v40 = vcombine.high %v1916_v30, %v1930_v31  ;;  %v839_v41 = vld [vmem:[#allocation5 + $0x14f0] sm:$0xff] }
 0x191   :  { %2923 = vmatprep.subr.mxu1 %v800_v43  ;;  %2855 = vmatpush2.msra.mxu0 %v733_v44  ;;  %v1933_v43 = vcombine.low %v1916_v30, %v1930_v31  ;;  %v838_v44 = vld [vmem:[#allocation5 + $0x14e8] sm:$0xff]  ;;  %v880_v30 = vld [vmem:[#allocation5 + $0x1638] sm:$0xff]  ;;  %v813_v31 = vld [vmem:[#allocation5 + $0x1420] sm:$0xff] }
 0x192   :  { %2924 = vmatpush2.msra.mxu1 %v799_v45  ;;  %2856 = vmatprep.subr.mxu0 %v732_v46  ;;  %v904_v45 = vld [vmem:[#allocation5 + $0x16f8] sm:$0xff]  ;;  %v837_v46 = vld [vmem:[#allocation5 + $0x14e0] sm:$0xff] }
 0x193   :  { %2925 = vmatprep.subr.mxu1 %v798_v47  ;;  %2857 = vmatpush2.msra.mxu0 %v731_v48  ;;  %v903_v47 = vld [vmem:[#allocation5 + $0x16f0] sm:$0xff]  ;;  %v836_v48 = vld [vmem:[#allocation5 + $0x14d8] sm:$0xff] }
 0x194   :  { %2926 = vmatpush2.msra.mxu1 %v797_v49  ;;  %2858 = vmatprep.subr.mxu0 %v730_v50  ;;  %v902_v49 = vld [vmem:[#allocation5 + $0x16e8] sm:$0xff]  ;;  %v835_v50 = vld [vmem:[#allocation5 + $0x14d0] sm:$0xff] }
 0x195   :  { %2927 = vmatprep.subr.mxu1 %v796_v51  ;;  %2859 = vmatpush2.msra.mxu0 %v729_v52  ;;  %v901_v51 = vld [vmem:[#allocation5 + $0x16e0] sm:$0xff]  ;;  %v834_v52 = vld [vmem:[#allocation5 + $0x14c8] sm:$0xff] }
 0x196   :  { %2928 = vmatpush2.msra.mxu1 %v795_v53  ;;  %2860 = vmatprep.subr.mxu0 %v728_v54  ;;  %v900_v53 = vld [vmem:[#allocation5 + $0x16d8] sm:$0xff]  ;;  %v833_v54 = vld [vmem:[#allocation5 + $0x14c0] sm:$0xff] }
 0x197   :  { %2929 = vmatprep.subr.mxu1 %v794_v56  ;;  %2861 = vmatpush2.msra.mxu0 %v727_v57  ;;  %v899_v56 = vld [vmem:[#allocation5 + $0x16d0] sm:$0xff]  ;;  %v832_v57 = vld [vmem:[#allocation5 + $0x14b8] sm:$0xff] }
 0x198   :  { %2930 = vmatpush2.msra.mxu1 %v793_v58  ;;  %2862 = vmatprep.subr.mxu0 %v726_v59  ;;  %v898_v58 = vld [vmem:[#allocation5 + $0x16c8] sm:$0xff]  ;;  %v831_v59 = vld [vmem:[#allocation5 + $0x14b0] sm:$0xff] }
 0x199   :  { %2931 = vmatprep.subr.mxu1 %v792_v60  ;;  %2863 = vmatpush2.msra.mxu0 %v725_v61  ;;  %v897_v60 = vld [vmem:[#allocation5 + $0x16c0] sm:$0xff]  ;;  %v830_v61 = vld [vmem:[#allocation5 + $0x14a8] sm:$0xff] }
 0x19a   :  { %2932 = vmatpush2.msra.mxu1 %v791_v62  ;;  %2864 = vmatprep.subr.mxu0 %v724_v63  ;;  %v896_v62 = vld [vmem:[#allocation5 + $0x16b8] sm:$0xff]  ;;  %v829_v63 = vld [vmem:[#allocation5 + $0x14a0] sm:$0xff] }
 0x19b   :  { %2933 = vmatprep.subr.mxu1 %v790_v4  ;;  %2865 = vmatpush2.msra.mxu0 %v723_v5  ;;  %v893_v4 = vld [vmem:[#allocation5 + $0x16a0] sm:$0xff]  ;;  %v826_v5 = vld [vmem:[#allocation5 + $0x1488] sm:$0xff] }
 0x19c   :  { %2934 = vmatpush2.msra.mxu1 %v789_v6  ;;  %2866 = vmatprep.subr.mxu0 %v722_v7  ;;  %v892_v6 = vld [vmem:[#allocation5 + $0x1698] sm:$0xff]  ;;  %v825_v7 = vld [vmem:[#allocation5 + $0x1480] sm:$0xff] }
 0x19d   :  { %2935 = vmatprep.subr.mxu1 %v788_v8  ;;  %2867 = vmatpush2.msra.mxu0 %v721_v9  ;;  %v891_v8 = vld [vmem:[#allocation5 + $0x1690] sm:$0xff]  ;;  %v824_v9 = vld [vmem:[#allocation5 + $0x1478] sm:$0xff] }
 0x19e   :  { %2936 = vmatpush2.msra.mxu1 %v787_v12  ;;  %2868 = vmatprep.subr.mxu0 %v720_v13  ;;  %v889_v12 = vld [vmem:[#allocation5 + $0x1680] sm:$0xff]  ;;  %v822_v13 = vld [vmem:[#allocation5 + $0x1468] sm:$0xff] }
 0x19f   :  { %2937 = vmatprep.subr.mxu1 %v786_v14  ;;  %2869 = vmatpush2.msra.mxu0 %v719_v15  ;;  %v888_v14 = vld [vmem:[#allocation5 + $0x1678] sm:$0xff]  ;;  %v821_v15 = vld [vmem:[#allocation5 + $0x1460] sm:$0xff] }
 0x1a0   :  { %2938 = vmatpush2.msra.mxu1 %v785_v16  ;;  %2870 = vmatprep.subr.mxu0 %v718_v17  ;;  %v887_v16 = vld [vmem:[#allocation5 + $0x1670] sm:$0xff]  ;;  %v820_v17 = vld [vmem:[#allocation5 + $0x1458] sm:$0xff] }
 0x1a1   :  { %2939 = vmatprep.subr.mxu1 %v784_v20  ;;  %2871 = vmatpush2.msra.mxu0 %v717_v21  ;;  %v885_v20 = vld [vmem:[#allocation5 + $0x1660] sm:$0xff]  ;;  %v818_v21 = vld [vmem:[#allocation5 + $0x1448] sm:$0xff] }
 0x1a2   :  { %2940 = vmatpush2.msra.mxu1 %v783_v24  ;;  %2872 = vmatprep.subr.mxu0 %v716_v25  ;;  %v883_v24 = vld [vmem:[#allocation5 + $0x1650] sm:$0xff]  ;;  %v816_v25 = vld [vmem:[#allocation5 + $0x1438] sm:$0xff] }
 0x1a3   :  { %2941 = vmatprep.subr.mxu1 %v782_v26  ;;  %2873 = vmatpush2.msra.mxu0 %v715_v27  ;;  %v882_v26 = vld [vmem:[#allocation5 + $0x1648] sm:$0xff]  ;;  %v815_v27 = vld [vmem:[#allocation5 + $0x1430] sm:$0xff] }
 0x1a4   :  { %2942 = vmatpush2.msra.mxu1 %v781_v28  ;;  %2874 = vmatprep.subr.mxu0 %v714_v29  ;;  %v881_v28 = vld [vmem:[#allocation5 + $0x1640] sm:$0xff]  ;;  %v814_v29 = vld [vmem:[#allocation5 + $0x1428] sm:$0xff] }
 0x1a5   :  { %2943 = vmatprep.subr.mxu1 %v780_v32  ;;  %2875 = vmatpush2.msra.mxu0 %v713_v33  ;;  %v879_v32 = vld [vmem:[#allocation5 + $0x1630] sm:$0xff]  ;;  %v812_v33 = vld [vmem:[#allocation5 + $0x1418] sm:$0xff] }
 0x1a6   :  { %2876 = vmatprep.mubr.f32.mxu0 %v1932_v34  ;;  %2944 = vmatpush2.msra.mxu1 %v779_v35  ;;  %v878_v34 = vld [vmem:[#allocation5 + $0x1628] sm:$0xff]  ;;  %v811_v35 = vld [vmem:[#allocation5 + $0x1410] sm:$0xff] }
 0x1a7   :  { %2877 = vmatmul.mubr.f32.vlgmr.msra.gmra.mxu0 %v1931_v36  ;;  %2945 = vmatprep.subr.mxu1 %v778_v37  ;;  %v877_v36 = vld [vmem:[#allocation5 + $0x1620] sm:$0xff]  ;;  %v810_v37 = vld [vmem:[#allocation5 + $0x1408] sm:$0xff] }
 0x1a8   :  { %2954 = vmatprep.subr.mxu0 %v840_v38  ;;  %2946 = vmatpush2.msra.mxu1 %v777_v39  ;;  %v876_v38 = vld [vmem:[#allocation5 + $0x1618] sm:$0xff]  ;;  %v809_v39 = vld [vmem:[#allocation5 + $0x1400] sm:$0xff] }
 0x1a9   :  { %2947 = vmatprep.mubr.f32.mxu1 %v1934_v40  ;;  %2955 = vmatpush1.msra.mxu0 %v839_v41  ;;  %v875_v40 = vld [vmem:[#allocation5 + $0x1610] sm:$0xff]  ;;  %v872_v41 = vld [vmem:[#allocation5 + $0x15f8] sm:$0xff] }
 0x1aa   :  { %2948 = vmatmul.mubr.f32.vlgmr.msra.gmra.mxu1 %v1933_v43  ;;  %2956 = vmatprep.subr.mxu0 %v838_v44  ;;  %v874_v43 = vld [vmem:[#allocation5 + $0x1608] sm:$0xff]  ;;  %v871_v44 = vld [vmem:[#allocation5 + $0x15f0] sm:$0xff] }
 0x1ab   :  { %3025 = vmatprep.subr.mxu1 %v904_v45  ;;  %2957 = vmatpush1.msra.mxu0 %v837_v46  ;;  %v873_v45 = vld [vmem:[#allocation5 + $0x1600] sm:$0xff]  ;;  %v870_v46 = vld [vmem:[#allocation5 + $0x15e8] sm:$0xff] }
 0x1ac   :  { %3026 = vmatpush1.msra.mxu1 %v903_v47  ;;  %2958 = vmatprep.subr.mxu0 %v836_v48  ;;  %v936_v47 = vld [vmem:[#allocation5 + $0x17f8] sm:$0xff]  ;;  %v869_v48 = vld [vmem:[#allocation5 + $0x15e0] sm:$0xff] }
 0x1ad   :  { %3027 = vmatprep.subr.mxu1 %v902_v49  ;;  %2959 = vmatpush1.msra.mxu0 %v835_v50  ;;  %v935_v49 = vld [vmem:[#allocation5 + $0x17f0] sm:$0xff]  ;;  %v868_v50 = vld [vmem:[#allocation5 + $0x15d8] sm:$0xff] }
 0x1ae   :  { %3028 = vmatpush1.msra.mxu1 %v901_v51  ;;  %2960 = vmatprep.subr.mxu0 %v834_v52  ;;  %v934_v51 = vld [vmem:[#allocation5 + $0x17e8] sm:$0xff]  ;;  %v867_v52 = vld [vmem:[#allocation5 + $0x15d0] sm:$0xff] }
 0x1af   :  { %3029 = vmatprep.subr.mxu1 %v900_v53  ;;  %2961 = vmatpush1.msra.mxu0 %v833_v54  ;;  %v933_v53 = vld [vmem:[#allocation5 + $0x17e0] sm:$0xff]  ;;  %v866_v54 = vld [vmem:[#allocation5 + $0x15c8] sm:$0xff] }
 0x1b0   :  { %3030 = vmatpush1.msra.mxu1 %v899_v56  ;;  %2962 = vmatprep.subr.mxu0 %v832_v57  ;;  %v932_v56 = vld [vmem:[#allocation5 + $0x17d8] sm:$0xff]  ;;  %v865_v57 = vld [vmem:[#allocation5 + $0x15c0] sm:$0xff] }
 0x1b1   :  { %3031 = vmatprep.subr.mxu1 %v898_v58  ;;  %2963 = vmatpush1.msra.mxu0 %v831_v59  ;;  %v931_v58 = vld [vmem:[#allocation5 + $0x17d0] sm:$0xff]  ;;  %v864_v59 = vld [vmem:[#allocation5 + $0x15b8] sm:$0xff] }
 0x1b2   :  { %3032 = vmatpush1.msra.mxu1 %v897_v60  ;;  %2964 = vmatprep.subr.mxu0 %v830_v61  ;;  %v930_v60 = vld [vmem:[#allocation5 + $0x17c8] sm:$0xff]  ;;  %v863_v61 = vld [vmem:[#allocation5 + $0x15b0] sm:$0xff] }
 0x1b3   :  { %3033 = vmatprep.subr.mxu1 %v896_v62  ;;  %2965 = vmatpush1.msra.mxu0 %v829_v63  ;;  %v929_v62 = vld [vmem:[#allocation5 + $0x17c0] sm:$0xff]  ;;  %v862_v63 = vld [vmem:[#allocation5 + $0x15a8] sm:$0xff] }
 0x1b4   :  { %3034 = vmatpush1.msra.mxu1 %v895_v0  ;;  %2966 = vmatprep.subr.mxu0 %v828_v1  ;;  %v928_v0 = vld [vmem:[#allocation5 + $0x17b8] sm:$0xff]  ;;  %v861_v1 = vld [vmem:[#allocation5 + $0x15a0] sm:$0xff] }
 0x1b5   :  { %3035 = vmatprep.subr.mxu1 %v894_v2  ;;  %2967 = vmatpush1.msra.mxu0 %v827_v3  ;;  %v927_v2 = vld [vmem:[#allocation5 + $0x17b0] sm:$0xff]  ;;  %v860_v3 = vld [vmem:[#allocation5 + $0x1598] sm:$0xff] }
 0x1b6   :  { %3036 = vmatpush1.msra.mxu1 %v893_v4  ;;  %2968 = vmatprep.subr.mxu0 %v826_v5  ;;  %v926_v4 = vld [vmem:[#allocation5 + $0x17a8] sm:$0xff]  ;;  %v859_v5 = vld [vmem:[#allocation5 + $0x1590] sm:$0xff] }
 0x1b7   :  { %3037 = vmatprep.subr.mxu1 %v892_v6  ;;  %2969 = vmatpush1.msra.mxu0 %v825_v7  ;;  %v925_v6 = vld [vmem:[#allocation5 + $0x17a0] sm:$0xff]  ;;  %v858_v7 = vld [vmem:[#allocation5 + $0x1588] sm:$0xff] }
 0x1b8   :  { %3038 = vmatpush1.msra.mxu1 %v891_v8  ;;  %2970 = vmatprep.subr.mxu0 %v824_v9  ;;  %v924_v8 = vld [vmem:[#allocation5 + $0x1798] sm:$0xff]  ;;  %v857_v9 = vld [vmem:[#allocation5 + $0x1580] sm:$0xff] }
 0x1b9   :  { %3039 = vmatprep.subr.mxu1 %v890_v10  ;;  %2971 = vmatpush1.msra.mxu0 %v823_v11  ;;  %v923_v10 = vld [vmem:[#allocation5 + $0x1790] sm:$0xff]  ;;  %v856_v11 = vld [vmem:[#allocation5 + $0x1578] sm:$0xff] }
 0x1ba   :  { %3040 = vmatpush1.msra.mxu1 %v889_v12  ;;  %2972 = vmatprep.subr.mxu0 %v822_v13  ;;  %v922_v12 = vld [vmem:[#allocation5 + $0x1788] sm:$0xff]  ;;  %v855_v13 = vld [vmem:[#allocation5 + $0x1570] sm:$0xff] }
 0x1bb   :  { %3041 = vmatprep.subr.mxu1 %v888_v14  ;;  %2973 = vmatpush1.msra.mxu0 %v821_v15  ;;  %v921_v14 = vld [vmem:[#allocation5 + $0x1780] sm:$0xff]  ;;  %v854_v15 = vld [vmem:[#allocation5 + $0x1568] sm:$0xff] }
 0x1bc   :  { %3042 = vmatpush1.msra.mxu1 %v887_v16  ;;  %2974 = vmatprep.subr.mxu0 %v820_v17  ;;  %v920_v16 = vld [vmem:[#allocation5 + $0x1778] sm:$0xff]  ;;  %v853_v17 = vld [vmem:[#allocation5 + $0x1560] sm:$0xff] }
 0x1bd   :  { %3043 = vmatprep.subr.mxu1 %v886_v18  ;;  %2975 = vmatpush1.msra.mxu0 %v819_v19  ;;  %v919_v18 = vld [vmem:[#allocation5 + $0x1770] sm:$0xff]  ;;  %v852_v19 = vld [vmem:[#allocation5 + $0x1558] sm:$0xff] }
 0x1be   :  { %3044 = vmatpush1.msra.mxu1 %v885_v20  ;;  %2976 = vmatprep.subr.mxu0 %v818_v21  ;;  %v126_v20 = vld [vmem:[#allocation3 + $0x28] sm:$0xff] }
 0x1bf   :  { %3045 = vmatprep.subr.mxu1 %v884_v22  ;;  %2977 = vmatpush1.msra.mxu0 %v817_v23  ;;  %v138_v21 = vld [vmem:[#allocation3 + $0x88] sm:$0xff] }
 0x1c0   :  { %3046 = vmatpush1.msra.mxu1 %v883_v24  ;;  %2978 = vmatprep.subr.mxu0 %v816_v25  ;;  %v150_v22 = vld [vmem:[#allocation3 + $0xe8] sm:$0xff]  ;;  %v851_v25 = vld [vmem:[#allocation5 + $0x1550] sm:$0xff] }
 0x1c1   :  { %3047 = vmatprep.subr.mxu1 %v882_v26  ;;  %2979 = vmatpush1.msra.mxu0 %v815_v27  ;;  %v162_v23 = vld [vmem:[#allocation3 + $0x148] sm:$0xff]  ;;  %v917_v26 = vld [vmem:[#allocation5 + $0x1760] sm:$0xff] }
 0x1c2   :  { %3048 = vmatpush1.msra.mxu1 %v881_v28  ;;  %2980 = vmatprep.subr.mxu0 %v814_v29  ;;  %v918_v24 = vld [vmem:[#allocation5 + $0x1768] sm:$0xff]  ;;  %v916_v28 = vld [vmem:[#allocation5 + $0x1758] sm:$0xff]  ;;  %v849_v29 = vld [vmem:[#allocation5 + $0x1540] sm:$0xff] }
 0x1c3   :  { %3049 = vmatprep.subr.mxu1 %v880_v30  ;;  %2981 = vmatpush1.msra.mxu0 %v813_v31  ;;  %v850_v27 = vld [vmem:[#allocation5 + $0x1548] sm:$0xff]  ;;  %v1935_v30 = vcombine.low %v126_v20, %v138_v21  ;;  %v1937_v31 = vcombine.low %v150_v22, %v162_v23 }
 0x1c4   :  { %3050 = vmatpush1.msra.mxu1 %v879_v32  ;;  %2982 = vmatprep.subr.mxu0 %v812_v33  ;;  %v915_v32 = vld [vmem:[#allocation5 + $0x1750] sm:$0xff]  ;;  %v848_v33 = vld [vmem:[#allocation5 + $0x1538] sm:$0xff] }
 0x1c5   :  { %3051 = vmatprep.subr.mxu1 %v878_v34  ;;  %2983 = vmatpush1.msra.mxu0 %v811_v35  ;;  %v914_v34 = vld [vmem:[#allocation5 + $0x1748] sm:$0xff]  ;;  %v847_v35 = vld [vmem:[#allocation5 + $0x1530] sm:$0xff] }
 0x1c6   :  { %3052 = vmatpush1.msra.mxu1 %v877_v36  ;;  %2984 = vmatprep.subr.mxu0 %v810_v37  ;;  %v913_v36 = vld [vmem:[#allocation5 + $0x1740] sm:$0xff]  ;;  %v846_v37 = vld [vmem:[#allocation5 + $0x1528] sm:$0xff] }
 0x1c7   :  { %3053 = vmatprep.subr.mxu1 %v876_v38  ;;  %2985 = vmatpush1.msra.mxu0 %v809_v39  ;;  %v1936_v38 = vcombine.high %v126_v20, %v138_v21  ;;  %v1938_v39 = vcombine.high %v150_v22, %v162_v23  ;;  %v1023_v20 = vld [vmem:[#allocation5 + $0x1ab0] sm:$0xff]  ;;  %v956_v21 = vld [vmem:[#allocation5 + $0x1898] sm:$0xff]  ;;  %v1022_v22 = vld [vmem:[#allocation5 + $0x1aa8] sm:$0xff] }
 0x1c8   :  { %3054 = vmatpush1.msra.mxu1 %v875_v40  ;;  %2986 = vmatprep.subr.mxu0 %v872_v41  ;;  %v912_v40 = vld [vmem:[#allocation5 + $0x1738] sm:$0xff]  ;;  %v845_v41 = vld [vmem:[#allocation5 + $0x1520] sm:$0xff]  ;;  %v955_v23 = vld [vmem:[#allocation5 + $0x1890] sm:$0xff] }
 0x1c9   :  { %3055 = vmatprep.subr.mxu1 %v874_v43  ;;  %2987 = vmatpush2.msra.mxu0 %v871_v44  ;;  %v1945_v43 = vrot.slane %v1935_v30, %v4572_v55  ;;  %v1959_v44 = vrot.slane %v1937_v31, %v4572_v55  ;;  %v1018_v30 = vld [vmem:[#allocation5 + $0x1a88] sm:$0xff]  ;;  %v951_v31 = vld [vmem:[#allocation5 + $0x1870] sm:$0xff] }
 0x1ca   :  { %3056 = vmatpush1.msra.mxu1 %v873_v45  ;;  %2988 = vmatprep.subr.mxu0 %v870_v46  ;;  %v911_v45 = vld [vmem:[#allocation5 + $0x1730] sm:$0xff]  ;;  %v844_v46 = vld [vmem:[#allocation5 + $0x1518] sm:$0xff] }
 0x1cb   :  { %3057 = vmatprep.subr.mxu1 %v936_v47  ;;  %2989 = vmatpush2.msra.mxu0 %v869_v48  ;;  %v910_v47 = vld [vmem:[#allocation5 + $0x1728] sm:$0xff]  ;;  %v843_v48 = vld [vmem:[#allocation5 + $0x1510] sm:$0xff] }
 0x1cc   :  { %3058 = vmatpush2.msra.mxu1 %v935_v49  ;;  %2990 = vmatprep.subr.mxu0 %v868_v50  ;;  %v909_v49 = vld [vmem:[#allocation5 + $0x1720] sm:$0xff]  ;;  %v842_v50 = vld [vmem:[#allocation5 + $0x1508] sm:$0xff] }
 0x1cd   :  { %3059 = vmatprep.subr.mxu1 %v934_v51  ;;  %2991 = vmatpush2.msra.mxu0 %v867_v52  ;;  %v1952_v51 = vrot.slane %v1936_v38, %v4572_v55  ;;  %v1966_v52 = vrot.slane %v1938_v39, %v4572_v55  ;;  %v1014_v38 = vld [vmem:[#allocation5 + $0x1a68] sm:$0xff]  ;;  %v947_v39 = vld [vmem:[#allocation5 + $0x1850] sm:$0xff] }
 0x1ce   :  { %3060 = vmatpush2.msra.mxu1 %v933_v53  ;;  %2992 = vmatprep.subr.mxu0 %v866_v54  ;;  %v908_v53 = vld [vmem:[#allocation5 + $0x1718] sm:$0xff]  ;;  %v841_v54 = vld [vmem:[#allocation5 + $0x1500] sm:$0xff] }
 0x1cf   :  { %3061 = vmatprep.subr.mxu1 %v932_v56  ;;  %2993 = vmatpush2.msra.mxu0 %v865_v57  ;;  %v1968_v56 = vcombine.high %v1945_v43, %v1959_v44  ;;  %v907_v57 = vld [vmem:[#allocation5 + $0x1710] sm:$0xff] }
 0x1d0   :  { %3062 = vmatpush2.msra.mxu1 %v931_v58  ;;  %2994 = vmatprep.subr.mxu0 %v864_v59  ;;  %v1967_v58 = vcombine.low %v1945_v43, %v1959_v44  ;;  %v906_v59 = vld [vmem:[#allocation5 + $0x1708] sm:$0xff]  ;;  %v1012_v43 = vld [vmem:[#allocation5 + $0x1a58] sm:$0xff]  ;;  %v945_v44 = vld [vmem:[#allocation5 + $0x1840] sm:$0xff] }
 0x1d1   :  { %3063 = vmatprep.subr.mxu1 %v930_v60  ;;  %2995 = vmatpush2.msra.mxu0 %v863_v61  ;;  %v968_v60 = vld [vmem:[#allocation5 + $0x18f8] sm:$0xff]  ;;  %v905_v61 = vld [vmem:[#allocation5 + $0x1700] sm:$0xff] }
 0x1d2   :  { %3064 = vmatpush2.msra.mxu1 %v929_v62  ;;  %2996 = vmatprep.subr.mxu0 %v862_v63  ;;  %v1970_v62 = vcombine.high %v1952_v51, %v1966_v52  ;;  %v967_v63 = vld [vmem:[#allocation5 + $0x18f0] sm:$0xff] }
 0x1d3   :  { %3065 = vmatprep.subr.mxu1 %v928_v0  ;;  %2997 = vmatpush2.msra.mxu0 %v861_v1  ;;  %v1969_v0 = vcombine.low %v1952_v51, %v1966_v52  ;;  %v966_v1 = vld [vmem:[#allocation5 + $0x18e8] sm:$0xff]  ;;  %v1008_v51 = vld [vmem:[#allocation5 + $0x1a38] sm:$0xff]  ;;  %v941_v52 = vld [vmem:[#allocation5 + $0x1820] sm:$0xff] }
 0x1d4   :  { %3066 = vmatpush2.msra.mxu1 %v927_v2  ;;  %2998 = vmatprep.subr.mxu0 %v860_v3  ;;  %v1032_v2 = vld [vmem:[#allocation5 + $0x1af8] sm:$0xff]  ;;  %v965_v3 = vld [vmem:[#allocation5 + $0x18e0] sm:$0xff] }
 0x1d5   :  { %3067 = vmatprep.subr.mxu1 %v926_v4  ;;  %2999 = vmatpush2.msra.mxu0 %v859_v5  ;;  %v1031_v4 = vld [vmem:[#allocation5 + $0x1af0] sm:$0xff]  ;;  %v964_v5 = vld [vmem:[#allocation5 + $0x18d8] sm:$0xff] }
 0x1d6   :  { %3068 = vmatpush2.msra.mxu1 %v925_v6  ;;  %3000 = vmatprep.subr.mxu0 %v858_v7  ;;  %v1030_v6 = vld [vmem:[#allocation5 + $0x1ae8] sm:$0xff]  ;;  %v963_v7 = vld [vmem:[#allocation5 + $0x18d0] sm:$0xff] }
 0x1d7   :  { %3069 = vmatprep.subr.mxu1 %v924_v8  ;;  %3001 = vmatpush2.msra.mxu0 %v857_v9  ;;  %v1029_v8 = vld [vmem:[#allocation5 + $0x1ae0] sm:$0xff]  ;;  %v962_v9 = vld [vmem:[#allocation5 + $0x18c8] sm:$0xff] }
 0x1d8   :  { %3070 = vmatpush2.msra.mxu1 %v923_v10  ;;  %3002 = vmatprep.subr.mxu0 %v856_v11  ;;  %v1028_v10 = vld [vmem:[#allocation5 + $0x1ad8] sm:$0xff]  ;;  %v961_v11 = vld [vmem:[#allocation5 + $0x18c0] sm:$0xff] }
 0x1d9   :  { %3071 = vmatprep.subr.mxu1 %v922_v12  ;;  %3003 = vmatpush2.msra.mxu0 %v855_v13  ;;  %v1027_v12 = vld [vmem:[#allocation5 + $0x1ad0] sm:$0xff]  ;;  %v960_v13 = vld [vmem:[#allocation5 + $0x18b8] sm:$0xff] }
 0x1da   :  { %3072 = vmatpush2.msra.mxu1 %v921_v14  ;;  %3004 = vmatprep.subr.mxu0 %v854_v15  ;;  %v1026_v14 = vld [vmem:[#allocation5 + $0x1ac8] sm:$0xff]  ;;  %v959_v15 = vld [vmem:[#allocation5 + $0x18b0] sm:$0xff] }
 0x1db   :  { %3073 = vmatprep.subr.mxu1 %v920_v16  ;;  %3005 = vmatpush2.msra.mxu0 %v853_v17  ;;  %v1025_v16 = vld [vmem:[#allocation5 + $0x1ac0] sm:$0xff]  ;;  %v958_v17 = vld [vmem:[#allocation5 + $0x18a8] sm:$0xff] }
 0x1dc   :  { %3074 = vmatpush2.msra.mxu1 %v919_v18  ;;  %3006 = vmatprep.subr.mxu0 %v852_v19  ;;  %v1024_v18 = vld [vmem:[#allocation5 + $0x1ab8] sm:$0xff]  ;;  %v957_v19 = vld [vmem:[#allocation5 + $0x18a0] sm:$0xff] }
 0x1dd   :  { %3075 = vmatprep.subr.mxu1 %v918_v24  ;;  %3007 = vmatpush2.msra.mxu0 %v851_v25  ;;  %v1021_v24 = vld [vmem:[#allocation5 + $0x1aa0] sm:$0xff]  ;;  %v954_v25 = vld [vmem:[#allocation5 + $0x1888] sm:$0xff] }
 0x1de   :  { %3076 = vmatpush2.msra.mxu1 %v917_v26  ;;  %3008 = vmatprep.subr.mxu0 %v850_v27  ;;  %v1020_v26 = vld [vmem:[#allocation5 + $0x1a98] sm:$0xff]  ;;  %v953_v27 = vld [vmem:[#allocation5 + $0x1880] sm:$0xff] }
 0x1df   :  { %3077 = vmatprep.subr.mxu1 %v916_v28  ;;  %3009 = vmatpush2.msra.mxu0 %v849_v29  ;;  %v1019_v28 = vld [vmem:[#allocation5 + $0x1a90] sm:$0xff]  ;;  %v952_v29 = vld [vmem:[#allocation5 + $0x1878] sm:$0xff] }
 0x1e0   :  { %3078 = vmatpush2.msra.mxu1 %v915_v32  ;;  %3010 = vmatprep.subr.mxu0 %v848_v33  ;;  %v1017_v32 = vld [vmem:[#allocation5 + $0x1a80] sm:$0xff]  ;;  %v950_v33 = vld [vmem:[#allocation5 + $0x1868] sm:$0xff] }
 0x1e1   :  { %3079 = vmatprep.subr.mxu1 %v914_v34  ;;  %3011 = vmatpush2.msra.mxu0 %v847_v35  ;;  %v1016_v34 = vld [vmem:[#allocation5 + $0x1a78] sm:$0xff]  ;;  %v949_v35 = vld [vmem:[#allocation5 + $0x1860] sm:$0xff] }
 0x1e2   :  { %3080 = vmatpush2.msra.mxu1 %v913_v36  ;;  %3012 = vmatprep.subr.mxu0 %v846_v37  ;;  %v1015_v36 = vld [vmem:[#allocation5 + $0x1a70] sm:$0xff]  ;;  %v948_v37 = vld [vmem:[#allocation5 + $0x1858] sm:$0xff] }
 0x1e3   :  { %3081 = vmatprep.subr.mxu1 %v912_v40  ;;  %3013 = vmatpush2.msra.mxu0 %v845_v41  ;;  %v1013_v40 = vld [vmem:[#allocation5 + $0x1a60] sm:$0xff]  ;;  %v946_v41 = vld [vmem:[#allocation5 + $0x1848] sm:$0xff] }
 0x1e4   :  { %3082 = vmatpush2.msra.mxu1 %v911_v45  ;;  %3014 = vmatprep.subr.mxu0 %v844_v46  ;;  %v1011_v45 = vld [vmem:[#allocation5 + $0x1a50] sm:$0xff]  ;;  %v944_v46 = vld [vmem:[#allocation5 + $0x1838] sm:$0xff] }
 0x1e5   :  { %3083 = vmatprep.subr.mxu1 %v910_v47  ;;  %3015 = vmatpush2.msra.mxu0 %v843_v48  ;;  %v1010_v47 = vld [vmem:[#allocation5 + $0x1a48] sm:$0xff]  ;;  %v943_v48 = vld [vmem:[#allocation5 + $0x1830] sm:$0xff] }
 0x1e6   :  { %3084 = vmatpush2.msra.mxu1 %v909_v49  ;;  %3016 = vmatprep.subr.mxu0 %v842_v50  ;;  %v1009_v49 = vld [vmem:[#allocation5 + $0x1a40] sm:$0xff]  ;;  %v942_v50 = vld [vmem:[#allocation5 + $0x1828] sm:$0xff] }
 0x1e7   :  { %3085 = vmatprep.subr.mxu1 %v908_v53  ;;  %3017 = vmatpush2.msra.mxu0 %v841_v54  ;;  %v1007_v53 = vld [vmem:[#allocation5 + $0x1a30] sm:$0xff]  ;;  %v940_v54 = vld [vmem:[#allocation5 + $0x1818] sm:$0xff] }
 0x1e8   :  { %3018 = vmatprep.mubr.f32.mxu0 %v1968_v56  ;;  %3086 = vmatpush2.msra.mxu1 %v907_v57  ;;  %v1006_v56 = vld [vmem:[#allocation5 + $0x1a28] sm:$0xff]  ;;  %v939_v57 = vld [vmem:[#allocation5 + $0x1810] sm:$0xff] }
 0x1e9   :  { %3019 = vmatmul.mubr.f32.vlgmr.msra.gmra.mxu0 %v1967_v58  ;;  %3087 = vmatprep.subr.mxu1 %v906_v59  ;;  %v1005_v58 = vld [vmem:[#allocation5 + $0x1a20] sm:$0xff]  ;;  %v938_v59 = vld [vmem:[#allocation5 + $0x1808] sm:$0xff] }
 0x1ea   :  { %3096 = vmatprep.subr.mxu0 %v968_v60  ;;  %3088 = vmatpush2.msra.mxu1 %v905_v61  ;;  %v1004_v60 = vld [vmem:[#allocation5 + $0x1a18] sm:$0xff]  ;;  %v937_v61 = vld [vmem:[#allocation5 + $0x1800] sm:$0xff] }
 0x1eb   :  { %3089 = vmatprep.mubr.f32.mxu1 %v1970_v62  ;;  %3097 = vmatpush1.msra.mxu0 %v967_v63  ;;  %v1003_v62 = vld [vmem:[#allocation5 + $0x1a10] sm:$0xff]  ;;  %v1000_v63 = vld [vmem:[#allocation5 + $0x19f8] sm:$0xff] }
 0x1ec   :  { %3090 = vmatmul.mubr.f32.vlgmr.msra.gmra.mxu1 %v1969_v0  ;;  %3098 = vmatprep.subr.mxu0 %v966_v1  ;;  %v1002_v0 = vld [vmem:[#allocation5 + $0x1a08] sm:$0xff]  ;;  %v999_v1 = vld [vmem:[#allocation5 + $0x19f0] sm:$0xff] }
 0x1ed   :  { %3167 = vmatprep.subr.mxu1 %v1032_v2  ;;  %3099 = vmatpush1.msra.mxu0 %v965_v3  ;;  %v1001_v2 = vld [vmem:[#allocation5 + $0x1a00] sm:$0xff]  ;;  %v998_v3 = vld [vmem:[#allocation5 + $0x19e8] sm:$0xff] }
 0x1ee   :  { %3168 = vmatpush1.msra.mxu1 %v1031_v4  ;;  %3100 = vmatprep.subr.mxu0 %v964_v5  ;;  %v1064_v4 = vld [vmem:[#allocation5 + $0x1bf8] sm:$0xff]  ;;  %v997_v5 = vld [vmem:[#allocation5 + $0x19e0] sm:$0xff] }
 0x1ef   :  { %3169 = vmatprep.subr.mxu1 %v1030_v6  ;;  %3101 = vmatpush1.msra.mxu0 %v963_v7  ;;  %v1063_v6 = vld [vmem:[#allocation5 + $0x1bf0] sm:$0xff]  ;;  %v996_v7 = vld [vmem:[#allocation5 + $0x19d8] sm:$0xff] }
 0x1f0   :  { %3170 = vmatpush1.msra.mxu1 %v1029_v8  ;;  %3102 = vmatprep.subr.mxu0 %v962_v9  ;;  %v1062_v8 = vld [vmem:[#allocation5 + $0x1be8] sm:$0xff]  ;;  %v995_v9 = vld [vmem:[#allocation5 + $0x19d0] sm:$0xff] }
 0x1f1   :  { %3171 = vmatprep.subr.mxu1 %v1028_v10  ;;  %3103 = vmatpush1.msra.mxu0 %v961_v11  ;;  %v1061_v10 = vld [vmem:[#allocation5 + $0x1be0] sm:$0xff]  ;;  %v994_v11 = vld [vmem:[#allocation5 + $0x19c8] sm:$0xff] }
 0x1f2   :  { %3172 = vmatpush1.msra.mxu1 %v1027_v12  ;;  %3104 = vmatprep.subr.mxu0 %v960_v13  ;;  %v1060_v12 = vld [vmem:[#allocation5 + $0x1bd8] sm:$0xff]  ;;  %v993_v13 = vld [vmem:[#allocation5 + $0x19c0] sm:$0xff] }
 0x1f3   :  { %3173 = vmatprep.subr.mxu1 %v1026_v14  ;;  %3105 = vmatpush1.msra.mxu0 %v959_v15  ;;  %v1059_v14 = vld [vmem:[#allocation5 + $0x1bd0] sm:$0xff]  ;;  %v992_v15 = vld [vmem:[#allocation5 + $0x19b8] sm:$0xff] }
 0x1f4   :  { %3174 = vmatpush1.msra.mxu1 %v1025_v16  ;;  %3106 = vmatprep.subr.mxu0 %v958_v17  ;;  %v1058_v16 = vld [vmem:[#allocation5 + $0x1bc8] sm:$0xff]  ;;  %v991_v17 = vld [vmem:[#allocation5 + $0x19b0] sm:$0xff] }
 0x1f5   :  { %3175 = vmatprep.subr.mxu1 %v1024_v18  ;;  %3107 = vmatpush1.msra.mxu0 %v957_v19  ;;  %v1057_v18 = vld [vmem:[#allocation5 + $0x1bc0] sm:$0xff]  ;;  %v990_v19 = vld [vmem:[#allocation5 + $0x19a8] sm:$0xff] }
 0x1f6   :  { %3176 = vmatpush1.msra.mxu1 %v1023_v20  ;;  %3108 = vmatprep.subr.mxu0 %v956_v21  ;;  %v1056_v20 = vld [vmem:[#allocation5 + $0x1bb8] sm:$0xff]  ;;  %v989_v21 = vld [vmem:[#allocation5 + $0x19a0] sm:$0xff] }
 0x1f7   :  { %3177 = vmatprep.subr.mxu1 %v1022_v22  ;;  %3109 = vmatpush1.msra.mxu0 %v955_v23  ;;  %v1055_v22 = vld [vmem:[#allocation5 + $0x1bb0] sm:$0xff]  ;;  %v988_v23 = vld [vmem:[#allocation5 + $0x1998] sm:$0xff] }
 0x1f8   :  { %3178 = vmatpush1.msra.mxu1 %v1021_v24  ;;  %3110 = vmatprep.subr.mxu0 %v954_v25  ;;  %v1054_v24 = vld [vmem:[#allocation5 + $0x1ba8] sm:$0xff]  ;;  %v987_v25 = vld [vmem:[#allocation5 + $0x1990] sm:$0xff] }
 0x1f9   :  { %3179 = vmatprep.subr.mxu1 %v1020_v26  ;;  %3111 = vmatpush1.msra.mxu0 %v953_v27  ;;  %v1053_v26 = vld [vmem:[#allocation5 + $0x1ba0] sm:$0xff]  ;;  %v986_v27 = vld [vmem:[#allocation5 + $0x1988] sm:$0xff] }
 0x1fa   :  { %3180 = vmatpush1.msra.mxu1 %v1019_v28  ;;  %3112 = vmatprep.subr.mxu0 %v952_v29  ;;  %v1052_v28 = vld [vmem:[#allocation5 + $0x1b98] sm:$0xff]  ;;  %v985_v29 = vld [vmem:[#allocation5 + $0x1980] sm:$0xff] }
 0x1fb   :  { %3181 = vmatprep.subr.mxu1 %v1018_v30  ;;  %3113 = vmatpush1.msra.mxu0 %v951_v31  ;;  %v1051_v30 = vld [vmem:[#allocation5 + $0x1b90] sm:$0xff]  ;;  %v984_v31 = vld [vmem:[#allocation5 + $0x1978] sm:$0xff] }
 0x1fc   :  { %3182 = vmatpush1.msra.mxu1 %v1017_v32  ;;  %3114 = vmatprep.subr.mxu0 %v950_v33  ;;  %v1050_v32 = vld [vmem:[#allocation5 + $0x1b88] sm:$0xff]  ;;  %v983_v33 = vld [vmem:[#allocation5 + $0x1970] sm:$0xff] }
 0x1fd   :  { %3183 = vmatprep.subr.mxu1 %v1016_v34  ;;  %3115 = vmatpush1.msra.mxu0 %v949_v35  ;;  %v1049_v34 = vld [vmem:[#allocation5 + $0x1b80] sm:$0xff]  ;;  %v982_v35 = vld [vmem:[#allocation5 + $0x1968] sm:$0xff] }
 0x1fe   :  { %3184 = vmatpush1.msra.mxu1 %v1015_v36  ;;  %3116 = vmatprep.subr.mxu0 %v948_v37  ;;  %v1048_v36 = vld [vmem:[#allocation5 + $0x1b78] sm:$0xff]  ;;  %v981_v37 = vld [vmem:[#allocation5 + $0x1960] sm:$0xff] }
 0x1ff   :  { %3185 = vmatprep.subr.mxu1 %v1014_v38  ;;  %3117 = vmatpush1.msra.mxu0 %v947_v39  ;;  %v1047_v38 = vld [vmem:[#allocation5 + $0x1b70] sm:$0xff]  ;;  %v980_v39 = vld [vmem:[#allocation5 + $0x1958] sm:$0xff] }
 0x200   :  { %3186 = vmatpush1.msra.mxu1 %v1013_v40  ;;  %3118 = vmatprep.subr.mxu0 %v946_v41  ;;  %v127_v40 = vld [vmem:[#allocation3 + $0x30] sm:$0xff] }
 0x201   :  { %3187 = vmatprep.subr.mxu1 %v1012_v43  ;;  %3119 = vmatpush1.msra.mxu0 %v945_v44  ;;  %v139_v41 = vld [vmem:[#allocation3 + $0x90] sm:$0xff] }
 0x202   :  { %3188 = vmatpush1.msra.mxu1 %v1011_v45  ;;  %3120 = vmatprep.subr.mxu0 %v944_v46  ;;  %v151_v43 = vld [vmem:[#allocation3 + $0xf0] sm:$0xff]  ;;  %v1046_v45 = vld [vmem:[#allocation5 + $0x1b68] sm:$0xff] }
 0x203   :  { %3189 = vmatprep.subr.mxu1 %v1010_v47  ;;  %3121 = vmatpush1.msra.mxu0 %v943_v48  ;;  %v163_v44 = vld [vmem:[#allocation3 + $0x150] sm:$0xff]  ;;  %v1045_v47 = vld [vmem:[#allocation5 + $0x1b60] sm:$0xff]  ;;  %v978_v48 = vld [vmem:[#allocation5 + $0x1948] sm:$0xff] }
 0x204   :  { %3190 = vmatpush1.msra.mxu1 %v1009_v49  ;;  %3122 = vmatprep.subr.mxu0 %v942_v50  ;;  %v979_v46 = vld [vmem:[#allocation5 + $0x1950] sm:$0xff]  ;;  %v1044_v49 = vld [vmem:[#allocation5 + $0x1b58] sm:$0xff]  ;;  %v977_v50 = vld [vmem:[#allocation5 + $0x1940] sm:$0xff] }
 0x205   :  { %3191 = vmatprep.subr.mxu1 %v1008_v51  ;;  %3123 = vmatpush1.msra.mxu0 %v941_v52  ;;  %v1971_v51 = vcombine.low %v127_v40, %v139_v41  ;;  %v1973_v52 = vcombine.low %v151_v43, %v163_v44 }
 0x206   :  { %3192 = vmatpush1.msra.mxu1 %v1007_v53  ;;  %3124 = vmatprep.subr.mxu0 %v940_v54  ;;  %v1043_v53 = vld [vmem:[#allocation5 + $0x1b50] sm:$0xff]  ;;  %v976_v54 = vld [vmem:[#allocation5 + $0x1938] sm:$0xff] }
 0x207   :  { %3193 = vmatprep.subr.mxu1 %v1006_v56  ;;  %3125 = vmatpush1.msra.mxu0 %v939_v57  ;;  %v1042_v56 = vld [vmem:[#allocation5 + $0x1b48] sm:$0xff]  ;;  %v975_v57 = vld [vmem:[#allocation5 + $0x1930] sm:$0xff] }
 0x208   :  { %3194 = vmatpush1.msra.mxu1 %v1005_v58  ;;  %3126 = vmatprep.subr.mxu0 %v938_v59  ;;  %v1041_v58 = vld [vmem:[#allocation5 + $0x1b40] sm:$0xff]  ;;  %v974_v59 = vld [vmem:[#allocation5 + $0x1928] sm:$0xff] }
 0x209   :  { %3195 = vmatprep.subr.mxu1 %v1004_v60  ;;  %3127 = vmatpush1.msra.mxu0 %v937_v61  ;;  %v1972_v60 = vcombine.high %v127_v40, %v139_v41  ;;  %v1974_v61 = vcombine.high %v151_v43, %v163_v44  ;;  %v1151_v40 = vld [vmem:[#allocation5 + $0x1eb0] sm:$0xff]  ;;  %v1084_v41 = vld [vmem:[#allocation5 + $0x1c98] sm:$0xff]  ;;  %v1150_v43 = vld [vmem:[#allocation5 + $0x1ea8] sm:$0xff] }
 0x20a   :  { %3196 = vmatpush1.msra.mxu1 %v1003_v62  ;;  %3128 = vmatprep.subr.mxu0 %v1000_v63  ;;  %v1040_v62 = vld [vmem:[#allocation5 + $0x1b38] sm:$0xff]  ;;  %v973_v63 = vld [vmem:[#allocation5 + $0x1920] sm:$0xff]  ;;  %v1083_v44 = vld [vmem:[#allocation5 + $0x1c90] sm:$0xff] }
 0x20b   :  { %3197 = vmatprep.subr.mxu1 %v1002_v0  ;;  %3129 = vmatpush2.msra.mxu0 %v999_v1  ;;  %v1981_v0 = vrot.slane %v1971_v51, %v4572_v55  ;;  %v1995_v1 = vrot.slane %v1973_v52, %v4572_v55  ;;  %v1146_v51 = vld [vmem:[#allocation5 + $0x1e88] sm:$0xff]  ;;  %v1079_v52 = vld [vmem:[#allocation5 + $0x1c70] sm:$0xff] }
 0x20c   :  { %3198 = vmatpush1.msra.mxu1 %v1001_v2  ;;  %3130 = vmatprep.subr.mxu0 %v998_v3  ;;  %v1039_v2 = vld [vmem:[#allocation5 + $0x1b30] sm:$0xff]  ;;  %v972_v3 = vld [vmem:[#allocation5 + $0x1918] sm:$0xff] }
 0x20d   :  { %3199 = vmatprep.subr.mxu1 %v1064_v4  ;;  %3131 = vmatpush2.msra.mxu0 %v997_v5  ;;  %v1038_v4 = vld [vmem:[#allocation5 + $0x1b28] sm:$0xff]  ;;  %v971_v5 = vld [vmem:[#allocation5 + $0x1910] sm:$0xff] }
 0x20e   :  { %3200 = vmatpush2.msra.mxu1 %v1063_v6  ;;  %3132 = vmatprep.subr.mxu0 %v996_v7  ;;  %v1037_v6 = vld [vmem:[#allocation5 + $0x1b20] sm:$0xff]  ;;  %v970_v7 = vld [vmem:[#allocation5 + $0x1908] sm:$0xff] }
 0x20f   :  { %3201 = vmatprep.subr.mxu1 %v1062_v8  ;;  %3133 = vmatpush2.msra.mxu0 %v995_v9  ;;  %v1988_v8 = vrot.slane %v1972_v60, %v4572_v55  ;;  %v2002_v9 = vrot.slane %v1974_v61, %v4572_v55  ;;  %v1142_v60 = vld [vmem:[#allocation5 + $0x1e68] sm:$0xff]  ;;  %v1075_v61 = vld [vmem:[#allocation5 + $0x1c50] sm:$0xff] }
 0x210   :  { %3202 = vmatpush2.msra.mxu1 %v1061_v10  ;;  %3134 = vmatprep.subr.mxu0 %v994_v11  ;;  %v1036_v10 = vld [vmem:[#allocation5 + $0x1b18] sm:$0xff]  ;;  %v969_v11 = vld [vmem:[#allocation5 + $0x1900] sm:$0xff] }
 0x211   :  { %3203 = vmatprep.subr.mxu1 %v1060_v12  ;;  %3135 = vmatpush2.msra.mxu0 %v993_v13  ;;  %v2004_v12 = vcombine.high %v1981_v0, %v1995_v1  ;;  %v1035_v13 = vld [vmem:[#allocation5 + $0x1b10] sm:$0xff] }
 0x212   :  { %3204 = vmatpush2.msra.mxu1 %v1059_v14  ;;  %3136 = vmatprep.subr.mxu0 %v992_v15  ;;  %v2003_v14 = vcombine.low %v1981_v0, %v1995_v1  ;;  %v1034_v15 = vld [vmem:[#allocation5 + $0x1b08] sm:$0xff]  ;;  %v1140_v0 = vld [vmem:[#allocation5 + $0x1e58] sm:$0xff]  ;;  %v1073_v1 = vld [vmem:[#allocation5 + $0x1c40] sm:$0xff] }
 0x213   :  { %3205 = vmatprep.subr.mxu1 %v1058_v16  ;;  %3137 = vmatpush2.msra.mxu0 %v991_v17  ;;  %v1096_v16 = vld [vmem:[#allocation5 + $0x1cf8] sm:$0xff]  ;;  %v1033_v17 = vld [vmem:[#allocation5 + $0x1b00] sm:$0xff] }
 0x214   :  { %3206 = vmatpush2.msra.mxu1 %v1057_v18  ;;  %3138 = vmatprep.subr.mxu0 %v990_v19  ;;  %v2006_v18 = vcombine.high %v1988_v8, %v2002_v9  ;;  %v1095_v19 = vld [vmem:[#allocation5 + $0x1cf0] sm:$0xff] }
 0x215   :  { %3207 = vmatprep.subr.mxu1 %v1056_v20  ;;  %3139 = vmatpush2.msra.mxu0 %v989_v21  ;;  %v2005_v20 = vcombine.low %v1988_v8, %v2002_v9  ;;  %v1094_v21 = vld [vmem:[#allocation5 + $0x1ce8] sm:$0xff]  ;;  %v1136_v8 = vld [vmem:[#allocation5 + $0x1e38] sm:$0xff]  ;;  %v1069_v9 = vld [vmem:[#allocation5 + $0x1c20] sm:$0xff] }
 0x216   :  { %3208 = vmatpush2.msra.mxu1 %v1055_v22  ;;  %3140 = vmatprep.subr.mxu0 %v988_v23  ;;  %v1160_v22 = vld [vmem:[#allocation5 + $0x1ef8] sm:$0xff]  ;;  %v1093_v23 = vld [vmem:[#allocation5 + $0x1ce0] sm:$0xff] }
 0x217   :  { %3209 = vmatprep.subr.mxu1 %v1054_v24  ;;  %3141 = vmatpush2.msra.mxu0 %v987_v25  ;;  %v1159_v24 = vld [vmem:[#allocation5 + $0x1ef0] sm:$0xff]  ;;  %v1092_v25 = vld [vmem:[#allocation5 + $0x1cd8] sm:$0xff] }
 0x218   :  { %3210 = vmatpush2.msra.mxu1 %v1053_v26  ;;  %3142 = vmatprep.subr.mxu0 %v986_v27  ;;  %v1158_v26 = vld [vmem:[#allocation5 + $0x1ee8] sm:$0xff]  ;;  %v1091_v27 = vld [vmem:[#allocation5 + $0x1cd0] sm:$0xff] }
 0x219   :  { %3211 = vmatprep.subr.mxu1 %v1052_v28  ;;  %3143 = vmatpush2.msra.mxu0 %v985_v29  ;;  %v1157_v28 = vld [vmem:[#allocation5 + $0x1ee0] sm:$0xff]  ;;  %v1090_v29 = vld [vmem:[#allocation5 + $0x1cc8] sm:$0xff] }
 0x21a   :  { %3212 = vmatpush2.msra.mxu1 %v1051_v30  ;;  %3144 = vmatprep.subr.mxu0 %v984_v31  ;;  %v1156_v30 = vld [vmem:[#allocation5 + $0x1ed8] sm:$0xff]  ;;  %v1089_v31 = vld [vmem:[#allocation5 + $0x1cc0] sm:$0xff] }
 0x21b   :  { %3213 = vmatprep.subr.mxu1 %v1050_v32  ;;  %3145 = vmatpush2.msra.mxu0 %v983_v33  ;;  %v1155_v32 = vld [vmem:[#allocation5 + $0x1ed0] sm:$0xff]  ;;  %v1088_v33 = vld [vmem:[#allocation5 + $0x1cb8] sm:$0xff] }
 0x21c   :  { %3214 = vmatpush2.msra.mxu1 %v1049_v34  ;;  %3146 = vmatprep.subr.mxu0 %v982_v35  ;;  %v1154_v34 = vld [vmem:[#allocation5 + $0x1ec8] sm:$0xff]  ;;  %v1087_v35 = vld [vmem:[#allocation5 + $0x1cb0] sm:$0xff] }
 0x21d   :  { %3215 = vmatprep.subr.mxu1 %v1048_v36  ;;  %3147 = vmatpush2.msra.mxu0 %v981_v37  ;;  %v1153_v36 = vld [vmem:[#allocation5 + $0x1ec0] sm:$0xff]  ;;  %v1086_v37 = vld [vmem:[#allocation5 + $0x1ca8] sm:$0xff] }
 0x21e   :  { %3216 = vmatpush2.msra.mxu1 %v1047_v38  ;;  %3148 = vmatprep.subr.mxu0 %v980_v39  ;;  %v1152_v38 = vld [vmem:[#allocation5 + $0x1eb8] sm:$0xff]  ;;  %v1085_v39 = vld [vmem:[#allocation5 + $0x1ca0] sm:$0xff] }
 0x21f   :  { %3217 = vmatprep.subr.mxu1 %v1046_v45  ;;  %3149 = vmatpush2.msra.mxu0 %v979_v46  ;;  %v1149_v45 = vld [vmem:[#allocation5 + $0x1ea0] sm:$0xff]  ;;  %v1082_v46 = vld [vmem:[#allocation5 + $0x1c88] sm:$0xff] }
 0x220   :  { %3218 = vmatpush2.msra.mxu1 %v1045_v47  ;;  %3150 = vmatprep.subr.mxu0 %v978_v48  ;;  %v1148_v47 = vld [vmem:[#allocation5 + $0x1e98] sm:$0xff]  ;;  %v1081_v48 = vld [vmem:[#allocation5 + $0x1c80] sm:$0xff] }
 0x221   :  { %3219 = vmatprep.subr.mxu1 %v1044_v49  ;;  %3151 = vmatpush2.msra.mxu0 %v977_v50  ;;  %v1147_v49 = vld [vmem:[#allocation5 + $0x1e90] sm:$0xff]  ;;  %v1080_v50 = vld [vmem:[#allocation5 + $0x1c78] sm:$0xff] }
 0x222   :  { %3220 = vmatpush2.msra.mxu1 %v1043_v53  ;;  %3152 = vmatprep.subr.mxu0 %v976_v54  ;;  %v1145_v53 = vld [vmem:[#allocation5 + $0x1e80] sm:$0xff]  ;;  %v1078_v54 = vld [vmem:[#allocation5 + $0x1c68] sm:$0xff] }
 0x223   :  { %3221 = vmatprep.subr.mxu1 %v1042_v56  ;;  %3153 = vmatpush2.msra.mxu0 %v975_v57  ;;  %v1144_v56 = vld [vmem:[#allocation5 + $0x1e78] sm:$0xff]  ;;  %v1077_v57 = vld [vmem:[#allocation5 + $0x1c60] sm:$0xff] }
 0x224   :  { %3222 = vmatpush2.msra.mxu1 %v1041_v58  ;;  %3154 = vmatprep.subr.mxu0 %v974_v59  ;;  %v1143_v58 = vld [vmem:[#allocation5 + $0x1e70] sm:$0xff]  ;;  %v1076_v59 = vld [vmem:[#allocation5 + $0x1c58] sm:$0xff] }
 0x225   :  { %3223 = vmatprep.subr.mxu1 %v1040_v62  ;;  %3155 = vmatpush2.msra.mxu0 %v973_v63  ;;  %v1141_v62 = vld [vmem:[#allocation5 + $0x1e60] sm:$0xff]  ;;  %v1074_v63 = vld [vmem:[#allocation5 + $0x1c48] sm:$0xff] }
 0x226   :  { %3224 = vmatpush2.msra.mxu1 %v1039_v2  ;;  %3156 = vmatprep.subr.mxu0 %v972_v3  ;;  %v1139_v2 = vld [vmem:[#allocation5 + $0x1e50] sm:$0xff]  ;;  %v1072_v3 = vld [vmem:[#allocation5 + $0x1c38] sm:$0xff] }
 0x227   :  { %3225 = vmatprep.subr.mxu1 %v1038_v4  ;;  %3157 = vmatpush2.msra.mxu0 %v971_v5  ;;  %v1138_v4 = vld [vmem:[#allocation5 + $0x1e48] sm:$0xff]  ;;  %v1071_v5 = vld [vmem:[#allocation5 + $0x1c30] sm:$0xff] }
 0x228   :  { %3226 = vmatpush2.msra.mxu1 %v1037_v6  ;;  %3158 = vmatprep.subr.mxu0 %v970_v7  ;;  %v1137_v6 = vld [vmem:[#allocation5 + $0x1e40] sm:$0xff]  ;;  %v1070_v7 = vld [vmem:[#allocation5 + $0x1c28] sm:$0xff] }
 0x229   :  { %3227 = vmatprep.subr.mxu1 %v1036_v10  ;;  %3159 = vmatpush2.msra.mxu0 %v969_v11  ;;  %v1135_v10 = vld [vmem:[#allocation5 + $0x1e30] sm:$0xff]  ;;  %v1068_v11 = vld [vmem:[#allocation5 + $0x1c18] sm:$0xff] }
 0x22a   :  { %3160 = vmatprep.mubr.f32.mxu0 %v2004_v12  ;;  %3228 = vmatpush2.msra.mxu1 %v1035_v13  ;;  %v1134_v12 = vld [vmem:[#allocation5 + $0x1e28] sm:$0xff]  ;;  %v1067_v13 = vld [vmem:[#allocation5 + $0x1c10] sm:$0xff] }
 0x22b   :  { %3161 = vmatmul.mubr.f32.vlgmr.msra.gmra.mxu0 %v2003_v14  ;;  %3229 = vmatprep.subr.mxu1 %v1034_v15  ;;  %v1133_v14 = vld [vmem:[#allocation5 + $0x1e20] sm:$0xff]  ;;  %v1066_v15 = vld [vmem:[#allocation5 + $0x1c08] sm:$0xff] }
 0x22c   :  { %3238 = vmatprep.subr.mxu0 %v1096_v16  ;;  %3230 = vmatpush2.msra.mxu1 %v1033_v17  ;;  %v1132_v16 = vld [vmem:[#allocation5 + $0x1e18] sm:$0xff]  ;;  %v1065_v17 = vld [vmem:[#allocation5 + $0x1c00] sm:$0xff] }
 0x22d   :  { %3231 = vmatprep.mubr.f32.mxu1 %v2006_v18  ;;  %3239 = vmatpush1.msra.mxu0 %v1095_v19  ;;  %v1131_v18 = vld [vmem:[#allocation5 + $0x1e10] sm:$0xff]  ;;  %v1128_v19 = vld [vmem:[#allocation5 + $0x1df8] sm:$0xff] }
 0x22e   :  { %3232 = vmatmul.mubr.f32.vlgmr.msra.gmra.mxu1 %v2005_v20  ;;  %3240 = vmatprep.subr.mxu0 %v1094_v21  ;;  %v1130_v20 = vld [vmem:[#allocation5 + $0x1e08] sm:$0xff]  ;;  %v1127_v21 = vld [vmem:[#allocation5 + $0x1df0] sm:$0xff] }
 0x22f   :  { %3309 = vmatprep.subr.mxu1 %v1160_v22  ;;  %3241 = vmatpush1.msra.mxu0 %v1093_v23  ;;  %v1129_v22 = vld [vmem:[#allocation5 + $0x1e00] sm:$0xff]  ;;  %v1126_v23 = vld [vmem:[#allocation5 + $0x1de8] sm:$0xff] }
 0x230   :  { %3310 = vmatpush1.msra.mxu1 %v1159_v24  ;;  %3242 = vmatprep.subr.mxu0 %v1092_v25  ;;  %v1192_v24 = vld [vmem:[#allocation5 + $0x1ff8] sm:$0xff]  ;;  %v1125_v25 = vld [vmem:[#allocation5 + $0x1de0] sm:$0xff] }
 0x231   :  { %3311 = vmatprep.subr.mxu1 %v1158_v26  ;;  %3243 = vmatpush1.msra.mxu0 %v1091_v27  ;;  %v1191_v26 = vld [vmem:[#allocation5 + $0x1ff0] sm:$0xff]  ;;  %v1124_v27 = vld [vmem:[#allocation5 + $0x1dd8] sm:$0xff] }
 0x232   :  { %3312 = vmatpush1.msra.mxu1 %v1157_v28  ;;  %3244 = vmatprep.subr.mxu0 %v1090_v29  ;;  %v1190_v28 = vld [vmem:[#allocation5 + $0x1fe8] sm:$0xff]  ;;  %v1123_v29 = vld [vmem:[#allocation5 + $0x1dd0] sm:$0xff] }
 0x233   :  { %3313 = vmatprep.subr.mxu1 %v1156_v30  ;;  %3245 = vmatpush1.msra.mxu0 %v1089_v31  ;;  %v1189_v30 = vld [vmem:[#allocation5 + $0x1fe0] sm:$0xff]  ;;  %v1122_v31 = vld [vmem:[#allocation5 + $0x1dc8] sm:$0xff] }
 0x234   :  { %3314 = vmatpush1.msra.mxu1 %v1155_v32  ;;  %3246 = vmatprep.subr.mxu0 %v1088_v33  ;;  %v1188_v32 = vld [vmem:[#allocation5 + $0x1fd8] sm:$0xff]  ;;  %v1121_v33 = vld [vmem:[#allocation5 + $0x1dc0] sm:$0xff] }
 0x235   :  { %3315 = vmatprep.subr.mxu1 %v1154_v34  ;;  %3247 = vmatpush1.msra.mxu0 %v1087_v35  ;;  %v1187_v34 = vld [vmem:[#allocation5 + $0x1fd0] sm:$0xff]  ;;  %v1120_v35 = vld [vmem:[#allocation5 + $0x1db8] sm:$0xff] }
 0x236   :  { %3316 = vmatpush1.msra.mxu1 %v1153_v36  ;;  %3248 = vmatprep.subr.mxu0 %v1086_v37  ;;  %v1186_v36 = vld [vmem:[#allocation5 + $0x1fc8] sm:$0xff]  ;;  %v1119_v37 = vld [vmem:[#allocation5 + $0x1db0] sm:$0xff] }
 0x237   :  { %3317 = vmatprep.subr.mxu1 %v1152_v38  ;;  %3249 = vmatpush1.msra.mxu0 %v1085_v39  ;;  %v1185_v38 = vld [vmem:[#allocation5 + $0x1fc0] sm:$0xff]  ;;  %v1118_v39 = vld [vmem:[#allocation5 + $0x1da8] sm:$0xff] }
 0x238   :  { %3318 = vmatpush1.msra.mxu1 %v1151_v40  ;;  %3250 = vmatprep.subr.mxu0 %v1084_v41  ;;  %v1184_v40 = vld [vmem:[#allocation5 + $0x1fb8] sm:$0xff]  ;;  %v1117_v41 = vld [vmem:[#allocation5 + $0x1da0] sm:$0xff] }
 0x239   :  { %3319 = vmatprep.subr.mxu1 %v1150_v43  ;;  %3251 = vmatpush1.msra.mxu0 %v1083_v44  ;;  %v1183_v43 = vld [vmem:[#allocation5 + $0x1fb0] sm:$0xff]  ;;  %v1116_v44 = vld [vmem:[#allocation5 + $0x1d98] sm:$0xff] }
 0x23a   :  { %3320 = vmatpush1.msra.mxu1 %v1149_v45  ;;  %3252 = vmatprep.subr.mxu0 %v1082_v46  ;;  %v1182_v45 = vld [vmem:[#allocation5 + $0x1fa8] sm:$0xff]  ;;  %v1115_v46 = vld [vmem:[#allocation5 + $0x1d90] sm:$0xff] }
 0x23b   :  { %3321 = vmatprep.subr.mxu1 %v1148_v47  ;;  %3253 = vmatpush1.msra.mxu0 %v1081_v48  ;;  %v1181_v47 = vld [vmem:[#allocation5 + $0x1fa0] sm:$0xff]  ;;  %v1114_v48 = vld [vmem:[#allocation5 + $0x1d88] sm:$0xff] }
 0x23c   :  { %3322 = vmatpush1.msra.mxu1 %v1147_v49  ;;  %3254 = vmatprep.subr.mxu0 %v1080_v50  ;;  %v1180_v49 = vld [vmem:[#allocation5 + $0x1f98] sm:$0xff]  ;;  %v1113_v50 = vld [vmem:[#allocation5 + $0x1d80] sm:$0xff] }
 0x23d   :  { %3323 = vmatprep.subr.mxu1 %v1146_v51  ;;  %3255 = vmatpush1.msra.mxu0 %v1079_v52  ;;  %v1179_v51 = vld [vmem:[#allocation5 + $0x1f90] sm:$0xff]  ;;  %v1112_v52 = vld [vmem:[#allocation5 + $0x1d78] sm:$0xff] }
 0x23e   :  { %3324 = vmatpush1.msra.mxu1 %v1145_v53  ;;  %3256 = vmatprep.subr.mxu0 %v1078_v54  ;;  %v1178_v53 = vld [vmem:[#allocation5 + $0x1f88] sm:$0xff]  ;;  %v1111_v54 = vld [vmem:[#allocation5 + $0x1d70] sm:$0xff] }
 0x23f   :  { %3325 = vmatprep.subr.mxu1 %v1144_v56  ;;  %3257 = vmatpush1.msra.mxu0 %v1077_v57  ;;  %v1177_v56 = vld [vmem:[#allocation5 + $0x1f80] sm:$0xff]  ;;  %v1110_v57 = vld [vmem:[#allocation5 + $0x1d68] sm:$0xff] }
 0x240   :  { %3326 = vmatpush1.msra.mxu1 %v1143_v58  ;;  %3258 = vmatprep.subr.mxu0 %v1076_v59  ;;  %v1176_v58 = vld [vmem:[#allocation5 + $0x1f78] sm:$0xff]  ;;  %v1109_v59 = vld [vmem:[#allocation5 + $0x1d60] sm:$0xff] }
 0x241   :  { %3327 = vmatprep.subr.mxu1 %v1142_v60  ;;  %3259 = vmatpush1.msra.mxu0 %v1075_v61  ;;  %v1175_v60 = vld [vmem:[#allocation5 + $0x1f70] sm:$0xff]  ;;  %v1108_v61 = vld [vmem:[#allocation5 + $0x1d58] sm:$0xff] }
 0x242   :  { %3328 = vmatpush1.msra.mxu1 %v1141_v62  ;;  %3260 = vmatprep.subr.mxu0 %v1074_v63  ;;  %v128_v62 = vld [vmem:[#allocation3 + $0x38] sm:$0xff] }
 0x243   :  { %3329 = vmatprep.subr.mxu1 %v1140_v0  ;;  %3261 = vmatpush1.msra.mxu0 %v1073_v1  ;;  %v140_v63 = vld [vmem:[#allocation3 + $0x98] sm:$0xff] }
 0x244   :  { %3330 = vmatpush1.msra.mxu1 %v1139_v2  ;;  %3262 = vmatprep.subr.mxu0 %v1072_v3  ;;  %v152_v0 = vld [vmem:[#allocation3 + $0xf8] sm:$0xff]  ;;  %v1174_v2 = vld [vmem:[#allocation5 + $0x1f68] sm:$0xff]  ;;  %v1107_v3 = vld [vmem:[#allocation5 + $0x1d50] sm:$0xff] }
 0x245   :  { %3331 = vmatprep.subr.mxu1 %v1138_v4  ;;  %3263 = vmatpush1.msra.mxu0 %v1071_v5  ;;  %v164_v1 = vld [vmem:[#allocation3 + $0x158] sm:$0xff]  ;;  %v1173_v4 = vld [vmem:[#allocation5 + $0x1f60] sm:$0xff]  ;;  %v1106_v5 = vld [vmem:[#allocation5 + $0x1d48] sm:$0xff] }
 0x246   :  { %3332 = vmatpush1.msra.mxu1 %v1137_v6  ;;  %3264 = vmatprep.subr.mxu0 %v1070_v7  ;;  %v1172_v6 = vld [vmem:[#allocation5 + $0x1f58] sm:$0xff]  ;;  %v1105_v7 = vld [vmem:[#allocation5 + $0x1d40] sm:$0xff] }
 0x247   :  { %3333 = vmatprep.subr.mxu1 %v1136_v8  ;;  %3265 = vmatpush1.msra.mxu0 %v1069_v9  ;;  %v2007_v8 = vcombine.low %v128_v62, %v140_v63  ;;  %v2009_v9 = vcombine.low %v152_v0, %v164_v1 }
 0x248   :  { %3334 = vmatpush1.msra.mxu1 %v1135_v10  ;;  %3266 = vmatprep.subr.mxu0 %v1068_v11  ;;  %v1171_v10 = vld [vmem:[#allocation5 + $0x1f50] sm:$0xff]  ;;  %v1104_v11 = vld [vmem:[#allocation5 + $0x1d38] sm:$0xff] }
 0x249   :  { %3335 = vmatprep.subr.mxu1 %v1134_v12  ;;  %3267 = vmatpush1.msra.mxu0 %v1067_v13  ;;  %v1170_v12 = vld [vmem:[#allocation5 + $0x1f48] sm:$0xff]  ;;  %v1103_v13 = vld [vmem:[#allocation5 + $0x1d30] sm:$0xff] }
 0x24a   :  { %3336 = vmatpush1.msra.mxu1 %v1133_v14  ;;  %3268 = vmatprep.subr.mxu0 %v1066_v15  ;;  %v1169_v14 = vld [vmem:[#allocation5 + $0x1f40] sm:$0xff]  ;;  %v1102_v15 = vld [vmem:[#allocation5 + $0x1d28] sm:$0xff] }
 0x24b   :  { %3337 = vmatprep.subr.mxu1 %v1132_v16  ;;  %3269 = vmatpush1.msra.mxu0 %v1065_v17  ;;  %v2008_v16 = vcombine.high %v128_v62, %v140_v63  ;;  %v2010_v17 = vcombine.high %v152_v0, %v164_v1  ;;  %v1279_v62 = vld [vmem:[#allocation5 + $0x22b0] sm:$0xff]  ;;  %v1212_v63 = vld [vmem:[#allocation5 + $0x2098] sm:$0xff]  ;;  %v1278_v0 = vld [vmem:[#allocation5 + $0x22a8] sm:$0xff] }
 0x24c   :  { %3338 = vmatpush1.msra.mxu1 %v1131_v18  ;;  %3270 = vmatprep.subr.mxu0 %v1128_v19  ;;  %v1168_v18 = vld [vmem:[#allocation5 + $0x1f38] sm:$0xff]  ;;  %v1101_v19 = vld [vmem:[#allocation5 + $0x1d20] sm:$0xff]  ;;  %v1211_v1 = vld [vmem:[#allocation5 + $0x2090] sm:$0xff] }
 0x24d   :  { %3339 = vmatprep.subr.mxu1 %v1130_v20  ;;  %3271 = vmatpush2.msra.mxu0 %v1127_v21  ;;  %v2017_v20 = vrot.slane %v2007_v8, %v4572_v55  ;;  %v2031_v21 = vrot.slane %v2009_v9, %v4572_v55  ;;  %v1274_v8 = vld [vmem:[#allocation5 + $0x2288] sm:$0xff]  ;;  %v1207_v9 = vld [vmem:[#allocation5 + $0x2070] sm:$0xff] }
 0x24e   :  { %3340 = vmatpush1.msra.mxu1 %v1129_v22  ;;  %3272 = vmatprep.subr.mxu0 %v1126_v23  ;;  %v1167_v22 = vld [vmem:[#allocation5 + $0x1f30] sm:$0xff]  ;;  %v1100_v23 = vld [vmem:[#allocation5 + $0x1d18] sm:$0xff] }
 0x24f   :  { %3341 = vmatprep.subr.mxu1 %v1192_v24  ;;  %3273 = vmatpush2.msra.mxu0 %v1125_v25  ;;  %v1166_v24 = vld [vmem:[#allocation5 + $0x1f28] sm:$0xff]  ;;  %v1099_v25 = vld [vmem:[#allocation5 + $0x1d10] sm:$0xff] }
 0x250   :  { %3342 = vmatpush2.msra.mxu1 %v1191_v26  ;;  %3274 = vmatprep.subr.mxu0 %v1124_v27  ;;  %v1165_v26 = vld [vmem:[#allocation5 + $0x1f20] sm:$0xff]  ;;  %v1098_v27 = vld [vmem:[#allocation5 + $0x1d08] sm:$0xff] }
 0x251   :  { %3343 = vmatprep.subr.mxu1 %v1190_v28  ;;  %3275 = vmatpush2.msra.mxu0 %v1123_v29  ;;  %v2024_v28 = vrot.slane %v2008_v16, %v4572_v55  ;;  %v2038_v29 = vrot.slane %v2010_v17, %v4572_v55  ;;  %v1270_v16 = vld [vmem:[#allocation5 + $0x2268] sm:$0xff]  ;;  %v1203_v17 = vld [vmem:[#allocation5 + $0x2050] sm:$0xff] }
 0x252   :  { %3344 = vmatpush2.msra.mxu1 %v1189_v30  ;;  %3276 = vmatprep.subr.mxu0 %v1122_v31  ;;  %v1164_v30 = vld [vmem:[#allocation5 + $0x1f18] sm:$0xff]  ;;  %v1097_v31 = vld [vmem:[#allocation5 + $0x1d00] sm:$0xff] }
 0x253   :  { %3345 = vmatprep.subr.mxu1 %v1188_v32  ;;  %3277 = vmatpush2.msra.mxu0 %v1121_v33  ;;  %v2040_v32 = vcombine.high %v2017_v20, %v2031_v21  ;;  %v1163_v33 = vld [vmem:[#allocation5 + $0x1f10] sm:$0xff] }
 0x254   :  { %3346 = vmatpush2.msra.mxu1 %v1187_v34  ;;  %3278 = vmatprep.subr.mxu0 %v1120_v35  ;;  %v2039_v34 = vcombine.low %v2017_v20, %v2031_v21  ;;  %v1162_v35 = vld [vmem:[#allocation5 + $0x1f08] sm:$0xff]  ;;  %v1268_v20 = vld [vmem:[#allocation5 + $0x2258] sm:$0xff]  ;;  %v1201_v21 = vld [vmem:[#allocation5 + $0x2040] sm:$0xff] }
 0x255   :  { %3347 = vmatprep.subr.mxu1 %v1186_v36  ;;  %3279 = vmatpush2.msra.mxu0 %v1119_v37  ;;  %v1224_v36 = vld [vmem:[#allocation5 + $0x20f8] sm:$0xff]  ;;  %v1161_v37 = vld [vmem:[#allocation5 + $0x1f00] sm:$0xff] }
 0x256   :  { %3348 = vmatpush2.msra.mxu1 %v1185_v38  ;;  %3280 = vmatprep.subr.mxu0 %v1118_v39  ;;  %v2042_v38 = vcombine.high %v2024_v28, %v2038_v29  ;;  %v1223_v39 = vld [vmem:[#allocation5 + $0x20f0] sm:$0xff] }
 0x257   :  { %3349 = vmatprep.subr.mxu1 %v1184_v40  ;;  %3281 = vmatpush2.msra.mxu0 %v1117_v41  ;;  %v2041_v40 = vcombine.low %v2024_v28, %v2038_v29  ;;  %v1222_v41 = vld [vmem:[#allocation5 + $0x20e8] sm:$0xff]  ;;  %v1264_v28 = vld [vmem:[#allocation5 + $0x2238] sm:$0xff]  ;;  %v1197_v29 = vld [vmem:[#allocation5 + $0x2020] sm:$0xff] }
 0x258   :  { %3350 = vmatpush2.msra.mxu1 %v1183_v43  ;;  %3282 = vmatprep.subr.mxu0 %v1116_v44  ;;  %v1288_v43 = vld [vmem:[#allocation5 + $0x22f8] sm:$0xff]  ;;  %v1221_v44 = vld [vmem:[#allocation5 + $0x20e0] sm:$0xff] }
 0x259   :  { %3351 = vmatprep.subr.mxu1 %v1182_v45  ;;  %3283 = vmatpush2.msra.mxu0 %v1115_v46  ;;  %v1287_v45 = vld [vmem:[#allocation5 + $0x22f0] sm:$0xff]  ;;  %v1220_v46 = vld [vmem:[#allocation5 + $0x20d8] sm:$0xff] }
 0x25a   :  { %3352 = vmatpush2.msra.mxu1 %v1181_v47  ;;  %3284 = vmatprep.subr.mxu0 %v1114_v48  ;;  %v1286_v47 = vld [vmem:[#allocation5 + $0x22e8] sm:$0xff]  ;;  %v1219_v48 = vld [vmem:[#allocation5 + $0x20d0] sm:$0xff] }
 0x25b   :  { %3353 = vmatprep.subr.mxu1 %v1180_v49  ;;  %3285 = vmatpush2.msra.mxu0 %v1113_v50  ;;  %v1285_v49 = vld [vmem:[#allocation5 + $0x22e0] sm:$0xff]  ;;  %v1218_v50 = vld [vmem:[#allocation5 + $0x20c8] sm:$0xff] }
 0x25c   :  { %3354 = vmatpush2.msra.mxu1 %v1179_v51  ;;  %3286 = vmatprep.subr.mxu0 %v1112_v52  ;;  %v1284_v51 = vld [vmem:[#allocation5 + $0x22d8] sm:$0xff]  ;;  %v1217_v52 = vld [vmem:[#allocation5 + $0x20c0] sm:$0xff] }
 0x25d   :  { %3355 = vmatprep.subr.mxu1 %v1178_v53  ;;  %3287 = vmatpush2.msra.mxu0 %v1111_v54  ;;  %v1283_v53 = vld [vmem:[#allocation5 + $0x22d0] sm:$0xff]  ;;  %v1216_v54 = vld [vmem:[#allocation5 + $0x20b8] sm:$0xff] }
 0x25e   :  { %3356 = vmatpush2.msra.mxu1 %v1177_v56  ;;  %3288 = vmatprep.subr.mxu0 %v1110_v57  ;;  %v1282_v56 = vld [vmem:[#allocation5 + $0x22c8] sm:$0xff]  ;;  %v1215_v57 = vld [vmem:[#allocation5 + $0x20b0] sm:$0xff] }
 0x25f   :  { %3357 = vmatprep.subr.mxu1 %v1176_v58  ;;  %3289 = vmatpush2.msra.mxu0 %v1109_v59  ;;  %v1281_v58 = vld [vmem:[#allocation5 + $0x22c0] sm:$0xff]  ;;  %v1214_v59 = vld [vmem:[#allocation5 + $0x20a8] sm:$0xff] }
 0x260   :  { %3358 = vmatpush2.msra.mxu1 %v1175_v60  ;;  %3290 = vmatprep.subr.mxu0 %v1108_v61  ;;  %v1280_v60 = vld [vmem:[#allocation5 + $0x22b8] sm:$0xff]  ;;  %v1213_v61 = vld [vmem:[#allocation5 + $0x20a0] sm:$0xff] }
 0x261   :  { %3359 = vmatprep.subr.mxu1 %v1174_v2  ;;  %3291 = vmatpush2.msra.mxu0 %v1107_v3  ;;  %v1277_v2 = vld [vmem:[#allocation5 + $0x22a0] sm:$0xff]  ;;  %v1210_v3 = vld [vmem:[#allocation5 + $0x2088] sm:$0xff] }
 0x262   :  { %3360 = vmatpush2.msra.mxu1 %v1173_v4  ;;  %3292 = vmatprep.subr.mxu0 %v1106_v5  ;;  %v1276_v4 = vld [vmem:[#allocation5 + $0x2298] sm:$0xff]  ;;  %v1209_v5 = vld [vmem:[#allocation5 + $0x2080] sm:$0xff] }
 0x263   :  { %3361 = vmatprep.subr.mxu1 %v1172_v6  ;;  %3293 = vmatpush2.msra.mxu0 %v1105_v7  ;;  %v1275_v6 = vld [vmem:[#allocation5 + $0x2290] sm:$0xff]  ;;  %v1208_v7 = vld [vmem:[#allocation5 + $0x2078] sm:$0xff] }
 0x264   :  { %3362 = vmatpush2.msra.mxu1 %v1171_v10  ;;  %3294 = vmatprep.subr.mxu0 %v1104_v11  ;;  %v1273_v10 = vld [vmem:[#allocation5 + $0x2280] sm:$0xff]  ;;  %v1206_v11 = vld [vmem:[#allocation5 + $0x2068] sm:$0xff] }
 0x265   :  { %3363 = vmatprep.subr.mxu1 %v1170_v12  ;;  %3295 = vmatpush2.msra.mxu0 %v1103_v13  ;;  %v1272_v12 = vld [vmem:[#allocation5 + $0x2278] sm:$0xff]  ;;  %v1205_v13 = vld [vmem:[#allocation5 + $0x2060] sm:$0xff] }
 0x266   :  { %3364 = vmatpush2.msra.mxu1 %v1169_v14  ;;  %3296 = vmatprep.subr.mxu0 %v1102_v15  ;;  %v1271_v14 = vld [vmem:[#allocation5 + $0x2270] sm:$0xff]  ;;  %v1204_v15 = vld [vmem:[#allocation5 + $0x2058] sm:$0xff] }
 0x267   :  { %3365 = vmatprep.subr.mxu1 %v1168_v18  ;;  %3297 = vmatpush2.msra.mxu0 %v1101_v19  ;;  %v1269_v18 = vld [vmem:[#allocation5 + $0x2260] sm:$0xff]  ;;  %v1202_v19 = vld [vmem:[#allocation5 + $0x2048] sm:$0xff] }
 0x268   :  { %3366 = vmatpush2.msra.mxu1 %v1167_v22  ;;  %3298 = vmatprep.subr.mxu0 %v1100_v23  ;;  %v1267_v22 = vld [vmem:[#allocation5 + $0x2250] sm:$0xff]  ;;  %v1200_v23 = vld [vmem:[#allocation5 + $0x2038] sm:$0xff] }
 0x269   :  { %3367 = vmatprep.subr.mxu1 %v1166_v24  ;;  %3299 = vmatpush2.msra.mxu0 %v1099_v25  ;;  %v1266_v24 = vld [vmem:[#allocation5 + $0x2248] sm:$0xff]  ;;  %v1199_v25 = vld [vmem:[#allocation5 + $0x2030] sm:$0xff] }
 0x26a   :  { %3368 = vmatpush2.msra.mxu1 %v1165_v26  ;;  %3300 = vmatprep.subr.mxu0 %v1098_v27  ;;  %v1265_v26 = vld [vmem:[#allocation5 + $0x2240] sm:$0xff]  ;;  %v1198_v27 = vld [vmem:[#allocation5 + $0x2028] sm:$0xff] }
 0x26b   :  { %3369 = vmatprep.subr.mxu1 %v1164_v30  ;;  %3301 = vmatpush2.msra.mxu0 %v1097_v31  ;;  %v1263_v30 = vld [vmem:[#allocation5 + $0x2230] sm:$0xff]  ;;  %v1196_v31 = vld [vmem:[#allocation5 + $0x2018] sm:$0xff] }
 0x26c   :  { %3302 = vmatprep.mubr.f32.mxu0 %v2040_v32  ;;  %3370 = vmatpush2.msra.mxu1 %v1163_v33  ;;  %v1262_v32 = vld [vmem:[#allocation5 + $0x2228] sm:$0xff]  ;;  %v1195_v33 = vld [vmem:[#allocation5 + $0x2010] sm:$0xff] }
 0x26d   :  { %3303 = vmatmul.mubr.f32.vlgmr.msra.gmra.mxu0 %v2039_v34  ;;  %3371 = vmatprep.subr.mxu1 %v1162_v35  ;;  %v1261_v34 = vld [vmem:[#allocation5 + $0x2220] sm:$0xff]  ;;  %v1194_v35 = vld [vmem:[#allocation5 + $0x2008] sm:$0xff] }
 0x26e   :  { %3380 = vmatprep.subr.mxu0 %v1224_v36  ;;  %3372 = vmatpush2.msra.mxu1 %v1161_v37  ;;  %v1260_v36 = vld [vmem:[#allocation5 + $0x2218] sm:$0xff]  ;;  %v1193_v37 = vld [vmem:[#allocation5 + $0x2000] sm:$0xff] }
 0x26f   :  { %3373 = vmatprep.mubr.f32.mxu1 %v2042_v38  ;;  %3381 = vmatpush1.msra.mxu0 %v1223_v39  ;;  %v1259_v38 = vld [vmem:[#allocation5 + $0x2210] sm:$0xff]  ;;  %v1256_v39 = vld [vmem:[#allocation5 + $0x21f8] sm:$0xff] }
 0x270   :  { %3374 = vmatmul.mubr.f32.vlgmr.msra.gmra.mxu1 %v2041_v40  ;;  %3382 = vmatprep.subr.mxu0 %v1222_v41  ;;  %v1258_v40 = vld [vmem:[#allocation5 + $0x2208] sm:$0xff]  ;;  %v1255_v41 = vld [vmem:[#allocation5 + $0x21f0] sm:$0xff] }
 0x271   :  { %3451 = vmatprep.subr.mxu1 %v1288_v43  ;;  %3383 = vmatpush1.msra.mxu0 %v1221_v44  ;;  %v1257_v43 = vld [vmem:[#allocation5 + $0x2200] sm:$0xff]  ;;  %v1254_v44 = vld [vmem:[#allocation5 + $0x21e8] sm:$0xff] }
 0x272   :  { %3452 = vmatpush1.msra.mxu1 %v1287_v45  ;;  %3384 = vmatprep.subr.mxu0 %v1220_v46  ;;  %v1320_v45 = vld [vmem:[#allocation5 + $0x23f8] sm:$0xff]  ;;  %v1253_v46 = vld [vmem:[#allocation5 + $0x21e0] sm:$0xff] }
 0x273   :  { %3453 = vmatprep.subr.mxu1 %v1286_v47  ;;  %3385 = vmatpush1.msra.mxu0 %v1219_v48  ;;  %v1319_v47 = vld [vmem:[#allocation5 + $0x23f0] sm:$0xff]  ;;  %v1252_v48 = vld [vmem:[#allocation5 + $0x21d8] sm:$0xff] }
 0x274   :  { %3454 = vmatpush1.msra.mxu1 %v1285_v49  ;;  %3386 = vmatprep.subr.mxu0 %v1218_v50  ;;  %v1318_v49 = vld [vmem:[#allocation5 + $0x23e8] sm:$0xff]  ;;  %v1251_v50 = vld [vmem:[#allocation5 + $0x21d0] sm:$0xff] }
 0x275   :  { %3455 = vmatprep.subr.mxu1 %v1284_v51  ;;  %3387 = vmatpush1.msra.mxu0 %v1217_v52  ;;  %v1317_v51 = vld [vmem:[#allocation5 + $0x23e0] sm:$0xff]  ;;  %v1250_v52 = vld [vmem:[#allocation5 + $0x21c8] sm:$0xff] }
 0x276   :  { %3456 = vmatpush1.msra.mxu1 %v1283_v53  ;;  %3388 = vmatprep.subr.mxu0 %v1216_v54  ;;  %v1316_v53 = vld [vmem:[#allocation5 + $0x23d8] sm:$0xff]  ;;  %v1249_v54 = vld [vmem:[#allocation5 + $0x21c0] sm:$0xff] }
 0x277   :  { %3457 = vmatprep.subr.mxu1 %v1282_v56  ;;  %3389 = vmatpush1.msra.mxu0 %v1215_v57  ;;  %v1315_v56 = vld [vmem:[#allocation5 + $0x23d0] sm:$0xff]  ;;  %v1248_v57 = vld [vmem:[#allocation5 + $0x21b8] sm:$0xff] }
 0x278   :  { %3458 = vmatpush1.msra.mxu1 %v1281_v58  ;;  %3390 = vmatprep.subr.mxu0 %v1214_v59  ;;  %v1314_v58 = vld [vmem:[#allocation5 + $0x23c8] sm:$0xff]  ;;  %v1247_v59 = vld [vmem:[#allocation5 + $0x21b0] sm:$0xff] }
 0x279   :  { %3459 = vmatprep.subr.mxu1 %v1280_v60  ;;  %3391 = vmatpush1.msra.mxu0 %v1213_v61  ;;  %v1313_v60 = vld [vmem:[#allocation5 + $0x23c0] sm:$0xff]  ;;  %v1246_v61 = vld [vmem:[#allocation5 + $0x21a8] sm:$0xff] }
 0x27a   :  { %3460 = vmatpush1.msra.mxu1 %v1279_v62  ;;  %3392 = vmatprep.subr.mxu0 %v1212_v63  ;;  %v1312_v62 = vld [vmem:[#allocation5 + $0x23b8] sm:$0xff]  ;;  %v1245_v63 = vld [vmem:[#allocation5 + $0x21a0] sm:$0xff] }
 0x27b   :  { %3461 = vmatprep.subr.mxu1 %v1278_v0  ;;  %3393 = vmatpush1.msra.mxu0 %v1211_v1  ;;  %v1311_v0 = vld [vmem:[#allocation5 + $0x23b0] sm:$0xff]  ;;  %v1244_v1 = vld [vmem:[#allocation5 + $0x2198] sm:$0xff] }
 0x27c   :  { %3462 = vmatpush1.msra.mxu1 %v1277_v2  ;;  %3394 = vmatprep.subr.mxu0 %v1210_v3  ;;  %v1310_v2 = vld [vmem:[#allocation5 + $0x23a8] sm:$0xff]  ;;  %v1243_v3 = vld [vmem:[#allocation5 + $0x2190] sm:$0xff] }
 0x27d   :  { %3463 = vmatprep.subr.mxu1 %v1276_v4  ;;  %3395 = vmatpush1.msra.mxu0 %v1209_v5  ;;  %v1309_v4 = vld [vmem:[#allocation5 + $0x23a0] sm:$0xff]  ;;  %v1242_v5 = vld [vmem:[#allocation5 + $0x2188] sm:$0xff] }
 0x27e   :  { %3464 = vmatpush1.msra.mxu1 %v1275_v6  ;;  %3396 = vmatprep.subr.mxu0 %v1208_v7  ;;  %v1308_v6 = vld [vmem:[#allocation5 + $0x2398] sm:$0xff]  ;;  %v1241_v7 = vld [vmem:[#allocation5 + $0x2180] sm:$0xff] }
 0x27f   :  { %3465 = vmatprep.subr.mxu1 %v1274_v8  ;;  %3397 = vmatpush1.msra.mxu0 %v1207_v9  ;;  %v1307_v8 = vld [vmem:[#allocation5 + $0x2390] sm:$0xff]  ;;  %v1240_v9 = vld [vmem:[#allocation5 + $0x2178] sm:$0xff] }
 0x280   :  { %3466 = vmatpush1.msra.mxu1 %v1273_v10  ;;  %3398 = vmatprep.subr.mxu0 %v1206_v11  ;;  %v1306_v10 = vld [vmem:[#allocation5 + $0x2388] sm:$0xff]  ;;  %v1239_v11 = vld [vmem:[#allocation5 + $0x2170] sm:$0xff] }
 0x281   :  { %3467 = vmatprep.subr.mxu1 %v1272_v12  ;;  %3399 = vmatpush1.msra.mxu0 %v1205_v13  ;;  %v1305_v12 = vld [vmem:[#allocation5 + $0x2380] sm:$0xff]  ;;  %v1238_v13 = vld [vmem:[#allocation5 + $0x2168] sm:$0xff] }
 0x282   :  { %3468 = vmatpush1.msra.mxu1 %v1271_v14  ;;  %3400 = vmatprep.subr.mxu0 %v1204_v15  ;;  %v1304_v14 = vld [vmem:[#allocation5 + $0x2378] sm:$0xff]  ;;  %v1237_v15 = vld [vmem:[#allocation5 + $0x2160] sm:$0xff] }
 0x283   :  { %3469 = vmatprep.subr.mxu1 %v1270_v16  ;;  %3401 = vmatpush1.msra.mxu0 %v1203_v17  ;;  %v1303_v16 = vld [vmem:[#allocation5 + $0x2370] sm:$0xff]  ;;  %v1236_v17 = vld [vmem:[#allocation5 + $0x2158] sm:$0xff] }
 0x284   :  { %3470 = vmatpush1.msra.mxu1 %v1269_v18  ;;  %3402 = vmatprep.subr.mxu0 %v1202_v19  ;;  %v129_v18 = vld [vmem:[#allocation3 + $0x40] sm:$0xff] }
 0x285   :  { %3471 = vmatprep.subr.mxu1 %v1268_v20  ;;  %3403 = vmatpush1.msra.mxu0 %v1201_v21  ;;  %v141_v19 = vld [vmem:[#allocation3 + $0xa0] sm:$0xff] }
 0x286   :  { %3472 = vmatpush1.msra.mxu1 %v1267_v22  ;;  %3404 = vmatprep.subr.mxu0 %v1200_v23  ;;  %v153_v20 = vld [vmem:[#allocation3 + $0x100] sm:$0xff]  ;;  %v1302_v22 = vld [vmem:[#allocation5 + $0x2368] sm:$0xff]  ;;  %v1235_v23 = vld [vmem:[#allocation5 + $0x2150] sm:$0xff] }
 0x287   :  { %3473 = vmatprep.subr.mxu1 %v1266_v24  ;;  %3405 = vmatpush1.msra.mxu0 %v1199_v25  ;;  %v165_v21 = vld [vmem:[#allocation3 + $0x160] sm:$0xff]  ;;  %v1234_v25 = vld [vmem:[#allocation5 + $0x2148] sm:$0xff] }
 0x288   :  { %3474 = vmatpush1.msra.mxu1 %v1265_v26  ;;  %3406 = vmatprep.subr.mxu0 %v1198_v27  ;;  %v1301_v24 = vld [vmem:[#allocation5 + $0x2360] sm:$0xff]  ;;  %v1300_v26 = vld [vmem:[#allocation5 + $0x2358] sm:$0xff] }
 0x289   :  { %3475 = vmatprep.subr.mxu1 %v1264_v28  ;;  %3407 = vmatpush1.msra.mxu0 %v1197_v29  ;;  %v1233_v27 = vld [vmem:[#allocation5 + $0x2140] sm:$0xff]  ;;  %v2043_v28 = vcombine.low %v129_v18, %v141_v19  ;;  %v2045_v29 = vcombine.low %v153_v20, %v165_v21 }
 0x28a   :  { %3476 = vmatpush1.msra.mxu1 %v1263_v30  ;;  %3408 = vmatprep.subr.mxu0 %v1196_v31  ;;  %v1299_v30 = vld [vmem:[#allocation5 + $0x2350] sm:$0xff]  ;;  %v1232_v31 = vld [vmem:[#allocation5 + $0x2138] sm:$0xff] }
 0x28b   :  { %3477 = vmatprep.subr.mxu1 %v1262_v32  ;;  %3409 = vmatpush1.msra.mxu0 %v1195_v33  ;;  %v1298_v32 = vld [vmem:[#allocation5 + $0x2348] sm:$0xff]  ;;  %v1231_v33 = vld [vmem:[#allocation5 + $0x2130] sm:$0xff] }
 0x28c   :  { %3478 = vmatpush1.msra.mxu1 %v1261_v34  ;;  %3410 = vmatprep.subr.mxu0 %v1194_v35  ;;  %v1297_v34 = vld [vmem:[#allocation5 + $0x2340] sm:$0xff]  ;;  %v1230_v35 = vld [vmem:[#allocation5 + $0x2128] sm:$0xff] }
 0x28d   :  { %3479 = vmatprep.subr.mxu1 %v1260_v36  ;;  %3411 = vmatpush1.msra.mxu0 %v1193_v37  ;;  %v2044_v36 = vcombine.high %v129_v18, %v141_v19  ;;  %v2046_v37 = vcombine.high %v153_v20, %v165_v21  ;;  %v1407_v18 = vld [vmem:[#allocation5 + $0x26b0] sm:$0xff]  ;;  %v1340_v19 = vld [vmem:[#allocation5 + $0x2498] sm:$0xff]  ;;  %v1406_v20 = vld [vmem:[#allocation5 + $0x26a8] sm:$0xff] }
 0x28e   :  { %3480 = vmatpush1.msra.mxu1 %v1259_v38  ;;  %3412 = vmatprep.subr.mxu0 %v1256_v39  ;;  %v1296_v38 = vld [vmem:[#allocation5 + $0x2338] sm:$0xff]  ;;  %v1229_v39 = vld [vmem:[#allocation5 + $0x2120] sm:$0xff]  ;;  %v1339_v21 = vld [vmem:[#allocation5 + $0x2490] sm:$0xff] }
 0x28f   :  { %3481 = vmatprep.subr.mxu1 %v1258_v40  ;;  %3413 = vmatpush2.msra.mxu0 %v1255_v41  ;;  %v2053_v40 = vrot.slane %v2043_v28, %v4572_v55  ;;  %v2067_v41 = vrot.slane %v2045_v29, %v4572_v55  ;;  %v1402_v28 = vld [vmem:[#allocation5 + $0x2688] sm:$0xff]  ;;  %v1335_v29 = vld [vmem:[#allocation5 + $0x2470] sm:$0xff] }
 0x290   :  { %3482 = vmatpush1.msra.mxu1 %v1257_v43  ;;  %3414 = vmatprep.subr.mxu0 %v1254_v44  ;;  %v1295_v43 = vld [vmem:[#allocation5 + $0x2330] sm:$0xff]  ;;  %v1228_v44 = vld [vmem:[#allocation5 + $0x2118] sm:$0xff] }
 0x291   :  { %3483 = vmatprep.subr.mxu1 %v1320_v45  ;;  %3415 = vmatpush2.msra.mxu0 %v1253_v46  ;;  %v1294_v45 = vld [vmem:[#allocation5 + $0x2328] sm:$0xff]  ;;  %v1227_v46 = vld [vmem:[#allocation5 + $0x2110] sm:$0xff] }
 0x292   :  { %3484 = vmatpush2.msra.mxu1 %v1319_v47  ;;  %3416 = vmatprep.subr.mxu0 %v1252_v48  ;;  %v1293_v47 = vld [vmem:[#allocation5 + $0x2320] sm:$0xff]  ;;  %v1226_v48 = vld [vmem:[#allocation5 + $0x2108] sm:$0xff] }
 0x293   :  { %3485 = vmatprep.subr.mxu1 %v1318_v49  ;;  %3417 = vmatpush2.msra.mxu0 %v1251_v50  ;;  %v2060_v49 = vrot.slane %v2044_v36, %v4572_v55  ;;  %v2074_v50 = vrot.slane %v2046_v37, %v4572_v55  ;;  %v1398_v36 = vld [vmem:[#allocation5 + $0x2668] sm:$0xff]  ;;  %v1331_v37 = vld [vmem:[#allocation5 + $0x2450] sm:$0xff] }
 0x294   :  { %3486 = vmatpush2.msra.mxu1 %v1317_v51  ;;  %3418 = vmatprep.subr.mxu0 %v1250_v52  ;;  %v1292_v51 = vld [vmem:[#allocation5 + $0x2318] sm:$0xff]  ;;  %v1225_v52 = vld [vmem:[#allocation5 + $0x2100] sm:$0xff] }
 0x295   :  { %3487 = vmatprep.subr.mxu1 %v1316_v53  ;;  %3419 = vmatpush2.msra.mxu0 %v1249_v54  ;;  %v2076_v53 = vcombine.high %v2053_v40, %v2067_v41  ;;  %v1291_v54 = vld [vmem:[#allocation5 + $0x2310] sm:$0xff] }
 0x296   :  { %3488 = vmatpush2.msra.mxu1 %v1315_v56  ;;  %3420 = vmatprep.subr.mxu0 %v1248_v57  ;;  %v2075_v56 = vcombine.low %v2053_v40, %v2067_v41  ;;  %v1290_v57 = vld [vmem:[#allocation5 + $0x2308] sm:$0xff]  ;;  %v1396_v40 = vld [vmem:[#allocation5 + $0x2658] sm:$0xff]  ;;  %v1329_v41 = vld [vmem:[#allocation5 + $0x2440] sm:$0xff] }
 0x297   :  { %3489 = vmatprep.subr.mxu1 %v1314_v58  ;;  %3421 = vmatpush2.msra.mxu0 %v1247_v59  ;;  %v1352_v58 = vld [vmem:[#allocation5 + $0x24f8] sm:$0xff]  ;;  %v1289_v59 = vld [vmem:[#allocation5 + $0x2300] sm:$0xff] }
 0x298   :  { %3490 = vmatpush2.msra.mxu1 %v1313_v60  ;;  %3422 = vmatprep.subr.mxu0 %v1246_v61  ;;  %v2078_v60 = vcombine.high %v2060_v49, %v2074_v50  ;;  %v1351_v61 = vld [vmem:[#allocation5 + $0x24f0] sm:$0xff] }
 0x299   :  { %3491 = vmatprep.subr.mxu1 %v1312_v62  ;;  %3423 = vmatpush2.msra.mxu0 %v1245_v63  ;;  %v2077_v62 = vcombine.low %v2060_v49, %v2074_v50  ;;  %v1350_v63 = vld [vmem:[#allocation5 + $0x24e8] sm:$0xff]  ;;  %v1392_v49 = vld [vmem:[#allocation5 + $0x2638] sm:$0xff]  ;;  %v1325_v50 = vld [vmem:[#allocation5 + $0x2420] sm:$0xff] }
 0x29a   :  { %3492 = vmatpush2.msra.mxu1 %v1311_v0  ;;  %3424 = vmatprep.subr.mxu0 %v1244_v1  ;;  %v1416_v0 = vld [vmem:[#allocation5 + $0x26f8] sm:$0xff]  ;;  %v1349_v1 = vld [vmem:[#allocation5 + $0x24e0] sm:$0xff] }
 0x29b   :  { %3493 = vmatprep.subr.mxu1 %v1310_v2  ;;  %3425 = vmatpush2.msra.mxu0 %v1243_v3  ;;  %v1415_v2 = vld [vmem:[#allocation5 + $0x26f0] sm:$0xff]  ;;  %v1348_v3 = vld [vmem:[#allocation5 + $0x24d8] sm:$0xff] }
 0x29c   :  { %3494 = vmatpush2.msra.mxu1 %v1309_v4  ;;  %3426 = vmatprep.subr.mxu0 %v1242_v5  ;;  %v1414_v4 = vld [vmem:[#allocation5 + $0x26e8] sm:$0xff]  ;;  %v1347_v5 = vld [vmem:[#allocation5 + $0x24d0] sm:$0xff] }
 0x29d   :  { %3495 = vmatprep.subr.mxu1 %v1308_v6  ;;  %3427 = vmatpush2.msra.mxu0 %v1241_v7  ;;  %v1413_v6 = vld [vmem:[#allocation5 + $0x26e0] sm:$0xff]  ;;  %v1346_v7 = vld [vmem:[#allocation5 + $0x24c8] sm:$0xff] }
 0x29e   :  { %3496 = vmatpush2.msra.mxu1 %v1307_v8  ;;  %3428 = vmatprep.subr.mxu0 %v1240_v9  ;;  %v1412_v8 = vld [vmem:[#allocation5 + $0x26d8] sm:$0xff]  ;;  %v1345_v9 = vld [vmem:[#allocation5 + $0x24c0] sm:$0xff] }
 0x29f   :  { %3497 = vmatprep.subr.mxu1 %v1306_v10  ;;  %3429 = vmatpush2.msra.mxu0 %v1239_v11  ;;  %v1411_v10 = vld [vmem:[#allocation5 + $0x26d0] sm:$0xff]  ;;  %v1344_v11 = vld [vmem:[#allocation5 + $0x24b8] sm:$0xff] }
 0x2a0   :  { %3498 = vmatpush2.msra.mxu1 %v1305_v12  ;;  %3430 = vmatprep.subr.mxu0 %v1238_v13  ;;  %v1410_v12 = vld [vmem:[#allocation5 + $0x26c8] sm:$0xff]  ;;  %v1343_v13 = vld [vmem:[#allocation5 + $0x24b0] sm:$0xff] }
 0x2a1   :  { %3499 = vmatprep.subr.mxu1 %v1304_v14  ;;  %3431 = vmatpush2.msra.mxu0 %v1237_v15  ;;  %v1409_v14 = vld [vmem:[#allocation5 + $0x26c0] sm:$0xff]  ;;  %v1342_v15 = vld [vmem:[#allocation5 + $0x24a8] sm:$0xff] }
 0x2a2   :  { %3500 = vmatpush2.msra.mxu1 %v1303_v16  ;;  %3432 = vmatprep.subr.mxu0 %v1236_v17  ;;  %v1408_v16 = vld [vmem:[#allocation5 + $0x26b8] sm:$0xff]  ;;  %v1341_v17 = vld [vmem:[#allocation5 + $0x24a0] sm:$0xff] }
 0x2a3   :  { %3501 = vmatprep.subr.mxu1 %v1302_v22  ;;  %3433 = vmatpush2.msra.mxu0 %v1235_v23  ;;  %v1405_v22 = vld [vmem:[#allocation5 + $0x26a0] sm:$0xff]  ;;  %v1338_v23 = vld [vmem:[#allocation5 + $0x2488] sm:$0xff] }
 0x2a4   :  { %3502 = vmatpush2.msra.mxu1 %v1301_v24  ;;  %3434 = vmatprep.subr.mxu0 %v1234_v25  ;;  %v1404_v24 = vld [vmem:[#allocation5 + $0x2698] sm:$0xff]  ;;  %v1337_v25 = vld [vmem:[#allocation5 + $0x2480] sm:$0xff] }
 0x2a5   :  { %3503 = vmatprep.subr.mxu1 %v1300_v26  ;;  %3435 = vmatpush2.msra.mxu0 %v1233_v27  ;;  %v1403_v26 = vld [vmem:[#allocation5 + $0x2690] sm:$0xff]  ;;  %v1336_v27 = vld [vmem:[#allocation5 + $0x2478] sm:$0xff] }
 0x2a6   :  { %3504 = vmatpush2.msra.mxu1 %v1299_v30  ;;  %3436 = vmatprep.subr.mxu0 %v1232_v31  ;;  %v1401_v30 = vld [vmem:[#allocation5 + $0x2680] sm:$0xff]  ;;  %v1334_v31 = vld [vmem:[#allocation5 + $0x2468] sm:$0xff] }
 0x2a7   :  { %3505 = vmatprep.subr.mxu1 %v1298_v32  ;;  %3437 = vmatpush2.msra.mxu0 %v1231_v33  ;;  %v1400_v32 = vld [vmem:[#allocation5 + $0x2678] sm:$0xff]  ;;  %v1333_v33 = vld [vmem:[#allocation5 + $0x2460] sm:$0xff] }
 0x2a8   :  { %3506 = vmatpush2.msra.mxu1 %v1297_v34  ;;  %3438 = vmatprep.subr.mxu0 %v1230_v35  ;;  %v1399_v34 = vld [vmem:[#allocation5 + $0x2670] sm:$0xff]  ;;  %v1332_v35 = vld [vmem:[#allocation5 + $0x2458] sm:$0xff] }
 0x2a9   :  { %3507 = vmatprep.subr.mxu1 %v1296_v38  ;;  %3439 = vmatpush2.msra.mxu0 %v1229_v39  ;;  %v1397_v38 = vld [vmem:[#allocation5 + $0x2660] sm:$0xff]  ;;  %v1330_v39 = vld [vmem:[#allocation5 + $0x2448] sm:$0xff] }
 0x2aa   :  { %3508 = vmatpush2.msra.mxu1 %v1295_v43  ;;  %3440 = vmatprep.subr.mxu0 %v1228_v44  ;;  %v1395_v43 = vld [vmem:[#allocation5 + $0x2650] sm:$0xff]  ;;  %v1328_v44 = vld [vmem:[#allocation5 + $0x2438] sm:$0xff] }
 0x2ab   :  { %3509 = vmatprep.subr.mxu1 %v1294_v45  ;;  %3441 = vmatpush2.msra.mxu0 %v1227_v46  ;;  %v1394_v45 = vld [vmem:[#allocation5 + $0x2648] sm:$0xff]  ;;  %v1327_v46 = vld [vmem:[#allocation5 + $0x2430] sm:$0xff] }
 0x2ac   :  { %3510 = vmatpush2.msra.mxu1 %v1293_v47  ;;  %3442 = vmatprep.subr.mxu0 %v1226_v48  ;;  %v1393_v47 = vld [vmem:[#allocation5 + $0x2640] sm:$0xff]  ;;  %v1326_v48 = vld [vmem:[#allocation5 + $0x2428] sm:$0xff] }
 0x2ad   :  { %3511 = vmatprep.subr.mxu1 %v1292_v51  ;;  %3443 = vmatpush2.msra.mxu0 %v1225_v52  ;;  %v1391_v51 = vld [vmem:[#allocation5 + $0x2630] sm:$0xff]  ;;  %v1324_v52 = vld [vmem:[#allocation5 + $0x2418] sm:$0xff] }
 0x2ae   :  { %3444 = vmatprep.mubr.f32.mxu0 %v2076_v53  ;;  %3512 = vmatpush2.msra.mxu1 %v1291_v54  ;;  %v1390_v53 = vld [vmem:[#allocation5 + $0x2628] sm:$0xff]  ;;  %v1323_v54 = vld [vmem:[#allocation5 + $0x2410] sm:$0xff] }
 0x2af   :  { %3445 = vmatmul.mubr.f32.vlgmr.msra.gmra.mxu0 %v2075_v56  ;;  %3513 = vmatprep.subr.mxu1 %v1290_v57  ;;  %v1389_v56 = vld [vmem:[#allocation5 + $0x2620] sm:$0xff]  ;;  %v1322_v57 = vld [vmem:[#allocation5 + $0x2408] sm:$0xff] }
 0x2b0   :  { %3522 = vmatprep.subr.mxu0 %v1352_v58  ;;  %3514 = vmatpush2.msra.mxu1 %v1289_v59  ;;  %v1388_v58 = vld [vmem:[#allocation5 + $0x2618] sm:$0xff]  ;;  %v1321_v59 = vld [vmem:[#allocation5 + $0x2400] sm:$0xff] }
 0x2b1   :  { %3515 = vmatprep.mubr.f32.mxu1 %v2078_v60  ;;  %3523 = vmatpush1.msra.mxu0 %v1351_v61  ;;  %v1387_v60 = vld [vmem:[#allocation5 + $0x2610] sm:$0xff]  ;;  %v1384_v61 = vld [vmem:[#allocation5 + $0x25f8] sm:$0xff] }
 0x2b2   :  { %3516 = vmatmul.mubr.f32.vlgmr.msra.gmra.mxu1 %v2077_v62  ;;  %3524 = vmatprep.subr.mxu0 %v1350_v63  ;;  %v1386_v62 = vld [vmem:[#allocation5 + $0x2608] sm:$0xff]  ;;  %v1383_v63 = vld [vmem:[#allocation5 + $0x25f0] sm:$0xff] }
 0x2b3   :  { %3593 = vmatprep.subr.mxu1 %v1416_v0  ;;  %3525 = vmatpush1.msra.mxu0 %v1349_v1  ;;  %v1385_v0 = vld [vmem:[#allocation5 + $0x2600] sm:$0xff]  ;;  %v1382_v1 = vld [vmem:[#allocation5 + $0x25e8] sm:$0xff] }
 0x2b4   :  { %3594 = vmatpush1.msra.mxu1 %v1415_v2  ;;  %3526 = vmatprep.subr.mxu0 %v1348_v3  ;;  %v1448_v2 = vld [vmem:[#allocation5 + $0x27f8] sm:$0xff]  ;;  %v1381_v3 = vld [vmem:[#allocation5 + $0x25e0] sm:$0xff] }
 0x2b5   :  { %3595 = vmatprep.subr.mxu1 %v1414_v4  ;;  %3527 = vmatpush1.msra.mxu0 %v1347_v5  ;;  %v1447_v4 = vld [vmem:[#allocation5 + $0x27f0] sm:$0xff]  ;;  %v1380_v5 = vld [vmem:[#allocation5 + $0x25d8] sm:$0xff] }
 0x2b6   :  { %3596 = vmatpush1.msra.mxu1 %v1413_v6  ;;  %3528 = vmatprep.subr.mxu0 %v1346_v7  ;;  %v1446_v6 = vld [vmem:[#allocation5 + $0x27e8] sm:$0xff]  ;;  %v1379_v7 = vld [vmem:[#allocation5 + $0x25d0] sm:$0xff] }
 0x2b7   :  { %3597 = vmatprep.subr.mxu1 %v1412_v8  ;;  %3529 = vmatpush1.msra.mxu0 %v1345_v9  ;;  %v1445_v8 = vld [vmem:[#allocation5 + $0x27e0] sm:$0xff]  ;;  %v1378_v9 = vld [vmem:[#allocation5 + $0x25c8] sm:$0xff] }
 0x2b8   :  { %3598 = vmatpush1.msra.mxu1 %v1411_v10  ;;  %3530 = vmatprep.subr.mxu0 %v1344_v11  ;;  %v1444_v10 = vld [vmem:[#allocation5 + $0x27d8] sm:$0xff]  ;;  %v1377_v11 = vld [vmem:[#allocation5 + $0x25c0] sm:$0xff] }
 0x2b9   :  { %3599 = vmatprep.subr.mxu1 %v1410_v12  ;;  %3531 = vmatpush1.msra.mxu0 %v1343_v13  ;;  %v1443_v12 = vld [vmem:[#allocation5 + $0x27d0] sm:$0xff]  ;;  %v1376_v13 = vld [vmem:[#allocation5 + $0x25b8] sm:$0xff] }
 0x2ba   :  { %3600 = vmatpush1.msra.mxu1 %v1409_v14  ;;  %3532 = vmatprep.subr.mxu0 %v1342_v15  ;;  %v1442_v14 = vld [vmem:[#allocation5 + $0x27c8] sm:$0xff]  ;;  %v1375_v15 = vld [vmem:[#allocation5 + $0x25b0] sm:$0xff] }
 0x2bb   :  { %3601 = vmatprep.subr.mxu1 %v1408_v16  ;;  %3533 = vmatpush1.msra.mxu0 %v1341_v17  ;;  %v1441_v16 = vld [vmem:[#allocation5 + $0x27c0] sm:$0xff]  ;;  %v1374_v17 = vld [vmem:[#allocation5 + $0x25a8] sm:$0xff] }
 0x2bc   :  { %3602 = vmatpush1.msra.mxu1 %v1407_v18  ;;  %3534 = vmatprep.subr.mxu0 %v1340_v19  ;;  %v1440_v18 = vld [vmem:[#allocation5 + $0x27b8] sm:$0xff]  ;;  %v1373_v19 = vld [vmem:[#allocation5 + $0x25a0] sm:$0xff] }
 0x2bd   :  { %3603 = vmatprep.subr.mxu1 %v1406_v20  ;;  %3535 = vmatpush1.msra.mxu0 %v1339_v21  ;;  %v1439_v20 = vld [vmem:[#allocation5 + $0x27b0] sm:$0xff]  ;;  %v1372_v21 = vld [vmem:[#allocation5 + $0x2598] sm:$0xff] }
 0x2be   :  { %3604 = vmatpush1.msra.mxu1 %v1405_v22  ;;  %3536 = vmatprep.subr.mxu0 %v1338_v23  ;;  %v1438_v22 = vld [vmem:[#allocation5 + $0x27a8] sm:$0xff]  ;;  %v1371_v23 = vld [vmem:[#allocation5 + $0x2590] sm:$0xff] }
 0x2bf   :  { %3605 = vmatprep.subr.mxu1 %v1404_v24  ;;  %3537 = vmatpush1.msra.mxu0 %v1337_v25  ;;  %v1437_v24 = vld [vmem:[#allocation5 + $0x27a0] sm:$0xff]  ;;  %v1370_v25 = vld [vmem:[#allocation5 + $0x2588] sm:$0xff] }
 0x2c0   :  { %3606 = vmatpush1.msra.mxu1 %v1403_v26  ;;  %3538 = vmatprep.subr.mxu0 %v1336_v27  ;;  %v1436_v26 = vld [vmem:[#allocation5 + $0x2798] sm:$0xff]  ;;  %v1369_v27 = vld [vmem:[#allocation5 + $0x2580] sm:$0xff] }
 0x2c1   :  { %3607 = vmatprep.subr.mxu1 %v1402_v28  ;;  %3539 = vmatpush1.msra.mxu0 %v1335_v29  ;;  %v1435_v28 = vld [vmem:[#allocation5 + $0x2790] sm:$0xff]  ;;  %v1368_v29 = vld [vmem:[#allocation5 + $0x2578] sm:$0xff] }
 0x2c2   :  { %3608 = vmatpush1.msra.mxu1 %v1401_v30  ;;  %3540 = vmatprep.subr.mxu0 %v1334_v31  ;;  %v1434_v30 = vld [vmem:[#allocation5 + $0x2788] sm:$0xff]  ;;  %v1367_v31 = vld [vmem:[#allocation5 + $0x2570] sm:$0xff] }
 0x2c3   :  { %3609 = vmatprep.subr.mxu1 %v1400_v32  ;;  %3541 = vmatpush1.msra.mxu0 %v1333_v33  ;;  %v1433_v32 = vld [vmem:[#allocation5 + $0x2780] sm:$0xff]  ;;  %v1366_v33 = vld [vmem:[#allocation5 + $0x2568] sm:$0xff] }
 0x2c4   :  { %3610 = vmatpush1.msra.mxu1 %v1399_v34  ;;  %3542 = vmatprep.subr.mxu0 %v1332_v35  ;;  %v1432_v34 = vld [vmem:[#allocation5 + $0x2778] sm:$0xff]  ;;  %v1365_v35 = vld [vmem:[#allocation5 + $0x2560] sm:$0xff] }
 0x2c5   :  { %3611 = vmatprep.subr.mxu1 %v1398_v36  ;;  %3543 = vmatpush1.msra.mxu0 %v1331_v37  ;;  %v1431_v36 = vld [vmem:[#allocation5 + $0x2770] sm:$0xff]  ;;  %v1364_v37 = vld [vmem:[#allocation5 + $0x2558] sm:$0xff] }
 0x2c6   :  { %3612 = vmatpush1.msra.mxu1 %v1397_v38  ;;  %3544 = vmatprep.subr.mxu0 %v1330_v39  ;;  %v130_v38 = vld [vmem:[#allocation3 + $0x48] sm:$0xff] }
 0x2c7   :  { %3613 = vmatprep.subr.mxu1 %v1396_v40  ;;  %3545 = vmatpush1.msra.mxu0 %v1329_v41  ;;  %v142_v39 = vld [vmem:[#allocation3 + $0xa8] sm:$0xff] }
 0x2c8   :  { %3614 = vmatpush1.msra.mxu1 %v1395_v43  ;;  %3546 = vmatprep.subr.mxu0 %v1328_v44  ;;  %v154_v40 = vld [vmem:[#allocation3 + $0x108] sm:$0xff]  ;;  %v1363_v44 = vld [vmem:[#allocation5 + $0x2550] sm:$0xff] }
 0x2c9   :  { %3615 = vmatprep.subr.mxu1 %v1394_v45  ;;  %3547 = vmatpush1.msra.mxu0 %v1327_v46  ;;  %v166_v41 = vld [vmem:[#allocation3 + $0x168] sm:$0xff]  ;;  %v1429_v45 = vld [vmem:[#allocation5 + $0x2760] sm:$0xff] }
 0x2ca   :  { %3616 = vmatpush1.msra.mxu1 %v1393_v47  ;;  %3548 = vmatprep.subr.mxu0 %v1326_v48  ;;  %v1430_v43 = vld [vmem:[#allocation5 + $0x2768] sm:$0xff]  ;;  %v1428_v47 = vld [vmem:[#allocation5 + $0x2758] sm:$0xff]  ;;  %v1361_v48 = vld [vmem:[#allocation5 + $0x2540] sm:$0xff] }
 0x2cb   :  { %3617 = vmatprep.subr.mxu1 %v1392_v49  ;;  %3549 = vmatpush1.msra.mxu0 %v1325_v50  ;;  %v1362_v46 = vld [vmem:[#allocation5 + $0x2548] sm:$0xff]  ;;  %v2079_v49 = vcombine.low %v130_v38, %v142_v39  ;;  %v2081_v50 = vcombine.low %v154_v40, %v166_v41 }
 0x2cc   :  { %3618 = vmatpush1.msra.mxu1 %v1391_v51  ;;  %3550 = vmatprep.subr.mxu0 %v1324_v52  ;;  %v1427_v51 = vld [vmem:[#allocation5 + $0x2750] sm:$0xff]  ;;  %v1360_v52 = vld [vmem:[#allocation5 + $0x2538] sm:$0xff] }
 0x2cd   :  { %3619 = vmatprep.subr.mxu1 %v1390_v53  ;;  %3551 = vmatpush1.msra.mxu0 %v1323_v54  ;;  %v1426_v53 = vld [vmem:[#allocation5 + $0x2748] sm:$0xff]  ;;  %v1359_v54 = vld [vmem:[#allocation5 + $0x2530] sm:$0xff] }
 0x2ce   :  { %3620 = vmatpush1.msra.mxu1 %v1389_v56  ;;  %3552 = vmatprep.subr.mxu0 %v1322_v57  ;;  %v1425_v56 = vld [vmem:[#allocation5 + $0x2740] sm:$0xff]  ;;  %v1358_v57 = vld [vmem:[#allocation5 + $0x2528] sm:$0xff] }
 0x2cf   :  { %3621 = vmatprep.subr.mxu1 %v1388_v58  ;;  %3553 = vmatpush1.msra.mxu0 %v1321_v59  ;;  %v2080_v58 = vcombine.high %v130_v38, %v142_v39  ;;  %v2082_v59 = vcombine.high %v154_v40, %v166_v41  ;;  %v1535_v38 = vld [vmem:[#allocation5 + $0x2ab0] sm:$0xff]  ;;  %v1468_v39 = vld [vmem:[#allocation5 + $0x2898] sm:$0xff]  ;;  %v1534_v40 = vld [vmem:[#allocation5 + $0x2aa8] sm:$0xff] }
 0x2d0   :  { %3622 = vmatpush1.msra.mxu1 %v1387_v60  ;;  %3554 = vmatprep.subr.mxu0 %v1384_v61  ;;  %v1424_v60 = vld [vmem:[#allocation5 + $0x2738] sm:$0xff]  ;;  %v1357_v61 = vld [vmem:[#allocation5 + $0x2520] sm:$0xff]  ;;  %v1467_v41 = vld [vmem:[#allocation5 + $0x2890] sm:$0xff] }
 0x2d1   :  { %3623 = vmatprep.subr.mxu1 %v1386_v62  ;;  %3555 = vmatpush2.msra.mxu0 %v1383_v63  ;;  %v2089_v62 = vrot.slane %v2079_v49, %v4572_v55  ;;  %v2103_v63 = vrot.slane %v2081_v50, %v4572_v55  ;;  %v1530_v49 = vld [vmem:[#allocation5 + $0x2a88] sm:$0xff]  ;;  %v1463_v50 = vld [vmem:[#allocation5 + $0x2870] sm:$0xff] }
 0x2d2   :  { %3624 = vmatpush1.msra.mxu1 %v1385_v0  ;;  %3556 = vmatprep.subr.mxu0 %v1382_v1  ;;  %v1423_v0 = vld [vmem:[#allocation5 + $0x2730] sm:$0xff]  ;;  %v1356_v1 = vld [vmem:[#allocation5 + $0x2518] sm:$0xff] }
 0x2d3   :  { %3625 = vmatprep.subr.mxu1 %v1448_v2  ;;  %3557 = vmatpush2.msra.mxu0 %v1381_v3  ;;  %v1422_v2 = vld [vmem:[#allocation5 + $0x2728] sm:$0xff]  ;;  %v1355_v3 = vld [vmem:[#allocation5 + $0x2510] sm:$0xff] }
 0x2d4   :  { %3626 = vmatpush2.msra.mxu1 %v1447_v4  ;;  %3558 = vmatprep.subr.mxu0 %v1380_v5  ;;  %v1421_v4 = vld [vmem:[#allocation5 + $0x2720] sm:$0xff]  ;;  %v1354_v5 = vld [vmem:[#allocation5 + $0x2508] sm:$0xff] }
 0x2d5   :  { %3627 = vmatprep.subr.mxu1 %v1446_v6  ;;  %3559 = vmatpush2.msra.mxu0 %v1379_v7  ;;  %v2096_v6 = vrot.slane %v2080_v58, %v4572_v55  ;;  %v2110_v7 = vrot.slane %v2082_v59, %v4572_v55  ;;  %v1526_v58 = vld [vmem:[#allocation5 + $0x2a68] sm:$0xff]  ;;  %v1459_v59 = vld [vmem:[#allocation5 + $0x2850] sm:$0xff] }
 0x2d6   :  { %3628 = vmatpush2.msra.mxu1 %v1445_v8  ;;  %3560 = vmatprep.subr.mxu0 %v1378_v9  ;;  %v1420_v8 = vld [vmem:[#allocation5 + $0x2718] sm:$0xff]  ;;  %v1353_v9 = vld [vmem:[#allocation5 + $0x2500] sm:$0xff] }
 0x2d7   :  { %3629 = vmatprep.subr.mxu1 %v1444_v10  ;;  %3561 = vmatpush2.msra.mxu0 %v1377_v11  ;;  %v2112_v10 = vcombine.high %v2089_v62, %v2103_v63  ;;  %v1419_v11 = vld [vmem:[#allocation5 + $0x2710] sm:$0xff] }
 0x2d8   :  { %3630 = vmatpush2.msra.mxu1 %v1443_v12  ;;  %3562 = vmatprep.subr.mxu0 %v1376_v13  ;;  %v2111_v12 = vcombine.low %v2089_v62, %v2103_v63  ;;  %v1418_v13 = vld [vmem:[#allocation5 + $0x2708] sm:$0xff]  ;;  %v1524_v62 = vld [vmem:[#allocation5 + $0x2a58] sm:$0xff]  ;;  %v1457_v63 = vld [vmem:[#allocation5 + $0x2840] sm:$0xff] }
 0x2d9   :  { %3631 = vmatprep.subr.mxu1 %v1442_v14  ;;  %3563 = vmatpush2.msra.mxu0 %v1375_v15  ;;  %v1480_v14 = vld [vmem:[#allocation5 + $0x28f8] sm:$0xff]  ;;  %v1417_v15 = vld [vmem:[#allocation5 + $0x2700] sm:$0xff] }
 0x2da   :  { %3632 = vmatpush2.msra.mxu1 %v1441_v16  ;;  %3564 = vmatprep.subr.mxu0 %v1374_v17  ;;  %v2114_v16 = vcombine.high %v2096_v6, %v2110_v7  ;;  %v1479_v17 = vld [vmem:[#allocation5 + $0x28f0] sm:$0xff] }
 0x2db   :  { %3633 = vmatprep.subr.mxu1 %v1440_v18  ;;  %3565 = vmatpush2.msra.mxu0 %v1373_v19  ;;  %v2113_v18 = vcombine.low %v2096_v6, %v2110_v7  ;;  %v1478_v19 = vld [vmem:[#allocation5 + $0x28e8] sm:$0xff]  ;;  %v1520_v6 = vld [vmem:[#allocation5 + $0x2a38] sm:$0xff]  ;;  %v1453_v7 = vld [vmem:[#allocation5 + $0x2820] sm:$0xff] }
 0x2dc   :  { %3634 = vmatpush2.msra.mxu1 %v1439_v20  ;;  %3566 = vmatprep.subr.mxu0 %v1372_v21  ;;  %v1544_v20 = vld [vmem:[#allocation5 + $0x2af8] sm:$0xff]  ;;  %v1477_v21 = vld [vmem:[#allocation5 + $0x28e0] sm:$0xff] }
 0x2dd   :  { %3635 = vmatprep.subr.mxu1 %v1438_v22  ;;  %3567 = vmatpush2.msra.mxu0 %v1371_v23  ;;  %v1543_v22 = vld [vmem:[#allocation5 + $0x2af0] sm:$0xff]  ;;  %v1476_v23 = vld [vmem:[#allocation5 + $0x28d8] sm:$0xff] }
 0x2de   :  { %3636 = vmatpush2.msra.mxu1 %v1437_v24  ;;  %3568 = vmatprep.subr.mxu0 %v1370_v25  ;;  %v1542_v24 = vld [vmem:[#allocation5 + $0x2ae8] sm:$0xff]  ;;  %v1475_v25 = vld [vmem:[#allocation5 + $0x28d0] sm:$0xff] }
 0x2df   :  { %3637 = vmatprep.subr.mxu1 %v1436_v26  ;;  %3569 = vmatpush2.msra.mxu0 %v1369_v27  ;;  %v1541_v26 = vld [vmem:[#allocation5 + $0x2ae0] sm:$0xff]  ;;  %v1474_v27 = vld [vmem:[#allocation5 + $0x28c8] sm:$0xff] }
 0x2e0   :  { %3638 = vmatpush2.msra.mxu1 %v1435_v28  ;;  %3570 = vmatprep.subr.mxu0 %v1368_v29  ;;  %v1540_v28 = vld [vmem:[#allocation5 + $0x2ad8] sm:$0xff]  ;;  %v1473_v29 = vld [vmem:[#allocation5 + $0x28c0] sm:$0xff] }
 0x2e1   :  { %3639 = vmatprep.subr.mxu1 %v1434_v30  ;;  %3571 = vmatpush2.msra.mxu0 %v1367_v31  ;;  %v1539_v30 = vld [vmem:[#allocation5 + $0x2ad0] sm:$0xff]  ;;  %v1472_v31 = vld [vmem:[#allocation5 + $0x28b8] sm:$0xff] }
 0x2e2   :  { %3640 = vmatpush2.msra.mxu1 %v1433_v32  ;;  %3572 = vmatprep.subr.mxu0 %v1366_v33  ;;  %v1538_v32 = vld [vmem:[#allocation5 + $0x2ac8] sm:$0xff]  ;;  %v1471_v33 = vld [vmem:[#allocation5 + $0x28b0] sm:$0xff] }
 0x2e3   :  { %3641 = vmatprep.subr.mxu1 %v1432_v34  ;;  %3573 = vmatpush2.msra.mxu0 %v1365_v35  ;;  %v1537_v34 = vld [vmem:[#allocation5 + $0x2ac0] sm:$0xff]  ;;  %v1470_v35 = vld [vmem:[#allocation5 + $0x28a8] sm:$0xff] }
 0x2e4   :  { %3642 = vmatpush2.msra.mxu1 %v1431_v36  ;;  %3574 = vmatprep.subr.mxu0 %v1364_v37  ;;  %v1536_v36 = vld [vmem:[#allocation5 + $0x2ab8] sm:$0xff]  ;;  %v1469_v37 = vld [vmem:[#allocation5 + $0x28a0] sm:$0xff] }
 0x2e5   :  { %3643 = vmatprep.subr.mxu1 %v1430_v43  ;;  %3575 = vmatpush2.msra.mxu0 %v1363_v44  ;;  %v1533_v43 = vld [vmem:[#allocation5 + $0x2aa0] sm:$0xff]  ;;  %v1466_v44 = vld [vmem:[#allocation5 + $0x2888] sm:$0xff] }
 0x2e6   :  { %3644 = vmatpush2.msra.mxu1 %v1429_v45  ;;  %3576 = vmatprep.subr.mxu0 %v1362_v46  ;;  %v1532_v45 = vld [vmem:[#allocation5 + $0x2a98] sm:$0xff]  ;;  %v1465_v46 = vld [vmem:[#allocation5 + $0x2880] sm:$0xff] }
 0x2e7   :  { %3645 = vmatprep.subr.mxu1 %v1428_v47  ;;  %3577 = vmatpush2.msra.mxu0 %v1361_v48  ;;  %v1531_v47 = vld [vmem:[#allocation5 + $0x2a90] sm:$0xff]  ;;  %v1464_v48 = vld [vmem:[#allocation5 + $0x2878] sm:$0xff] }
 0x2e8   :  { %3646 = vmatpush2.msra.mxu1 %v1427_v51  ;;  %3578 = vmatprep.subr.mxu0 %v1360_v52  ;;  %v1529_v51 = vld [vmem:[#allocation5 + $0x2a80] sm:$0xff]  ;;  %v1462_v52 = vld [vmem:[#allocation5 + $0x2868] sm:$0xff] }
 0x2e9   :  { %3647 = vmatprep.subr.mxu1 %v1426_v53  ;;  %3579 = vmatpush2.msra.mxu0 %v1359_v54  ;;  %v1528_v53 = vld [vmem:[#allocation5 + $0x2a78] sm:$0xff]  ;;  %v1461_v54 = vld [vmem:[#allocation5 + $0x2860] sm:$0xff] }
 0x2ea   :  { %3648 = vmatpush2.msra.mxu1 %v1425_v56  ;;  %3580 = vmatprep.subr.mxu0 %v1358_v57  ;;  %v1527_v56 = vld [vmem:[#allocation5 + $0x2a70] sm:$0xff]  ;;  %v1460_v57 = vld [vmem:[#allocation5 + $0x2858] sm:$0xff] }
 0x2eb   :  { %3649 = vmatprep.subr.mxu1 %v1424_v60  ;;  %3581 = vmatpush2.msra.mxu0 %v1357_v61  ;;  %v1525_v60 = vld [vmem:[#allocation5 + $0x2a60] sm:$0xff]  ;;  %v1458_v61 = vld [vmem:[#allocation5 + $0x2848] sm:$0xff] }
 0x2ec   :  { %3650 = vmatpush2.msra.mxu1 %v1423_v0  ;;  %3582 = vmatprep.subr.mxu0 %v1356_v1  ;;  %v1523_v0 = vld [vmem:[#allocation5 + $0x2a50] sm:$0xff]  ;;  %v1456_v1 = vld [vmem:[#allocation5 + $0x2838] sm:$0xff] }
 0x2ed   :  { %3651 = vmatprep.subr.mxu1 %v1422_v2  ;;  %3583 = vmatpush2.msra.mxu0 %v1355_v3  ;;  %v1522_v2 = vld [vmem:[#allocation5 + $0x2a48] sm:$0xff]  ;;  %v1455_v3 = vld [vmem:[#allocation5 + $0x2830] sm:$0xff] }
 0x2ee   :  { %3652 = vmatpush2.msra.mxu1 %v1421_v4  ;;  %3584 = vmatprep.subr.mxu0 %v1354_v5  ;;  %v1521_v4 = vld [vmem:[#allocation5 + $0x2a40] sm:$0xff]  ;;  %v1454_v5 = vld [vmem:[#allocation5 + $0x2828] sm:$0xff] }
 0x2ef   :  { %3653 = vmatprep.subr.mxu1 %v1420_v8  ;;  %3585 = vmatpush2.msra.mxu0 %v1353_v9  ;;  %v1519_v8 = vld [vmem:[#allocation5 + $0x2a30] sm:$0xff]  ;;  %v1452_v9 = vld [vmem:[#allocation5 + $0x2818] sm:$0xff] }
 0x2f0   :  { %3586 = vmatprep.mubr.f32.mxu0 %v2112_v10  ;;  %3654 = vmatpush2.msra.mxu1 %v1419_v11  ;;  %v1518_v10 = vld [vmem:[#allocation5 + $0x2a28] sm:$0xff]  ;;  %v1451_v11 = vld [vmem:[#allocation5 + $0x2810] sm:$0xff] }
 0x2f1   :  { %3587 = vmatmul.mubr.f32.vlgmr.msra.gmra.mxu0 %v2111_v12  ;;  %3655 = vmatprep.subr.mxu1 %v1418_v13  ;;  %v1517_v12 = vld [vmem:[#allocation5 + $0x2a20] sm:$0xff]  ;;  %v1450_v13 = vld [vmem:[#allocation5 + $0x2808] sm:$0xff] }
 0x2f2   :  { %3664 = vmatprep.subr.mxu0 %v1480_v14  ;;  %3656 = vmatpush2.msra.mxu1 %v1417_v15  ;;  %v1516_v14 = vld [vmem:[#allocation5 + $0x2a18] sm:$0xff]  ;;  %v1449_v15 = vld [vmem:[#allocation5 + $0x2800] sm:$0xff] }
 0x2f3   :  { %3657 = vmatprep.mubr.f32.mxu1 %v2114_v16  ;;  %3665 = vmatpush1.msra.mxu0 %v1479_v17  ;;  %v1515_v16 = vld [vmem:[#allocation5 + $0x2a10] sm:$0xff]  ;;  %v1512_v17 = vld [vmem:[#allocation5 + $0x29f8] sm:$0xff] }
 0x2f4   :  { %3658 = vmatmul.mubr.f32.vlgmr.msra.gmra.mxu1 %v2113_v18  ;;  %3666 = vmatprep.subr.mxu0 %v1478_v19  ;;  %v1514_v18 = vld [vmem:[#allocation5 + $0x2a08] sm:$0xff]  ;;  %v1511_v19 = vld [vmem:[#allocation5 + $0x29f0] sm:$0xff] }
 0x2f5   :  { %3735 = vmatprep.subr.mxu1 %v1544_v20  ;;  %3667 = vmatpush1.msra.mxu0 %v1477_v21  ;;  %v1513_v20 = vld [vmem:[#allocation5 + $0x2a00] sm:$0xff]  ;;  %v1510_v21 = vld [vmem:[#allocation5 + $0x29e8] sm:$0xff] }
 0x2f6   :  { %3736 = vmatpush1.msra.mxu1 %v1543_v22  ;;  %3668 = vmatprep.subr.mxu0 %v1476_v23  ;;  %v1576_v22 = vld [vmem:[#allocation5 + $0x2bf8] sm:$0xff]  ;;  %v1509_v23 = vld [vmem:[#allocation5 + $0x29e0] sm:$0xff] }
 0x2f7   :  { %3737 = vmatprep.subr.mxu1 %v1542_v24  ;;  %3669 = vmatpush1.msra.mxu0 %v1475_v25  ;;  %v1575_v24 = vld [vmem:[#allocation5 + $0x2bf0] sm:$0xff]  ;;  %v1508_v25 = vld [vmem:[#allocation5 + $0x29d8] sm:$0xff] }
 0x2f8   :  { %3738 = vmatpush1.msra.mxu1 %v1541_v26  ;;  %3670 = vmatprep.subr.mxu0 %v1474_v27  ;;  %v1574_v26 = vld [vmem:[#allocation5 + $0x2be8] sm:$0xff]  ;;  %v1507_v27 = vld [vmem:[#allocation5 + $0x29d0] sm:$0xff] }
 0x2f9   :  { %3739 = vmatprep.subr.mxu1 %v1540_v28  ;;  %3671 = vmatpush1.msra.mxu0 %v1473_v29  ;;  %v1573_v28 = vld [vmem:[#allocation5 + $0x2be0] sm:$0xff]  ;;  %v1506_v29 = vld [vmem:[#allocation5 + $0x29c8] sm:$0xff] }
 0x2fa   :  { %3740 = vmatpush1.msra.mxu1 %v1539_v30  ;;  %3672 = vmatprep.subr.mxu0 %v1472_v31  ;;  %v1572_v30 = vld [vmem:[#allocation5 + $0x2bd8] sm:$0xff]  ;;  %v1505_v31 = vld [vmem:[#allocation5 + $0x29c0] sm:$0xff] }
 0x2fb   :  { %3741 = vmatprep.subr.mxu1 %v1538_v32  ;;  %3673 = vmatpush1.msra.mxu0 %v1471_v33  ;;  %v1571_v32 = vld [vmem:[#allocation5 + $0x2bd0] sm:$0xff]  ;;  %v1504_v33 = vld [vmem:[#allocation5 + $0x29b8] sm:$0xff] }
 0x2fc   :  { %3742 = vmatpush1.msra.mxu1 %v1537_v34  ;;  %3674 = vmatprep.subr.mxu0 %v1470_v35  ;;  %v1570_v34 = vld [vmem:[#allocation5 + $0x2bc8] sm:$0xff]  ;;  %v1503_v35 = vld [vmem:[#allocation5 + $0x29b0] sm:$0xff] }
 0x2fd   :  { %3743 = vmatprep.subr.mxu1 %v1536_v36  ;;  %3675 = vmatpush1.msra.mxu0 %v1469_v37  ;;  %v1569_v36 = vld [vmem:[#allocation5 + $0x2bc0] sm:$0xff]  ;;  %v1502_v37 = vld [vmem:[#allocation5 + $0x29a8] sm:$0xff] }
 0x2fe   :  { %3744 = vmatpush1.msra.mxu1 %v1535_v38  ;;  %3676 = vmatprep.subr.mxu0 %v1468_v39  ;;  %v1568_v38 = vld [vmem:[#allocation5 + $0x2bb8] sm:$0xff]  ;;  %v1501_v39 = vld [vmem:[#allocation5 + $0x29a0] sm:$0xff] }
 0x2ff   :  { %3745 = vmatprep.subr.mxu1 %v1534_v40  ;;  %3677 = vmatpush1.msra.mxu0 %v1467_v41  ;;  %v1567_v40 = vld [vmem:[#allocation5 + $0x2bb0] sm:$0xff]  ;;  %v1500_v41 = vld [vmem:[#allocation5 + $0x2998] sm:$0xff] }
 0x300   :  { %3746 = vmatpush1.msra.mxu1 %v1533_v43  ;;  %3678 = vmatprep.subr.mxu0 %v1466_v44  ;;  %v1566_v43 = vld [vmem:[#allocation5 + $0x2ba8] sm:$0xff]  ;;  %v1499_v44 = vld [vmem:[#allocation5 + $0x2990] sm:$0xff] }
 0x301   :  { %3747 = vmatprep.subr.mxu1 %v1532_v45  ;;  %3679 = vmatpush1.msra.mxu0 %v1465_v46  ;;  %v1565_v45 = vld [vmem:[#allocation5 + $0x2ba0] sm:$0xff]  ;;  %v1498_v46 = vld [vmem:[#allocation5 + $0x2988] sm:$0xff] }
 0x302   :  { %3748 = vmatpush1.msra.mxu1 %v1531_v47  ;;  %3680 = vmatprep.subr.mxu0 %v1464_v48  ;;  %v1564_v47 = vld [vmem:[#allocation5 + $0x2b98] sm:$0xff]  ;;  %v1497_v48 = vld [vmem:[#allocation5 + $0x2980] sm:$0xff] }
 0x303   :  { %3749 = vmatprep.subr.mxu1 %v1530_v49  ;;  %3681 = vmatpush1.msra.mxu0 %v1463_v50  ;;  %v1563_v49 = vld [vmem:[#allocation5 + $0x2b90] sm:$0xff]  ;;  %v1496_v50 = vld [vmem:[#allocation5 + $0x2978] sm:$0xff] }
 0x304   :  { %3750 = vmatpush1.msra.mxu1 %v1529_v51  ;;  %3682 = vmatprep.subr.mxu0 %v1462_v52  ;;  %v1562_v51 = vld [vmem:[#allocation5 + $0x2b88] sm:$0xff]  ;;  %v1495_v52 = vld [vmem:[#allocation5 + $0x2970] sm:$0xff] }
 0x305   :  { %3751 = vmatprep.subr.mxu1 %v1528_v53  ;;  %3683 = vmatpush1.msra.mxu0 %v1461_v54  ;;  %v1561_v53 = vld [vmem:[#allocation5 + $0x2b80] sm:$0xff]  ;;  %v1494_v54 = vld [vmem:[#allocation5 + $0x2968] sm:$0xff] }
 0x306   :  { %3752 = vmatpush1.msra.mxu1 %v1527_v56  ;;  %3684 = vmatprep.subr.mxu0 %v1460_v57  ;;  %v1560_v56 = vld [vmem:[#allocation5 + $0x2b78] sm:$0xff]  ;;  %v1493_v57 = vld [vmem:[#allocation5 + $0x2960] sm:$0xff] }
 0x307   :  { %3753 = vmatprep.subr.mxu1 %v1526_v58  ;;  %3685 = vmatpush1.msra.mxu0 %v1459_v59  ;;  %v1559_v58 = vld [vmem:[#allocation5 + $0x2b70] sm:$0xff]  ;;  %v1492_v59 = vld [vmem:[#allocation5 + $0x2958] sm:$0xff] }
 0x308   :  { %3754 = vmatpush1.msra.mxu1 %v1525_v60  ;;  %3686 = vmatprep.subr.mxu0 %v1458_v61  ;;  %v131_v60 = vld [vmem:[#allocation3 + $0x50] sm:$0xff] }
 0x309   :  { %3755 = vmatprep.subr.mxu1 %v1524_v62  ;;  %3687 = vmatpush1.msra.mxu0 %v1457_v63  ;;  %v143_v61 = vld [vmem:[#allocation3 + $0xb0] sm:$0xff] }
 0x30a   :  { %3756 = vmatpush1.msra.mxu1 %v1523_v0  ;;  %3688 = vmatprep.subr.mxu0 %v1456_v1  ;;  %v155_v62 = vld [vmem:[#allocation3 + $0x110] sm:$0xff]  ;;  %v1558_v0 = vld [vmem:[#allocation5 + $0x2b68] sm:$0xff] }
 0x30b   :  { %3757 = vmatprep.subr.mxu1 %v1522_v2  ;;  %3689 = vmatpush1.msra.mxu0 %v1455_v3  ;;  %v167_v63 = vld [vmem:[#allocation3 + $0x170] sm:$0xff]  ;;  %v1557_v2 = vld [vmem:[#allocation5 + $0x2b60] sm:$0xff]  ;;  %v1490_v3 = vld [vmem:[#allocation5 + $0x2948] sm:$0xff] }
 0x30c   :  { %3758 = vmatpush1.msra.mxu1 %v1521_v4  ;;  %3690 = vmatprep.subr.mxu0 %v1454_v5  ;;  %v1491_v1 = vld [vmem:[#allocation5 + $0x2950] sm:$0xff]  ;;  %v1556_v4 = vld [vmem:[#allocation5 + $0x2b58] sm:$0xff]  ;;  %v1489_v5 = vld [vmem:[#allocation5 + $0x2940] sm:$0xff] }
 0x30d   :  { %3759 = vmatprep.subr.mxu1 %v1520_v6  ;;  %3691 = vmatpush1.msra.mxu0 %v1453_v7  ;;  %v2115_v6 = vcombine.low %v131_v60, %v143_v61  ;;  %v2117_v7 = vcombine.low %v155_v62, %v167_v63 }
 0x30e   :  { %3760 = vmatpush1.msra.mxu1 %v1519_v8  ;;  %3692 = vmatprep.subr.mxu0 %v1452_v9  ;;  %v1555_v8 = vld [vmem:[#allocation5 + $0x2b50] sm:$0xff]  ;;  %v1488_v9 = vld [vmem:[#allocation5 + $0x2938] sm:$0xff] }
 0x30f   :  { %3761 = vmatprep.subr.mxu1 %v1518_v10  ;;  %3693 = vmatpush1.msra.mxu0 %v1451_v11  ;;  %v1554_v10 = vld [vmem:[#allocation5 + $0x2b48] sm:$0xff]  ;;  %v1487_v11 = vld [vmem:[#allocation5 + $0x2930] sm:$0xff] }
 0x310   :  { %3762 = vmatpush1.msra.mxu1 %v1517_v12  ;;  %3694 = vmatprep.subr.mxu0 %v1450_v13  ;;  %v1553_v12 = vld [vmem:[#allocation5 + $0x2b40] sm:$0xff]  ;;  %v1486_v13 = vld [vmem:[#allocation5 + $0x2928] sm:$0xff] }
 0x311   :  { %3763 = vmatprep.subr.mxu1 %v1516_v14  ;;  %3695 = vmatpush1.msra.mxu0 %v1449_v15  ;;  %v2116_v14 = vcombine.high %v131_v60, %v143_v61  ;;  %v2118_v15 = vcombine.high %v155_v62, %v167_v63  ;;  %v1596_v60 = vld [vmem:[#allocation5 + $0x2c98] sm:$0xff]  ;;  %v1663_v61 = vld [vmem:[#allocation5 + $0x2eb0] sm:$0xff]  ;;  %v1662_v63 = vld [vmem:[#allocation5 + $0x2ea8] sm:$0xff] }
 0x312   :  { %3764 = vmatpush1.msra.mxu1 %v1515_v16  ;;  %3696 = vmatprep.subr.mxu0 %v1512_v17  ;;  %v1552_v16 = vld [vmem:[#allocation5 + $0x2b38] sm:$0xff]  ;;  %v1485_v17 = vld [vmem:[#allocation5 + $0x2920] sm:$0xff]  ;;  %v1595_v62 = vld [vmem:[#allocation5 + $0x2c90] sm:$0xff] }
 0x313   :  { %3765 = vmatprep.subr.mxu1 %v1514_v18  ;;  %3697 = vmatpush2.msra.mxu0 %v1511_v19  ;;  %v2125_v18 = vrot.slane %v2115_v6, %v4572_v55  ;;  %v2139_v19 = vrot.slane %v2117_v7, %v4572_v55  ;;  %v1591_v6 = vld [vmem:[#allocation5 + $0x2c70] sm:$0xff]  ;;  %v1658_v7 = vld [vmem:[#allocation5 + $0x2e88] sm:$0xff] }
 0x314   :  { %3766 = vmatpush1.msra.mxu1 %v1513_v20  ;;  %3698 = vmatprep.subr.mxu0 %v1510_v21  ;;  %v1551_v20 = vld [vmem:[#allocation5 + $0x2b30] sm:$0xff]  ;;  %v1484_v21 = vld [vmem:[#allocation5 + $0x2918] sm:$0xff] }
 0x315   :  { %3767 = vmatprep.subr.mxu1 %v1576_v22  ;;  %3699 = vmatpush2.msra.mxu0 %v1509_v23  ;;  %v1550_v22 = vld [vmem:[#allocation5 + $0x2b28] sm:$0xff]  ;;  %v1483_v23 = vld [vmem:[#allocation5 + $0x2910] sm:$0xff] }
 0x316   :  { %3768 = vmatpush2.msra.mxu1 %v1575_v24  ;;  %3700 = vmatprep.subr.mxu0 %v1508_v25  ;;  %v1549_v24 = vld [vmem:[#allocation5 + $0x2b20] sm:$0xff]  ;;  %v1482_v25 = vld [vmem:[#allocation5 + $0x2908] sm:$0xff] }
 0x317   :  { %3769 = vmatprep.subr.mxu1 %v1574_v26  ;;  %3701 = vmatpush2.msra.mxu0 %v1507_v27  ;;  %v2132_v26 = vrot.slane %v2116_v14, %v4572_v55  ;;  %v2146_v27 = vrot.slane %v2118_v15, %v4572_v55  ;;  %v1587_v14 = vld [vmem:[#allocation5 + $0x2c50] sm:$0xff]  ;;  %v1654_v15 = vld [vmem:[#allocation5 + $0x2e68] sm:$0xff] }
 0x318   :  { %3770 = vmatpush2.msra.mxu1 %v1573_v28  ;;  %3702 = vmatprep.subr.mxu0 %v1506_v29  ;;  %v1548_v28 = vld [vmem:[#allocation5 + $0x2b18] sm:$0xff]  ;;  %v1481_v29 = vld [vmem:[#allocation5 + $0x2900] sm:$0xff] }
 0x319   :  { %3771 = vmatprep.subr.mxu1 %v1572_v30  ;;  %3703 = vmatpush2.msra.mxu0 %v1505_v31  ;;  %v2148_v30 = vcombine.high %v2125_v18, %v2139_v19  ;;  %v1547_v31 = vld [vmem:[#allocation5 + $0x2b10] sm:$0xff] }
 0x31a   :  { %3772 = vmatpush2.msra.mxu1 %v1571_v32  ;;  %3704 = vmatprep.subr.mxu0 %v1504_v33  ;;  %v2147_v32 = vcombine.low %v2125_v18, %v2139_v19  ;;  %v1546_v33 = vld [vmem:[#allocation5 + $0x2b08] sm:$0xff]  ;;  %v1585_v18 = vld [vmem:[#allocation5 + $0x2c40] sm:$0xff]  ;;  %v1652_v19 = vld [vmem:[#allocation5 + $0x2e58] sm:$0xff] }
 0x31b   :  { %3773 = vmatprep.subr.mxu1 %v1570_v34  ;;  %3705 = vmatpush2.msra.mxu0 %v1503_v35  ;;  %v1608_v34 = vld [vmem:[#allocation5 + $0x2cf8] sm:$0xff]  ;;  %v1545_v35 = vld [vmem:[#allocation5 + $0x2b00] sm:$0xff] }
 0x31c   :  { %3774 = vmatpush2.msra.mxu1 %v1569_v36  ;;  %3706 = vmatprep.subr.mxu0 %v1502_v37  ;;  %v2150_v36 = vcombine.high %v2132_v26, %v2146_v27  ;;  %v1607_v37 = vld [vmem:[#allocation5 + $0x2cf0] sm:$0xff] }
 0x31d   :  { %3775 = vmatprep.subr.mxu1 %v1568_v38  ;;  %3707 = vmatpush2.msra.mxu0 %v1501_v39  ;;  %v2149_v38 = vcombine.low %v2132_v26, %v2146_v27  ;;  %v1606_v39 = vld [vmem:[#allocation5 + $0x2ce8] sm:$0xff]  ;;  %v1581_v26 = vld [vmem:[#allocation5 + $0x2c20] sm:$0xff]  ;;  %v1648_v27 = vld [vmem:[#allocation5 + $0x2e38] sm:$0xff] }
 0x31e   :  { %3776 = vmatpush2.msra.mxu1 %v1567_v40  ;;  %3708 = vmatprep.subr.mxu0 %v1500_v41  ;;  %v1605_v40 = vld [vmem:[#allocation5 + $0x2ce0] sm:$0xff]  ;;  %v1672_v41 = vld [vmem:[#allocation5 + $0x2ef8] sm:$0xff] }
 0x31f   :  { %3777 = vmatprep.subr.mxu1 %v1566_v43  ;;  %3709 = vmatpush2.msra.mxu0 %v1499_v44  ;;  %v1604_v43 = vld [vmem:[#allocation5 + $0x2cd8] sm:$0xff]  ;;  %v1671_v44 = vld [vmem:[#allocation5 + $0x2ef0] sm:$0xff] }
 0x320   :  { %3778 = vmatpush2.msra.mxu1 %v1565_v45  ;;  %3710 = vmatprep.subr.mxu0 %v1498_v46  ;;  %v1603_v45 = vld [vmem:[#allocation5 + $0x2cd0] sm:$0xff]  ;;  %v1670_v46 = vld [vmem:[#allocation5 + $0x2ee8] sm:$0xff] }
 0x321   :  { %3779 = vmatprep.subr.mxu1 %v1564_v47  ;;  %3711 = vmatpush2.msra.mxu0 %v1497_v48  ;;  %v1602_v47 = vld [vmem:[#allocation5 + $0x2cc8] sm:$0xff]  ;;  %v1669_v48 = vld [vmem:[#allocation5 + $0x2ee0] sm:$0xff] }
 0x322   :  { %3780 = vmatpush2.msra.mxu1 %v1563_v49  ;;  %3712 = vmatprep.subr.mxu0 %v1496_v50  ;;  %v1601_v49 = vld [vmem:[#allocation5 + $0x2cc0] sm:$0xff]  ;;  %v1668_v50 = vld [vmem:[#allocation5 + $0x2ed8] sm:$0xff] }
 0x323   :  { %3781 = vmatprep.subr.mxu1 %v1562_v51  ;;  %3713 = vmatpush2.msra.mxu0 %v1495_v52  ;;  %v1600_v51 = vld [vmem:[#allocation5 + $0x2cb8] sm:$0xff]  ;;  %v1667_v52 = vld [vmem:[#allocation5 + $0x2ed0] sm:$0xff] }
 0x324   :  { %3782 = vmatpush2.msra.mxu1 %v1561_v53  ;;  %3714 = vmatprep.subr.mxu0 %v1494_v54  ;;  %v1599_v53 = vld [vmem:[#allocation5 + $0x2cb0] sm:$0xff]  ;;  %v1666_v54 = vld [vmem:[#allocation5 + $0x2ec8] sm:$0xff] }
 0x325   :  { %3783 = vmatprep.subr.mxu1 %v1560_v56  ;;  %3715 = vmatpush2.msra.mxu0 %v1493_v57  ;;  %v1598_v56 = vld [vmem:[#allocation5 + $0x2ca8] sm:$0xff]  ;;  %v1665_v57 = vld [vmem:[#allocation5 + $0x2ec0] sm:$0xff] }
 0x326   :  { %3784 = vmatpush2.msra.mxu1 %v1559_v58  ;;  %3716 = vmatprep.subr.mxu0 %v1492_v59  ;;  %v1597_v58 = vld [vmem:[#allocation5 + $0x2ca0] sm:$0xff]  ;;  %v1664_v59 = vld [vmem:[#allocation5 + $0x2eb8] sm:$0xff] }
 0x327   :  { %3785 = vmatprep.subr.mxu1 %v1558_v0  ;;  %3717 = vmatpush2.msra.mxu0 %v1491_v1  ;;  %v1594_v0 = vld [vmem:[#allocation5 + $0x2c88] sm:$0xff]  ;;  %v1661_v1 = vld [vmem:[#allocation5 + $0x2ea0] sm:$0xff] }
 0x328   :  { %3786 = vmatpush2.msra.mxu1 %v1557_v2  ;;  %3718 = vmatprep.subr.mxu0 %v1490_v3  ;;  %v1593_v2 = vld [vmem:[#allocation5 + $0x2c80] sm:$0xff]  ;;  %v1660_v3 = vld [vmem:[#allocation5 + $0x2e98] sm:$0xff] }
 0x329   :  { %3787 = vmatprep.subr.mxu1 %v1556_v4  ;;  %3719 = vmatpush2.msra.mxu0 %v1489_v5  ;;  %v1592_v4 = vld [vmem:[#allocation5 + $0x2c78] sm:$0xff]  ;;  %v1659_v5 = vld [vmem:[#allocation5 + $0x2e90] sm:$0xff] }
 0x32a   :  { %3788 = vmatpush2.msra.mxu1 %v1555_v8  ;;  %3720 = vmatprep.subr.mxu0 %v1488_v9  ;;  %v1590_v8 = vld [vmem:[#allocation5 + $0x2c68] sm:$0xff]  ;;  %v1657_v9 = vld [vmem:[#allocation5 + $0x2e80] sm:$0xff] }
 0x32b   :  { %3789 = vmatprep.subr.mxu1 %v1554_v10  ;;  %3721 = vmatpush2.msra.mxu0 %v1487_v11  ;;  %v1589_v10 = vld [vmem:[#allocation5 + $0x2c60] sm:$0xff]  ;;  %v1656_v11 = vld [vmem:[#allocation5 + $0x2e78] sm:$0xff] }
 0x32c   :  { %3790 = vmatpush2.msra.mxu1 %v1553_v12  ;;  %3722 = vmatprep.subr.mxu0 %v1486_v13  ;;  %v1588_v12 = vld [vmem:[#allocation5 + $0x2c58] sm:$0xff]  ;;  %v1655_v13 = vld [vmem:[#allocation5 + $0x2e70] sm:$0xff] }
 0x32d   :  { %3791 = vmatprep.subr.mxu1 %v1552_v16  ;;  %3723 = vmatpush2.msra.mxu0 %v1485_v17  ;;  %v1586_v16 = vld [vmem:[#allocation5 + $0x2c48] sm:$0xff]  ;;  %v1653_v17 = vld [vmem:[#allocation5 + $0x2e60] sm:$0xff] }
 0x32e   :  { %3792 = vmatpush2.msra.mxu1 %v1551_v20  ;;  %3724 = vmatprep.subr.mxu0 %v1484_v21  ;;  %v1584_v20 = vld [vmem:[#allocation5 + $0x2c38] sm:$0xff]  ;;  %v1651_v21 = vld [vmem:[#allocation5 + $0x2e50] sm:$0xff] }
 0x32f   :  { %3793 = vmatprep.subr.mxu1 %v1550_v22  ;;  %3725 = vmatpush2.msra.mxu0 %v1483_v23  ;;  %v1583_v22 = vld [vmem:[#allocation5 + $0x2c30] sm:$0xff]  ;;  %v1650_v23 = vld [vmem:[#allocation5 + $0x2e48] sm:$0xff] }
 0x330   :  { %3794 = vmatpush2.msra.mxu1 %v1549_v24  ;;  %3726 = vmatprep.subr.mxu0 %v1482_v25  ;;  %v1582_v24 = vld [vmem:[#allocation5 + $0x2c28] sm:$0xff]  ;;  %v1649_v25 = vld [vmem:[#allocation5 + $0x2e40] sm:$0xff] }
 0x331   :  { %3795 = vmatprep.subr.mxu1 %v1548_v28  ;;  %3727 = vmatpush2.msra.mxu0 %v1481_v29  ;;  %v1580_v28 = vld [vmem:[#allocation5 + $0x2c18] sm:$0xff]  ;;  %v1647_v29 = vld [vmem:[#allocation5 + $0x2e30] sm:$0xff] }
 0x332   :  { %3728 = vmatprep.mubr.f32.mxu0 %v2148_v30  ;;  %3796 = vmatpush2.msra.mxu1 %v1547_v31  ;;  %v1579_v30 = vld [vmem:[#allocation5 + $0x2c10] sm:$0xff]  ;;  %v1646_v31 = vld [vmem:[#allocation5 + $0x2e28] sm:$0xff] }
 0x333   :  { %3729 = vmatmul.mubr.f32.vlgmr.msra.gmra.mxu0 %v2147_v32  ;;  %3797 = vmatprep.subr.mxu1 %v1546_v33  ;;  %v1578_v32 = vld [vmem:[#allocation5 + $0x2c08] sm:$0xff]  ;;  %v1645_v33 = vld [vmem:[#allocation5 + $0x2e20] sm:$0xff] }
 0x334   :  { %3806 = vmatprep.subr.mxu0 %v1608_v34  ;;  %3798 = vmatpush2.msra.mxu1 %v1545_v35  ;;  %v1577_v34 = vld [vmem:[#allocation5 + $0x2c00] sm:$0xff]  ;;  %v1644_v35 = vld [vmem:[#allocation5 + $0x2e18] sm:$0xff] }
 0x335   :  { %3799 = vmatprep.mubr.f32.mxu1 %v2150_v36  ;;  %3807 = vmatpush1.msra.mxu0 %v1607_v37  ;;  %v1640_v36 = vld [vmem:[#allocation5 + $0x2df8] sm:$0xff]  ;;  %v1643_v37 = vld [vmem:[#allocation5 + $0x2e10] sm:$0xff] }
 0x336   :  { %3800 = vmatmul.mubr.f32.vlgmr.msra.gmra.mxu1 %v2149_v38  ;;  %3808 = vmatprep.subr.mxu0 %v1606_v39  ;;  %v1639_v38 = vld [vmem:[#allocation5 + $0x2df0] sm:$0xff]  ;;  %v1642_v39 = vld [vmem:[#allocation5 + $0x2e08] sm:$0xff] }
 0x337   :  { %3809 = vmatpush1.msra.mxu0 %v1605_v40  ;;  %3877 = vmatprep.subr.mxu1 %v1672_v41  ;;  %v1638_v40 = vld [vmem:[#allocation5 + $0x2de8] sm:$0xff]  ;;  %v1641_v41 = vld [vmem:[#allocation5 + $0x2e00] sm:$0xff] }
 0x338   :  { %3810 = vmatprep.subr.mxu0 %v1604_v43  ;;  %3878 = vmatpush1.msra.mxu1 %v1671_v44  ;;  %v1637_v43 = vld [vmem:[#allocation5 + $0x2de0] sm:$0xff]  ;;  %v1694_v44 = vld [vmem:[#allocation5 + $0x2fa8] sm:$0xf] }
 0x339   :  { %3811 = vmatpush1.msra.mxu0 %v1603_v45  ;;  %3879 = vmatprep.subr.mxu1 %v1670_v46  ;;  %v1636_v45 = vld [vmem:[#allocation5 + $0x2dd8] sm:$0xff]  ;;  %v1693_v46 = vld [vmem:[#allocation5 + $0x2fa0] sm:$0xf] }
 0x33a   :  { %3812 = vmatprep.subr.mxu0 %v1602_v47  ;;  %3880 = vmatpush1.msra.mxu1 %v1669_v48  ;;  %v1635_v47 = vld [vmem:[#allocation5 + $0x2dd0] sm:$0xff]  ;;  %v1692_v48 = vld [vmem:[#allocation5 + $0x2f98] sm:$0xff] }
 0x33b   :  { %3813 = vmatpush1.msra.mxu0 %v1601_v49  ;;  %3881 = vmatprep.subr.mxu1 %v1668_v50  ;;  %v1634_v49 = vld [vmem:[#allocation5 + $0x2dc8] sm:$0xff]  ;;  %v1691_v50 = vld [vmem:[#allocation5 + $0x2f90] sm:$0xff] }
 0x33c   :  { %3814 = vmatprep.subr.mxu0 %v1600_v51  ;;  %3882 = vmatpush1.msra.mxu1 %v1667_v52  ;;  %v1633_v51 = vld [vmem:[#allocation5 + $0x2dc0] sm:$0xff]  ;;  %v1690_v52 = vld [vmem:[#allocation5 + $0x2f88] sm:$0xff] }
 0x33d   :  { %3815 = vmatpush1.msra.mxu0 %v1599_v53  ;;  %3883 = vmatprep.subr.mxu1 %v1666_v54  ;;  %v1632_v53 = vld [vmem:[#allocation5 + $0x2db8] sm:$0xff]  ;;  %v1689_v54 = vld [vmem:[#allocation5 + $0x2f80] sm:$0xff] }
 0x33e   :  { %3816 = vmatprep.subr.mxu0 %v1598_v56  ;;  %3884 = vmatpush1.msra.mxu1 %v1665_v57  ;;  %v1631_v56 = vld [vmem:[#allocation5 + $0x2db0] sm:$0xff]  ;;  %v1630_v57 = vld [vmem:[#allocation5 + $0x2da8] sm:$0xff] }
 0x33f   :  { %3817 = vmatpush1.msra.mxu0 %v1597_v58  ;;  %3885 = vmatprep.subr.mxu1 %v1664_v59  ;;  %v1688_v58 = vld [vmem:[#allocation5 + $0x2f78] sm:$0xff]  ;;  %v1629_v59 = vld [vmem:[#allocation5 + $0x2da0] sm:$0xff] }
 0x340   :  { %3818 = vmatprep.subr.mxu0 %v1596_v60  ;;  %3886 = vmatpush1.msra.mxu1 %v1663_v61  ;;  %v1628_v60 = vld [vmem:[#allocation5 + $0x2d98] sm:$0xff]  ;;  %v1687_v61 = vld [vmem:[#allocation5 + $0x2f70] sm:$0xff] }
 0x341   :  { %3819 = vmatpush1.msra.mxu0 %v1595_v62  ;;  %3887 = vmatprep.subr.mxu1 %v1662_v63  ;;  %v1686_v62 = vld [vmem:[#allocation5 + $0x2f68] sm:$0xff]  ;;  %v1685_v63 = vld [vmem:[#allocation5 + $0x2f60] sm:$0xff] }
 0x342   :  { %3820 = vmatprep.subr.mxu0 %v1594_v0  ;;  %3888 = vmatpush1.msra.mxu1 %v1661_v1  ;;  %v132_v0 = vld [vmem:[#allocation3 + $0x58] sm:$0xff] }
 0x343   :  { %3821 = vmatpush1.msra.mxu0 %v1593_v2  ;;  %3889 = vmatprep.subr.mxu1 %v1660_v3  ;;  %v144_v1 = vld [vmem:[#allocation3 + $0xb8] sm:$0xff] }
 0x344   :  { %3822 = vmatprep.subr.mxu0 %v1592_v4  ;;  %3890 = vmatpush1.msra.mxu1 %v1659_v5  ;;  %v156_v2 = vld [vmem:[#allocation3 + $0x118] sm:$0xff]  ;;  %v1627_v4 = vld [vmem:[#allocation5 + $0x2d90] sm:$0xff] }
 0x345   :  { %3823 = vmatpush1.msra.mxu0 %v1591_v6  ;;  %3891 = vmatprep.subr.mxu1 %v1658_v7  ;;  %v168_v3 = vld [vmem:[#allocation3 + $0x178] sm:$0xff]  ;;  %v1626_v6 = vld [vmem:[#allocation5 + $0x2d88] sm:$0xff]  ;;  %v1683_v7 = vld [vmem:[#allocation5 + $0x2f50] sm:$0xff] }
 0x346   :  { %3824 = vmatprep.subr.mxu0 %v1590_v8  ;;  %3892 = vmatpush1.msra.mxu1 %v1657_v9  ;;  %v1684_v5 = vld [vmem:[#allocation5 + $0x2f58] sm:$0xff]  ;;  %v1625_v8 = vld [vmem:[#allocation5 + $0x2d80] sm:$0xff]  ;;  %v1682_v9 = vld [vmem:[#allocation5 + $0x2f48] sm:$0xff] }
 0x347   :  { %3825 = vmatpush1.msra.mxu0 %v1589_v10  ;;  %3893 = vmatprep.subr.mxu1 %v1656_v11  ;;  %v2151_v10 = vcombine.low %v132_v0, %v144_v1  ;;  %v2153_v11 = vcombine.low %v156_v2, %v168_v3 }
 0x348   :  { %3826 = vmatprep.subr.mxu0 %v1588_v12  ;;  %3894 = vmatpush1.msra.mxu1 %v1655_v13  ;;  %v1624_v12 = vld [vmem:[#allocation5 + $0x2d78] sm:$0xff]  ;;  %v1681_v13 = vld [vmem:[#allocation5 + $0x2f40] sm:$0xff] }
 0x349   :  { %3827 = vmatpush1.msra.mxu0 %v1587_v14  ;;  %3895 = vmatprep.subr.mxu1 %v1654_v15  ;;  %v1623_v14 = vld [vmem:[#allocation5 + $0x2d70] sm:$0xff]  ;;  %v1680_v15 = vld [vmem:[#allocation5 + $0x2f38] sm:$0xff] }
 0x34a   :  { %3828 = vmatprep.subr.mxu0 %v1586_v16  ;;  %3896 = vmatpush1.msra.mxu1 %v1653_v17  ;;  %v2152_v16 = vcombine.high %v132_v0, %v144_v1  ;;  %v2154_v17 = vcombine.high %v156_v2, %v168_v3  ;;  %v3973_v0 = vld [vmem:[#allocation8 + $0xb8] sm:$0xff]  ;;  %v3972_v2 = vld [vmem:[#allocation8 + $0xb0] sm:$0xff] }
 0x34b   :  { %3829 = vmatpush1.msra.mxu0 %v1585_v18  ;;  %3897 = vmatprep.subr.mxu1 %v1652_v19  ;;  %v1622_v18 = vld [vmem:[#allocation5 + $0x2d68] sm:$0xff]  ;;  %v1679_v19 = vld [vmem:[#allocation5 + $0x2f30] sm:$0xff] }
 0x34c   :  { %3830 = vmatprep.subr.mxu0 %v1584_v20  ;;  %3898 = vmatpush1.msra.mxu1 %v1651_v21  ;;  %v1621_v20 = vld [vmem:[#allocation5 + $0x2d60] sm:$0xff]  ;;  %v1678_v21 = vld [vmem:[#allocation5 + $0x2f28] sm:$0xff] }
 0x34d   :  { %3831 = vmatpush1.msra.mxu0 %v1583_v22  ;;  %3899 = vmatprep.subr.mxu1 %v1650_v23  ;;  %v2161_v22 = vrot.slane %v2151_v10, %v4572_v55  ;;  %v2175_v23 = vrot.slane %v2153_v11, %v4572_v55  ;;  %v3957_v1 = vld [vmem:[#allocation8 + $0x38] sm:$0xff]  ;;  %v3956_v3 = vld [vmem:[#allocation8 + $0x30] sm:$0xff] }
 0x34e   :  { %3832 = vmatprep.subr.mxu0 %v1582_v24  ;;  %3900 = vmatpush1.msra.mxu1 %v1649_v25  ;;  %v1620_v24 = vld [vmem:[#allocation5 + $0x2d58] sm:$0xff]  ;;  %v1677_v25 = vld [vmem:[#allocation5 + $0x2f20] sm:$0xff] }
 0x34f   :  { %3833 = vmatpush1.msra.mxu0 %v1581_v26  ;;  %3901 = vmatprep.subr.mxu1 %v1648_v27  ;;  %v1619_v26 = vld [vmem:[#allocation5 + $0x2d50] sm:$0xff]  ;;  %v1676_v27 = vld [vmem:[#allocation5 + $0x2f18] sm:$0xff]  ;;  %v3968_v10 = vld [vmem:[#allocation8 + $0x90] sm:$0xff] }
 0x350   :  { %3834 = vmatprep.subr.mxu0 %v1580_v28  ;;  %3902 = vmatpush1.msra.mxu1 %v1647_v29  ;;  %v2168_v28 = vrot.slane %v2152_v16, %v4572_v55  ;;  %v2182_v29 = vrot.slane %v2154_v17, %v4572_v55  ;;  %v3952_v11 = vld [vmem:[#allocation8 + $0x10] sm:$0xff]  ;;  %v4075_v16 = vld [vmem:[%s4697_s5 + $0x78] sm:$0xff]  ;;  %v4493_v17 = vmov 0.0  }
 0x351   :  { %3835 = vmatpush1.msra.mxu0 %v1579_v30  ;;  %3903 = vmatprep.subr.mxu1 %v1646_v31  ;;  %v1618_v30 = vld [vmem:[#allocation5 + $0x2d48] sm:$0xff]  ;;  %v1675_v31 = vld [vmem:[#allocation5 + $0x2f10] sm:$0xff] }
 0x352   :  { %3836 = vmatprep.subr.mxu0 %v1578_v32  ;;  %3904 = vmatpush1.msra.mxu1 %v1645_v33  ;;  %v1617_v32 = vld [vmem:[#allocation5 + $0x2d40] sm:$0xff]  ;;  %v1674_v33 = vld [vmem:[#allocation5 + $0x2f08] sm:$0xff]  ;;  %v2185_v55 = vcombine.low %v2168_v28, %v2182_v29 }
 0x353   :  { %3837 = vmatpush1.msra.mxu0 %v1577_v34  ;;  %3905 = vmatprep.subr.mxu1 %v1644_v35  ;;  %v2184_v34 = vcombine.high %v2161_v22, %v2175_v23  ;;  %v1616_v35 = vld [vmem:[#allocation5 + $0x2d38] sm:$0xff] }
 0x354   :  { %3838 = vmatprep.subr.mxu0 %v1640_v36  ;;  %3906 = vmatpush1.msra.mxu1 %v1643_v37  ;;  %v1615_v36 = vld [vmem:[#allocation5 + $0x2d30] sm:$0xff]  ;;  %v1673_v37 = vld [vmem:[#allocation5 + $0x2f00] sm:$0xff] }
 0x355   :  { %3839 = vmatpush2.msra.mxu0 %v1639_v38  ;;  %3907 = vmatprep.subr.mxu1 %v1642_v39  ;;  %v2186_v38 = vcombine.high %v2168_v28, %v2182_v29  ;;  %v1614_v39 = vld [vmem:[#allocation5 + $0x2d28] sm:$0xff]  ;;  %v1699_v28 = vsub.s32 0, %v4569_v42  ;;  %v1695_v29 = vld [vmem:[#allocation7] sm:$0x3] }
 0x356   :  { %3840 = vmatprep.subr.mxu0 %v1638_v40  ;;  %3908 = vmatpush1.msra.mxu1 %v1641_v41  ;;  %v1613_v40 = vld [vmem:[#allocation5 + $0x2d20] sm:$0xff]  ;;  %v1612_v41 = vld [vmem:[#allocation5 + $0x2d18] sm:$0xff] }
 0x357   :  { %3841 = vmatpush2.msra.mxu0 %v1637_v43  ;;  %4221 = vmatprep.subr.msk.mxu1 %vm2237_vm0, %v1694_v44  ;;  %v1611_v43 = vld [vmem:[#allocation5 + $0x2d10] sm:$0xff]  ;;  %v1610_v44 = vld [vmem:[#allocation5 + $0x2d08] sm:$0xff] }
 0x358   :  { %3842 = vmatprep.subr.mxu0 %v1636_v45  ;;  %4222 = vmatpush2.msk.msra.mxu1 %vm2237_vm0, %v1693_v46  ;;  %v1609_v45 = vld [vmem:[#allocation5 + $0x2d00] sm:$0xff]  ;;  %v2183_v46 = vcombine.low %v2161_v22, %v2175_v23  ;;  %v4070_v22 = vld [vmem:[%s4697_s5 + $0x50] sm:$0xff] }
 0x359   :  { %3843 = vmatpush2.msra.mxu0 %v1635_v47  ;;  %3921 = vmatprep.subr.mxu1 %v1692_v48  ;;  %v3981_v47 = vld [vmem:[#allocation8 + $0xf8] sm:$0xff] }
 0x35a   :  { %3844 = vmatprep.subr.mxu0 %v1634_v49  ;;  %3922 = vmatpush2.msra.mxu1 %v1691_v50  ;;  %v3965_v48 = vld [vmem:[#allocation8 + $0x78] sm:$0xff]  ;;  %v3980_v49 = vld [vmem:[#allocation8 + $0xf0] sm:$0xff] }
 0x35b   :  { %3845 = vmatpush2.msra.mxu0 %v1633_v51  ;;  %3923 = vmatprep.subr.mxu1 %v1690_v52  ;;  %v3964_v50 = vld [vmem:[#allocation8 + $0x70] sm:$0xff]  ;;  %v3979_v51 = vld [vmem:[#allocation8 + $0xe8] sm:$0xff] }
 0x35c   :  { %3846 = vmatprep.subr.mxu0 %v1632_v53  ;;  %3924 = vmatpush2.msra.mxu1 %v1689_v54  ;;  %v3963_v52 = vld [vmem:[#allocation8 + $0x68] sm:$0xff]  ;;  %v3978_v53 = vld [vmem:[#allocation8 + $0xe0] sm:$0xff]  ;;  %v4069_v23 = vld [vmem:[%s4697_s5 + $0x48] sm:$0xff] }
 0x35d   :  { %3847 = vmatpush2.msra.mxu0 %v1631_v56  ;;  %3925 = vmatprep.subr.mxu1 %v1688_v58  ;;  %v3962_v54 = vld [vmem:[#allocation8 + $0x60] sm:$0xff]  ;;  %v3977_v56 = vld [vmem:[#allocation8 + $0xd8] sm:$0xff]  ;;  %v3976_v58 = vld [vmem:[#allocation8 + $0xd0] sm:$0xff] }
 0x35e   :  { %3848 = vmatprep.subr.mxu0 %v1630_v57  ;;  %3926 = vmatpush2.msra.mxu1 %v1687_v61  ;;  %v3961_v57 = vld [vmem:[#allocation8 + $0x58] sm:$0xff]  ;;  %v3959_v61 = vld [vmem:[#allocation8 + $0x48] sm:$0xff] }
 0x35f   :  { %3849 = vmatpush2.msra.mxu0 %v1629_v59  ;;  %3927 = vmatprep.subr.mxu1 %v1686_v62  ;;  %v3960_v59 = vld [vmem:[#allocation8 + $0x50] sm:$0xff]  ;;  %v3974_v62 = vld [vmem:[#allocation8 + $0xc0] sm:$0xff] }
 0x360   :  { %3850 = vmatprep.subr.mxu0 %v1628_v60  ;;  %3928 = vmatpush2.msra.mxu1 %v1685_v63  ;;  %v3975_v60 = vld [vmem:[#allocation8 + $0xc8] sm:$0xff]  ;;  %v3958_v63 = vld [vmem:[#allocation8 + $0x40] sm:$0xff] }
 0x361   :  { %3851 = vmatpush2.msra.mxu0 %v1627_v4  ;;  %3929 = vmatprep.subr.mxu1 %v1684_v5  ;;  %v3971_v4 = vld [vmem:[#allocation8 + $0xa8] sm:$0xff] }
 0x362   :  { %3852 = vmatprep.subr.mxu0 %v1626_v6  ;;  %3930 = vmatpush2.msra.mxu1 %v1683_v7  ;;  %v3955_v5 = vld [vmem:[#allocation8 + $0x28] sm:$0xff]  ;;  %v3970_v6 = vld [vmem:[#allocation8 + $0xa0] sm:$0xff] }
 0x363   :  { %3853 = vmatpush2.msra.mxu0 %v1625_v8  ;;  %3931 = vmatprep.subr.mxu1 %v1682_v9  ;;  %v3954_v7 = vld [vmem:[#allocation8 + $0x20] sm:$0xff]  ;;  %v3969_v8 = vld [vmem:[#allocation8 + $0x98] sm:$0xff] }
 0x364   :  { %3854 = vmatprep.subr.mxu0 %v1624_v12  ;;  %3932 = vmatpush2.msra.mxu1 %v1681_v13  ;;  %v3953_v9 = vld [vmem:[#allocation8 + $0x18] sm:$0xff]  ;;  %v3967_v12 = vld [vmem:[#allocation8 + $0x88] sm:$0xff] }
 0x365   :  { %3855 = vmatpush2.msra.mxu0 %v1623_v14  ;;  %3933 = vmatprep.subr.mxu1 %v1680_v15  ;;  %v3951_v13 = vld [vmem:[#allocation8 + $0x8] sm:$0xff]  ;;  %v3966_v14 = vld [vmem:[#allocation8 + $0x80] sm:$0xff] }
 0x366   :  { %3856 = vmatprep.subr.mxu0 %v1622_v18  ;;  %3934 = vmatpush2.msra.mxu1 %v1679_v19  ;;  %v3950_v15 = vld [vmem:[#allocation8] sm:$0xff]  ;;  %v4073_v19 = vld [vmem:[%s4697_s5 + $0x68] sm:$0xff] }
 0x367   :  { %3857 = vmatpush2.msra.mxu0 %v1621_v20  ;;  %3935 = vmatprep.subr.mxu1 %v1678_v21  ;;  %v4074_v18 = vld [vmem:[%s4697_s5 + $0x70] sm:$0xff]  ;;  %v4072_v20 = vld [vmem:[%s4697_s5 + $0x60] sm:$0xff]  ;;  %v4071_v21 = vld [vmem:[%s4697_s5 + $0x58] sm:$0xff] }
 0x368   :  { %3858 = vmatprep.subr.mxu0 %v1620_v24  ;;  %3936 = vmatpush2.msra.mxu1 %v1677_v25  ;;  %v4068_v24 = vld [vmem:[%s4697_s5 + $0x40] sm:$0xff]  ;;  %v4067_v25 = vld [vmem:[%s4697_s5 + $0x38] sm:$0xff] }
 0x369   :  { %3859 = vmatpush2.msra.mxu0 %v1619_v26  ;;  %3937 = vmatprep.subr.mxu1 %v1676_v27  ;;  %v4066_v26 = vld [vmem:[%s4697_s5 + $0x30] sm:$0xff]  ;;  %v4065_v27 = vld [vmem:[%s4697_s5 + $0x28] sm:$0xff] }
 0x36a   :  { %3860 = vmatprep.subr.mxu0 %v1618_v30  ;;  %3938 = vmatpush2.msra.mxu1 %v1675_v31  ;;  %v1703_v30 = vsub.s32 1, %v4569_v42  ;;  %v2310_v31 = vpop.f32.mrf.mxu0 }
 0x36b   :  { %3861 = vmatpush2.msra.mxu0 %v1617_v32  ;;  %3939 = vmatprep.subr.mxu1 %v1674_v33  ;;  %v1700_v32 = vrot.slane %v1695_v29, %v1699_v28 }
 0x36c   :  { %3862 = vmatprep.subr.mxu0 %v1616_v35  ;;  %3870 = vmatprep.mubr.f32.mxu0 %v2184_v34  ;;  %v1704_v33 = vrot.slane %v1695_v29, %v1703_v30  ;;  %v2312_v34 = vpop.f32.mrf.mxu0  ;;  %v2381_v35 = vpop.f32.mrf.mxu1 }
 0x36d   :  { %3863 = vmatpush2.msra.mxu0 %v1615_v36  ;;  %3940 = vmatpush2.msra.mxu1 %v1673_v37  ;;  %v2311_v36 = vadd.f32 %v2310_v31, %v1700_v32 }
 0x36e   :  { %3864 = vmatprep.subr.mxu0 %v1614_v39  ;;  %4223 = vmatprep.mubr.msk.f32.mxu1 %vm2234_vm1, %v2186_v38  ;;  %v2452_v37 = vpop.f32.mrf.mxu0  ;;  %v2313_v38 = vadd.f32 %v2312_v34, %v1704_v33  ;;  %v2383_v39 = vpop.f32.mrf.mxu1 }
 0x36f   :  { %3865 = vmatpush2.msra.mxu0 %v1613_v40  ;;  %3942 = vmatmul.mubr.f32.vlgmr.msra.gmra.mxu1 %v2185_v55  ;;  %v2382_v55 = vadd.f32 %v2381_v35, %v2311_v36 }
 0x370   :  { %3866 = vmatprep.subr.mxu0 %v1612_v41  ;;  %4228 = vmatprep.subr.mxu1 %v3981_v47  ;;  %v2454_v40 = vpop.f32.mrf.mxu0  ;;  %v2523_v41 = vpop.f32.mrf.mxu1 }
 0x371   :  { %3867 = vmatpush2.msra.mxu0 %v1611_v43  ;;  %4229 = vmatpush3.msra.mxu1 %v3965_v48  ;;  %v2384_v43 = vadd.f32 %v2383_v39, %v2313_v38 }
 0x372   :  { %3868 = vmatprep.subr.mxu0 %v1610_v44  ;;  %4230 = vmatprep.subr.mxu1 %v3980_v49  ;;  %v2453_v44 = vadd.f32 %v2452_v37, %v2382_v55  ;;  %v2525_v47 = vpop.f32.mrf.mxu1 }
 0x373   :  { %3869 = vmatpush2.msra.mxu0 %v1609_v45  ;;  %4231 = vmatpush3.msra.mxu1 %v3964_v50  ;;  %v2594_v45 = vpop.f32.mrf.mxu0 }
 0x374   :  { %3871 = vmatmul.mubr.f32.vlgmr.msra.gmra.mxu0 %v2183_v46  ;;  %4232 = vmatprep.subr.mxu1 %v3979_v51  ;;  %v2455_v46 = vadd.f32 %v2454_v40, %v2384_v43  ;;  %v2524_v48 = vadd.f32 %v2523_v41, %v2453_v44  ;;  %v2665_v42 = vpop.f32.mrf.mxu1 }
 0x375   :  { %4233 = vmatpush3.msra.mxu1 %v3963_v52  ;;  %4280 = vmatprep.subr.mxu0 %v4493_v17  ;;  %v2596_v49 = vpop.f32.mrf.mxu0 }
 0x376   :  { %4234 = vmatprep.subr.mxu1 %v3978_v53  ;;  %4281 = vmatpush3.msra.mxu0 %v4075_v16  ;;  %v2526_v50 = vadd.f32 %v2525_v47, %v2455_v46  ;;  %v2595_v51 = vadd.f32 %v2594_v45, %v2524_v48 }
 0x377   :  { %4235 = vmatpush3.msra.mxu1 %v3962_v54  ;;  %4282 = vmatprep.subr.mxu0 %v4493_v17  ;;  %v2736_v52 = vpop.f32.mrf.mxu0  ;;  %v2667_v54 = vpop.f32.mrf.mxu1 }
 0x378   :  { %4236 = vmatprep.subr.mxu1 %v3977_v56  ;;  %4283 = vmatpush3.msra.mxu0 %v4074_v18  ;;  %v2597_v53 = vadd.f32 %v2596_v49, %v2526_v50  ;;  %v2666_v56 = vadd.f32 %v2665_v42, %v2595_v51 }
 0x379   :  { %4237 = vmatpush3.msra.mxu1 %v3961_v57  ;;  %4284 = vmatprep.subr.mxu0 %v4493_v17  ;;  %v2738_v57 = vpop.f32.mrf.mxu0 }
 0x37a   :  { %4238 = vmatprep.subr.mxu1 %v3976_v58  ;;  %4285 = vmatpush3.msra.mxu0 %v4073_v19  ;;  %v2807_v58 = vpop.f32.mrf.mxu1 }
 0x37b   :  { %4239 = vmatpush3.msra.mxu1 %v3960_v59  ;;  %4286 = vmatprep.subr.mxu0 %v4493_v17  ;;  %v2668_v59 = vadd.f32 %v2667_v54, %v2597_v53 }
 0x37c   :  { %4240 = vmatprep.subr.mxu1 %v3975_v60  ;;  %4287 = vmatpush3.msra.mxu0 %v4072_v20  ;;  %v2737_v60 = vadd.f32 %v2736_v52, %v2666_v56 }
 0x37d   :  { %4241 = vmatpush3.msra.mxu1 %v3959_v61  ;;  %4288 = vmatprep.subr.mxu0 %v4493_v17  ;;  %v2878_v61 = vpop.f32.mrf.mxu0 }
 0x37e   :  { %4242 = vmatprep.subr.mxu1 %v3974_v62  ;;  %4289 = vmatpush3.msra.mxu0 %v4071_v21  ;;  %v2739_v62 = vadd.f32 %v2738_v57, %v2668_v59 }
 0x37f   :  { %4243 = vmatpush3.msra.mxu1 %v3958_v63  ;;  %4290 = vmatprep.subr.mxu0 %v4493_v17  ;;  %v2809_v63 = vpop.f32.mrf.mxu1 }
 0x380   :  { %4244 = vmatprep.subr.mxu1 %v3973_v0  ;;  %4291 = vmatpush3.msra.mxu0 %v4070_v22  ;;  %v2808_v0 = vadd.f32 %v2807_v58, %v2737_v60 }
 0x381   :  { %4245 = vmatpush3.msra.mxu1 %v3957_v1  ;;  %4292 = vmatprep.subr.mxu0 %v4493_v17  ;;  %v2880_v1 = vpop.f32.mrf.mxu0 }
 0x382   :  { %4246 = vmatprep.subr.mxu1 %v3972_v2  ;;  %4293 = vmatpush3.msra.mxu0 %v4069_v23  ;;  %v2949_v2 = vpop.f32.mrf.mxu1 }
 0x383   :  { %4247 = vmatpush3.msra.mxu1 %v3956_v3  ;;  %4294 = vmatprep.subr.mxu0 %v4493_v17  ;;  %v2810_v3 = vadd.f32 %v2809_v63, %v2739_v62 }
 0x384   :  { %4248 = vmatprep.subr.mxu1 %v3971_v4  ;;  %4295 = vmatpush3.msra.mxu0 %v4068_v24  ;;  %v2879_v4 = vadd.f32 %v2878_v61, %v2808_v0 }
 0x385   :  { %4249 = vmatpush3.msra.mxu1 %v3955_v5  ;;  %4296 = vmatprep.subr.mxu0 %v4493_v17  ;;  %v3020_v5 = vpop.f32.mrf.mxu0 }
 0x386   :  { %4250 = vmatprep.subr.mxu1 %v3970_v6  ;;  %4297 = vmatpush3.msra.mxu0 %v4067_v25  ;;  %v2881_v6 = vadd.f32 %v2880_v1, %v2810_v3 }
 0x387   :  { %4251 = vmatpush3.msra.mxu1 %v3954_v7  ;;  %4298 = vmatprep.subr.mxu0 %v4493_v17  ;;  %v2951_v7 = vpop.f32.mrf.mxu1 }
 0x388   :  { %4252 = vmatprep.subr.mxu1 %v3969_v8  ;;  %4299 = vmatpush3.msra.mxu0 %v4066_v26  ;;  %v2950_v8 = vadd.f32 %v2949_v2, %v2879_v4  ;;  %v4064_v4 = vld [vmem:[%s4697_s5 + $0x20] sm:$0xff] }
 0x389   :  { %4253 = vmatpush3.msra.mxu1 %v3953_v9  ;;  %4300 = vmatprep.subr.mxu0 %v4493_v17  ;;  %v3022_v9 = vpop.f32.mrf.mxu0 }
 0x38a   :  { %4254 = vmatprep.subr.mxu1 %v3968_v10  ;;  %4301 = vmatpush3.msra.mxu0 %v4065_v27  ;;  %v3091_v10 = vpop.f32.mrf.mxu1 }
 0x38b   :  { %4255 = vmatpush3.msra.mxu1 %v3952_v11  ;;  %4302 = vmatprep.subr.mxu0 %v4493_v17  ;;  %v2952_v11 = vadd.f32 %v2951_v7, %v2881_v6  ;;  %v4062_v6 = vld [vmem:[%s4697_s5 + $0x10] sm:$0xff]  ;;  %v4061_v7 = vld [vmem:[%s4697_s5 + $0x8] sm:$0xff] }
 0x38c   :  { %4256 = vmatprep.subr.mxu1 %v3967_v12  ;;  %v3021_v12 = vadd.f32 %v3020_v5, %v2950_v8  ;;  %4303 = vmatpush3.msra.mxu0 %v4064_v4  ;;  %v4063_v5 = vld [vmem:[%s4697_s5 + $0x18] sm:$0xff]  ;;  %v4060_v8 = vld [vmem:[%s4697_s5] sm:$0xff] }
 0x38d   :  { %4257 = vmatpush3.msra.mxu1 %v3951_v13  ;;  %v3162_v13 = vpop.f32.mrf.mxu0  ;;  %4304 = vmatprep.subr.mxu0 %v4493_v17 }
 0x38e   :  { %4258 = vmatprep.subr.mxu1 %v3966_v14  ;;  %v3023_v14 = vadd.f32 %v3022_v9, %v2952_v11  ;;  %v3092_v16 = vadd.f32 %v3091_v10, %v3021_v12  ;;  %4305 = vmatpush3.msra.mxu0 %v4063_v5  ;;  %v4224_v10 = vld [vmem:[#allocation10] ss:$0 sm:$0xff] }
 0x38f   :  { %4259 = vmatpush3.msra.mxu1 %v3950_v15  ;;  %v3093_v15 = vpop.f32.mrf.mxu1  ;;  %v3164_v18 = vpop.f32.mrf.mxu0  ;;  %4306 = vmatprep.subr.mxu0 %v4493_v17 }
 0x390   :  { %v3094_v20 = vadd.f32 %v3093_v15, %v3023_v14  ;;  %v3163_v21 = vadd.f32 %v3162_v13, %v3092_v16  ;;  %4307 = vmatpush3.msra.mxu0 %v4062_v6  ;;  %4312 = vmatprep.mubr.msk.f32.mxu0 %vm4494_vm2, %v4493_v17  ;;  %v4225_v15 = vld [vmem:[#allocation11] ss:$0 sm:$0xff] }
 0x391   :  { %v3233_v19 = vpop.f32.mrf.mxu1  ;;  %v3304_v22 = vpop.f32.mrf.mxu0  ;;  %4308 = vmatprep.subr.mxu0 %v4493_v17 }
 0x392   :  { %v3165_v23 = vadd.f32 %v3164_v18, %v3094_v20  ;;  %v3234_v25 = vadd.f32 %v3233_v19, %v3163_v21  ;;  %4309 = vmatpush3.msra.mxu0 %v4061_v7  ;;  %v4226_v20 = vld [vmem:[#allocation13] ss:$0 sm:$0xff] }
 0x393   :  { %v3235_v24 = vpop.f32.mrf.mxu1  ;;  %v3306_v26 = vpop.f32.mrf.mxu0  ;;  %4310 = vmatprep.subr.mxu0 %v4493_v17 }
 0x394   :  { %v3236_v28 = vadd.f32 %v3235_v24, %v3165_v23  ;;  %v3305_v29 = vadd.f32 %v3304_v22, %v3234_v25  ;;  %4311 = vmatpush3.msra.mxu0 %v4060_v8  ;;  %v4227_v24 = vld [vmem:[#allocation2] ss:$0 sm:$0xff] }
 0x395   :  { %v3375_v27 = vpop.f32.mrf.mxu1  ;;  %v3446_v30 = vpop.f32.mrf.mxu0 }
 0x396   :  { %v3307_v31 = vadd.f32 %v3306_v26, %v3236_v28  ;;  %v3376_v33 = vadd.f32 %v3375_v27, %v3305_v29 }
 0x397   :  { %v3377_v32 = vpop.f32.mrf.mxu1  ;;  %v3448_v34 = vpop.f32.mrf.mxu0 }
 0x398   :  { %v3378_v36 = vadd.f32 %v3377_v32, %v3307_v31  ;;  %v3447_v37 = vadd.f32 %v3446_v30, %v3376_v33 }
 0x399   :  { %v3517_v35 = vpop.f32.mrf.mxu1 }
 0x39a   :  { %v3449_v39 = vadd.f32 %v3448_v34, %v3378_v36  ;;  %v3518_v40 = vadd.f32 %v3517_v35, %v3447_v37 }
 0x39b   :  { %v3519_v55 = vpop.f32.mrf.mxu1 }
 0x39c   :  { %v3520_v44 = vadd.f32 %v3519_v55, %v3449_v39 }
 0x3b1   :  { %v3588_v38 = vpop.f32.mrf.mxu0 }
 0x3b2   :  { %v3589_v45 = vadd.f32 %v3588_v38, %v3518_v40 }
 0x3b3   :  { %v3590_v41 = vpop.f32.mrf.mxu0 }
 0x3b4   :  { %v3659_v43 = vpop.f32.mrf.mxu1  ;;  %v3591_v47 = vadd.f32 %v3590_v41, %v3520_v44 }
 0x3b5   :  { %v3660_v49 = vadd.f32 %v3659_v43, %v3589_v45 }
 0x3b6   :  { %v3661_v48 = vpop.f32.mrf.mxu1 }
 0x3b7   :  { %v3662_v51 = vadd.f32 %v3661_v48, %v3591_v47 }
 0x3f3   :  { %v3730_v46 = vpop.f32.mrf.mxu0 }
 0x3f4   :  { %v3731_v52 = vadd.f32 %v3730_v46, %v3660_v49 }
 0x3f5   :  { %v3732_v42 = vpop.f32.mrf.mxu0 }
 0x3f6   :  { %v3801_v50 = vpop.f32.mrf.mxu1  ;;  %v3733_v53 = vadd.f32 %v3732_v42, %v3662_v51 }
 0x3f7   :  { %v3802_v56 = vadd.f32 %v3801_v50, %v3731_v52 }
 0x3f8   :  { %v3803_v54 = vpop.f32.mrf.mxu1 }
 0x3f9   :  { %v3804_v59 = vadd.f32 %v3803_v54, %v3733_v53 }
 0x42f   :  { %v3943_v58 = vpop.f32.mrf.mxu1 }
 0x431   :  { %v3945_v0 = vpop.f32.mrf.mxu1 }
 0x434   :  { %v3872_v57 = vpop.f32.mrf.mxu0 }
 0x435   :  { %v3873_v60 = vadd.f32 %v3872_v57, %v3802_v56 }
 0x436   :  { %v3874_v61 = vpop.f32.mrf.mxu0 }
 0x437   :  { %v3875_v62 = vadd.f32 %v3874_v61, %v3804_v59  ;;  %v3944_v63 = vadd.f32 %v3943_v58, %v3873_v60 }
 0x439   :  { %v3946_v1 = vadd.f32 %v3945_v0, %v3875_v62  ;;  %v3948_v3 = vmax.f32 %v3944_v63, 0.0 }
 0x43b   :  { %v3949_v2 = vmax.f32 %v3946_v1, 0.0 }
 0x43d   :  { %4053 = vmatprep.mubr.f32.mxu1 %v3949_v2 }
 0x43e   :  { %4054 = vmatmul.mubr.f32.vlgmr.msra.gmra.mxu1 %v3948_v3 }
 0x4fe   :  { %v4260_v9 = vpop.f32.mrf.mxu1 }
 0x500   :  { %v4261_v11 = vpop.f32.mrf.mxu1 }
 0x501   :  { %v4262_v12 = vadd.f32 %v4261_v11, %v4260_v9 }
 0x503   :  { %v4056_v13 = vadd.f32 %v4262_v12, %v4224_v10 }
 0x505   :  { %v4059_v14 = vmax.f32 %v4056_v13, 0.0 }
 0x507   :  { %4313 = vmatmul.mubr.f32.vlgmr.msra.gmra.mxu0 %v4059_v14 }
 0x5c7   :  { %v4149_v16 = vpop.f32.mrf.mxu0 }
 0x5c8   :  { %v4150_v18 = vadd.f32 %v4225_v15, %v4149_v16 }
 0x5c9   :  { %v4314_v19 = vpop.f32.mrf.mxu0 }
 0x5ca   :  { %v4153_v21 = vmax.f32 %v4150_v18, 0.0 }
 0x5cc   :  { %v4161_v22 = vmul.f32 %v4226_v20, %v4153_v21 }
 0x5ce   :  { %v4163_v23 = vsel %vm4162_vm3, %v4161_v22, 0.0 }
 0x5cf   :  { %4164 = vadd.xlane.f32.xlu0 %v4163_v23 }
 0x658   :  { %v4165_v25 = vpop.xlane.xlu0 %4164 }
 0x659   :  { %v4173_v17 = vadd.f32 %v4227_v24, %v4165_v25 }
 0x65b   :  { %4175 = vst.msk [vmem:[#allocation14] sm:$0xff] %vm4174_vm4, %v4173_v17 }
 0x662   :  { %v4194_v26 = vld [vmem:[#allocation14] sm:$0x3] }
 0x663   :  { %4195 = vst [vmem:[%s4701_s9] sm:$0x3] %v4194_v26 }
 0x664   :  { %4213 = vsyncpa [#allocation4], 1 }
 0x665   :  { %4214 = vsyncpa [#allocation6], 1 }
 0x666   :  { %4215 = vsyncpa [#allocation9], 1 }
 0x667   :  { %4216 = vsyncpa [#allocation12], 1 }

</bundles_post_ra>
